<compile_context>
chip_gen: v5e
topology: v5e:2x2
jax: 0.10.0
libtpu: 0.0.40
codegen_flags: <defaults>
</compile_context>

<pallas_src>
import jax
import jax.numpy as jnp
from jax import lax
from jax.experimental import pallas as pl
from jax.experimental.pallas import tpu as pltpu

LANE = 128
SUBLANE = 8  # f32 sublane tile; h/c state is carried in f32


def _round_up(x, m):
    return (x + m - 1) // m * m


# ---------------------------------------------------------------------------
# Fused kernel: input projection -> LSTM recurrence -> FC, all VMEM-resident.
#   x_ref    : (T*Bp, Hp)   bf16   embedded inputs, time-major, batch-padded
#   wih_ref  : (Hp, 4Hp)    bf16   input->gates weight (transposed, gate-padded)
#   whh_ref  : (Hp, 4Hp)    bf16   hidden->gates weight (transposed, gate-padded)
#   b_ref    : (1, 4Hp)     f32    b_ih + b_hh, gate-padded
#   wfc_ref  : (Hp, Vp)     bf16   FC weight (transposed, padded)
#   bfc_ref  : (1, Vp)      f32
#   h0_ref/c0_ref : (Bp, Hp) f32
# outputs:
#   logits_ref : (T*Bp, Vp) f32    (lane-dense -> unmasked stores)
#   hn_ref/cn_ref : (Bp, Hp) f32
# scratch:
#   xw_sc   : (T*Bp, 4Hp)   f32    hoisted x @ W_ih^T + b
#   hall_sc : (T*Bp, Hp)    f32    all hidden states (feeds the fused FC)
# ---------------------------------------------------------------------------
def _fused_char_lstm_kernel(x_ref, wih_ref, whh_ref, b_ref, wfc_ref, bfc_ref,
                            h0_ref, c0_ref,
                            logits_ref, hn_ref, cn_ref,
                            xw_sc, hall_sc):
    TB = x_ref.shape[0]
    Bp = h0_ref.shape[0]
    Hp = whh_ref.shape[0]
    T = TB // Bp

    # (1) Input projection hoisted out of the recurrence: one (T*Bp, Hp)@(Hp, 4Hp)
    #     bf16 matmul with f32 accumulation, result stays in VMEM scratch.
    xw_sc[...] = (jnp.dot(x_ref[...], wih_ref[...],
                          preferred_element_type=jnp.float32)
                  + b_ref[...])

    # (2) Sequential recurrence. Only h_{t-1} @ W_hh remains on the critical path.
    # TODO(synk): on v6e/v7x make W_hh weight-stationary across the loop with
    # pltpu.matmul_push_rhs (once) + matmul_acc_lhs/matmul_pop per step.
    def step(t, carry):
        h_prev, c_prev = carry
        off = pl.multiple_of(t * Bp, Bp)
        gates = xw_sc[pl.ds(off, Bp), :] + jnp.dot(
            h_prev.astype(whh_ref.dtype), whh_ref[...],
            preferred_element_type=jnp.float32)
        # Each gate slice is a whole Hp(=128)-lane tile -> free views.
        i_g = jax.nn.sigmoid(gates[:, 0 * Hp:1 * Hp])
        f_g = jax.nn.sigmoid(gates[:, 1 * Hp:2 * Hp])
        g_g = jnp.tanh(gates[:, 2 * Hp:3 * Hp])
        o_g = jax.nn.sigmoid(gates[:, 3 * Hp:4 * Hp])
        c_new = f_g * c_prev + i_g * g_g
        h_new = o_g * jnp.tanh(c_new)
        hall_sc[pl.ds(off, Bp), :] = h_new        # unmasked (8,128) f32 store
        return (h_new, c_new)

    unroll = True if T <= 8 else 8                # partial unroll for long T
    h_fin, c_fin = lax.fori_loop(0, T, step, (h0_ref[...], c0_ref[...]),
                                 unroll=unroll)
    hn_ref[...] = h_fin
    cn_ref[...] = c_fin

    # (3) Output projection hoisted out of the recurrence: one (T*Bp, Hp)@(Hp, Vp)
    #     bf16 matmul, lane-dense f32 store straight to the output.
    logits_ref[...] = (jnp.dot(hall_sc[...].astype(wfc_ref.dtype), wfc_ref[...],
                               preferred_element_type=jnp.float32)
                       + bfc_ref[...]).astype(logits_ref.dtype)
    # TODO(synk): for long T / large B, add a grid: leading "parallel" batch-chunk
    # axis (splits across v7x's two TensorCores) and a T-chunked "arbitrary" axis
    # with h/c carried in VMEM scratch; re-derive residency for v7x's 64 MiB VMEM
    # and set pltpu.CompilerParams(vmem_limit_bytes=...).
    # TODO(synk): at production vocab sizes, tile the FC over N (lane-dense blocks,
    # pl.Buffered on the W_fc spec) instead of keeping W_fc fully resident.


# ---------------------------------------------------------------------------
# One-time weight preparation (OUTSIDE the jitted forward): PyTorch (4H, H) gate
# weights -> transposed, lane-aligned, gate-padded (Hp, 4Hp), bf16 for the MXU.
# Gate k occupies columns [k*Hp, k*Hp + H); all padding is zero.
# ---------------------------------------------------------------------------
def _pad_gate_mat(w_t, H, Hp):
    out = jnp.zeros((Hp, 4 * Hp), jnp.float32)
    for k in range(4):
        out = out.at[:H, k * Hp:k * Hp + H].set(w_t[:, k * H:(k + 1) * H])
    return out


def _pad_gate_vec(b, H, Hp):
    out = jnp.zeros((1, 4 * Hp), jnp.float32)
    for k in range(4):
        out = out.at[0, k * Hp:k * Hp + H].set(b[k * H:(k + 1) * H])
    return out


def prepare_params(params):
    """Pad/transpose/cast weights once; returns a dict of device arrays only."""
    emb = params["embed"]                      # (V, H)
    V, H = emb.shape
    Hp = _round_up(H, LANE)
    Vp = _round_up(V, LANE)
    b = params["b_ih"] + params["b_hh"]
    return {
        "emb_p": jnp.zeros((V, Hp), jnp.float32).at[:, :H].set(emb)
                 .astype(jnp.bfloat16),                                   # (V, Hp)
        "wih_p": _pad_gate_mat(params["W_ih"].T, H, Hp).astype(jnp.bfloat16),
        "whh_p": _pad_gate_mat(params["W_hh"].T, H, Hp).astype(jnp.bfloat16),
        "b_p": _pad_gate_vec(b, H, Hp),                                   # f32
        "wfc_p": jnp.zeros((Hp, Vp), jnp.float32).at[:H, :V]
                 .set(params["W_fc"].T).astype(jnp.bfloat16),             # (Hp, Vp)
        "bfc_p": jnp.zeros((1, Vp), jnp.float32).at[0, :V].set(params["b_fc"]),
    }


def char_lstm_forward(x_tokens, hidden, prepped):
    """x_tokens: (B, T) int32 token ids; hidden = (h0, c0) each (1, B, H).
    `prepped` must come from prepare_params (padded/cast weights)."""
    B, T = x_tokens.shape
    V = prepped["emb_p"].shape[0]
    Hp = prepped["whh_p"].shape[0]
    Vp = prepped["wfc_p"].shape[1]
    H = hidden[0].shape[2]
    Bp = _round_up(B, SUBLANE)

    # --- embedding gather (XLA glue), time-major, batch-padded ----------------
    # TODO(synk): fuse the gather into the kernel via PrefetchScalarGridSpec +
    # pl.Element row indexing at real vocab sizes.
    tok_p = jnp.zeros((Bp, T), jnp.int32).at[:B, :].set(x_tokens)
    x_tm = jnp.take(prepped["emb_p"], tok_p.T, axis=0)          # (T, Bp, Hp) bf16
    x2d = x_tm.reshape(T * Bp, Hp)

    h0_p = jnp.zeros((Bp, Hp), jnp.float32).at[:B, :H].set(hidden[0][0])
    c0_p = jnp.zeros((Bp, Hp), jnp.float32).at[:B, :H].set(hidden[1][0])

    vmem = pl.BlockSpec(memory_space=pltpu.MemorySpace.VMEM)
    logits_p, hn_p, cn_p = pl.pallas_call(
        _fused_char_lstm_kernel,
        out_shape=(jax.ShapeDtypeStruct((T * Bp, Vp), jnp.float32),
                   jax.ShapeDtypeStruct((Bp, Hp), jnp.float32),
                   jax.ShapeDtypeStruct((Bp, Hp), jnp.float32)),
        in_specs=[vmem] * 8,
        out_specs=(vmem, vmem, vmem),
        scratch_shapes=[pltpu.VMEM((T * Bp, 4 * Hp), jnp.float32),   # xw
                        pltpu.VMEM((T * Bp, Hp), jnp.float32)],      # h_all
    )(x2d, prepped["wih_p"], prepped["whh_p"], prepped["b_p"],
      prepped["wfc_p"], prepped["bfc_p"], h0_p, c0_p)

    out = jnp.transpose(logits_p.reshape(T, Bp, Vp), (1, 0, 2))[:B, :, :V]
    hidden_out = (hn_p[:B, :H][None], cn_p[:B, :H][None])
    return out, hidden_out


def init_params(key, vocab_size, hidden_size):
    H, V = hidden_size, vocab_size
    k = jax.random.split(key, 7)
    s = 1.0 / jnp.sqrt(H)
    return {
        "embed": jax.random.normal(k[0], (V, H), jnp.float32),
        "W_ih": jax.random.uniform(k[1], (4 * H, H), jnp.float32, -s, s),
        "W_hh": jax.random.uniform(k[2], (4 * H, H), jnp.float32, -s, s),
        "b_ih": jax.random.uniform(k[3], (4 * H,), jnp.float32, -s, s),
        "b_hh": jax.random.uniform(k[4], (4 * H,), jnp.float32, -s, s),
        "W_fc": jax.random.uniform(k[5], (V, H), jnp.float32, -s, s),
        "b_fc": jax.random.uniform(k[6], (V,), jnp.float32, -s, s),
    }


def _ref_forward(x_tokens, hidden, params):
    """Pure-JAX reference (lax.scan) for a correctness spot-check."""
    emb = params["embed"]
    W_ih, W_hh = params["W_ih"], params["W_hh"]
    b = params["b_ih"] + params["b_hh"]
    W_fc, b_fc = params["W_fc"], params["b_fc"]
    H = emb.shape[1]
    x = jnp.take(emb, x_tokens, axis=0)             # (B, T, H)
    x_tm = jnp.transpose(x, (1, 0, 2))              # (T, B, H)

    def step(carry, x_t):
        h, c = carry
        g = x_t @ W_ih.T + h @ W_hh.T + b
        i = jax.nn.sigmoid(g[:, 0 * H:1 * H])
        f = jax.nn.sigmoid(g[:, 1 * H:2 * H])
        gg = jnp.tanh(g[:, 2 * H:3 * H])
        o = jax.nn.sigmoid(g[:, 3 * H:4 * H])
        c = f * c + i * gg
        h = o * jnp.tanh(c)
        return (h, c), h

    (hN, cN), hs = lax.scan(step, (hidden[0][0], hidden[1][0]), x_tm)
    out = jnp.einsum("tbh,vh->btv", hs, W_fc) + b_fc
    return out, (hN[None], cN[None])


if __name__ == "__main__":
    vocab_size, hidden_size, num_layers = 64, 32, 1
    batch, seq = 2, 8

    key = jax.random.PRNGKey(0)
    pkey, xkey = jax.random.split(key)
    params = init_params(pkey, vocab_size, hidden_size)
    prepped = prepare_params(params)                 # one-time, outside jit

    x = jax.random.randint(xkey, (batch, seq), 0, vocab_size, jnp.int32)
    h0 = jnp.zeros((num_layers, batch, hidden_size), jnp.float32)
    c0 = jnp.zeros((num_layers, batch, hidden_size), jnp.float32)

    fwd = jax.jit(char_lstm_forward)
    out, (h_n, c_n) = fwd(x, (h0, c0), prepped)
    jax.block_until_ready((out, h_n, c_n))

    assert out.shape == (batch, seq, vocab_size)
    assert h_n.shape == (num_layers, batch, hidden_size)
    assert c_n.shape == (num_layers, batch, hidden_size)

    ref_out, (ref_h, ref_c) = _ref_forward(x, (h0, c0), params)
    assert jnp.allclose(out, ref_out, atol=3e-2, rtol=3e-2)
    assert jnp.allclose(h_n, ref_h, atol=3e-2, rtol=3e-2)
    assert jnp.allclose(c_n, ref_c, atol=3e-2, rtol=3e-2)

    print("KERNEL_OK")
</pallas_src>

<mosaic_0001>
module attributes {stable_mosaic.version = 11 : i64} {
  func.func @_fused_char_lstm_kernel(%arg0: memref<64x128xbf16, #tpu.memory_space<vmem>>, %arg1: memref<128x512xbf16, #tpu.memory_space<vmem>>, %arg2: memref<128x512xbf16, #tpu.memory_space<vmem>>, %arg3: memref<1x512xf32, #tpu.memory_space<vmem>>, %arg4: memref<128x128xbf16, #tpu.memory_space<vmem>>, %arg5: memref<1x128xf32, #tpu.memory_space<vmem>>, %arg6: memref<8x128xf32, #tpu.memory_space<vmem>>, %arg7: memref<8x128xf32, #tpu.memory_space<vmem>>, %arg8: memref<64x128xf32, #tpu.memory_space<vmem>>, %arg9: memref<8x128xf32, #tpu.memory_space<vmem>>, %arg10: memref<8x128xf32, #tpu.memory_space<vmem>>, %arg11: memref<64x512xf32, #tpu.memory_space<vmem>>, %arg12: memref<64x128xf32, #tpu.memory_space<vmem>>) attributes {dimension_semantics = [], scalar_prefetch = 0 : i64, scratch_operands = 2 : i64, tpu.core_type = #tpu.core_type<tc>} {
    %c0 = arith.constant 0 : index
    %c0_0 = arith.constant 0 : index
    %0 = vector.load %arg0[%c0, %c0_0] : memref<64x128xbf16, #tpu.memory_space<vmem>>, vector<64x128xbf16>
    %c0_1 = arith.constant 0 : index
    %c0_2 = arith.constant 0 : index
    %1 = vector.load %arg1[%c0_1, %c0_2] : memref<128x512xbf16, #tpu.memory_space<vmem>>, vector<128x512xbf16>
    %cst = arith.constant dense<0.000000e+00> : vector<64x512xf32>
    %2 = tpu.matmul %0, %1, %cst {dimension_numbers = #tpu.dot_dimension_numbers<[1], [0], [0], [1], [0, 0, 1, 1], [], []>} : vector<64x128xbf16>, vector<128x512xbf16>, vector<64x512xf32> -> vector<64x512xf32>
    %c0_3 = arith.constant 0 : index
    %c0_4 = arith.constant 0 : index
    %3 = vector.load %arg3[%c0_3, %c0_4] : memref<1x512xf32, #tpu.memory_space<vmem>>, vector<1x512xf32>
    %4 = vector.broadcast %3 : vector<1x512xf32> to vector<64x512xf32>
    %5 = arith.addf %2, %4 : vector<64x512xf32>
    %c0_5 = arith.constant 0 : index
    %c0_6 = arith.constant 0 : index
    %6 = vector.load %arg11[%c0_5, %c0_6] : memref<64x512xf32, #tpu.memory_space<vmem>>, vector<64x512xf32>
    tpu.vector_store %arg11[%c0_5, %c0_6], %5 {strides = array<i32>} : memref<64x512xf32, #tpu.memory_space<vmem>>, vector<64x512xf32>,
    %c0_7 = arith.constant 0 : index
    %c0_8 = arith.constant 0 : index
    %7 = vector.load %arg6[%c0_7, %c0_8] : memref<8x128xf32, #tpu.memory_space<vmem>>, vector<8x128xf32>
    %c0_9 = arith.constant 0 : index
    %c0_10 = arith.constant 0 : index
    %8 = vector.load %arg7[%c0_9, %c0_10] : memref<8x128xf32, #tpu.memory_space<vmem>>, vector<8x128xf32>
    %c0_i32 = arith.constant 0 : i32
    %c8_i32 = arith.constant 8 : i32
    %9 = arith.muli %c0_i32, %c8_i32 : i32
    %10 = tpu.assume_multiple %9, 8 : i32
    %11 = arith.index_cast %10 : i32 to index
    %c0_11 = arith.constant 0 : index
    %12 = vector.load %arg11[%11, %c0_11] : memref<64x512xf32, #tpu.memory_space<vmem>>, vector<8x512xf32>
    %13 = arith.truncf %7 : vector<8x128xf32> to vector<8x128xbf16>
    %c0_12 = arith.constant 0 : index
    %c0_13 = arith.constant 0 : index
    %14 = vector.load %arg2[%c0_12, %c0_13] : memref<128x512xbf16, #tpu.memory_space<vmem>>, vector<128x512xbf16>
    %cst_14 = arith.constant dense<0.000000e+00> : vector<8x512xf32>
    %15 = tpu.matmul %13, %14, %cst_14 {dimension_numbers = #tpu.dot_dimension_numbers<[1], [0], [0], [1], [0, 0, 1, 1], [], []>} : vector<8x128xbf16>, vector<128x512xbf16>, vector<8x512xf32> -> vector<8x512xf32>
    %16 = arith.addf %12, %15 : vector<8x512xf32>
    %17 = vector.extract_strided_slice %16 {offsets = [0, 0], sizes = [8, 128], strides = [1, 1]} : vector<8x512xf32> to vector<8x128xf32>
    %18 = arith.negf %17 : vector<8x128xf32>
    %19 = math.exp %18 : vector<8x128xf32>
    %cst_15 = arith.constant 1.000000e+00 : f32
    %20 = vector.broadcast %cst_15 : f32 to vector<8x128xf32>
    %21 = arith.addf %20, %19 : vector<8x128xf32>
    %22 = arith.divf %20, %21 : vector<8x128xf32>
    %23 = vector.extract_strided_slice %16 {offsets = [0, 128], sizes = [8, 128], strides = [1, 1]} : vector<8x512xf32> to vector<8x128xf32>
    %24 = arith.negf %23 : vector<8x128xf32>
    %25 = math.exp %24 : vector<8x128xf32>
    %cst_16 = arith.constant 1.000000e+00 : f32
    %26 = vector.broadcast %cst_16 : f32 to vector<8x128xf32>
    %27 = arith.addf %26, %25 : vector<8x128xf32>
    %28 = arith.divf %26, %27 : vector<8x128xf32>
    %29 = vector.extract_strided_slice %16 {offsets = [0, 256], sizes = [8, 128], strides = [1, 1]} : vector<8x512xf32> to vector<8x128xf32>
    %30 = math.tanh %29 : vector<8x128xf32>
    %31 = vector.extract_strided_slice %16 {offsets = [0, 384], sizes = [8, 128], strides = [1, 1]} : vector<8x512xf32> to vector<8x128xf32>
    %32 = arith.negf %31 : vector<8x128xf32>
    %33 = math.exp %32 : vector<8x128xf32>
    %cst_17 = arith.constant 1.000000e+00 : f32
    %34 = vector.broadcast %cst_17 : f32 to vector<8x128xf32>
    %35 = arith.addf %34, %33 : vector<8x128xf32>
    %36 = arith.divf %34, %35 : vector<8x128xf32>
    %37 = arith.mulf %28, %8 : vector<8x128xf32>
    %38 = arith.mulf %22, %30 : vector<8x128xf32>
    %39 = arith.addf %37, %38 : vector<8x128xf32>
    %40 = math.tanh %39 : vector<8x128xf32>
    %41 = arith.mulf %36, %40 : vector<8x128xf32>
    %42 = arith.index_cast %10 : i32 to index
    %c0_18 = arith.constant 0 : index
    %43 = vector.load %arg12[%42, %c0_18] : memref<64x128xf32, #tpu.memory_space<vmem>>, vector<8x128xf32>
    tpu.vector_store %arg12[%42, %c0_18], %41 {strides = array<i32>} : memref<64x128xf32, #tpu.memory_space<vmem>>, vector<8x128xf32>,
    %c1_i32 = arith.constant 1 : i32
    %c8_i32_19 = arith.constant 8 : i32
    %44 = arith.muli %c1_i32, %c8_i32_19 : i32
    %45 = tpu.assume_multiple %44, 8 : i32
    %46 = arith.index_cast %45 : i32 to index
    %c0_20 = arith.constant 0 : index
    %47 = vector.load %arg11[%46, %c0_20] : memref<64x512xf32, #tpu.memory_space<vmem>>, vector<8x512xf32>
    %48 = arith.truncf %41 : vector<8x128xf32> to vector<8x128xbf16>
    %c0_21 = arith.constant 0 : index
    %c0_22 = arith.constant 0 : index
    %49 = vector.load %arg2[%c0_21, %c0_22] : memref<128x512xbf16, #tpu.memory_space<vmem>>, vector<128x512xbf16>
    %cst_23 = arith.constant dense<0.000000e+00> : vector<8x512xf32>
    %50 = tpu.matmul %48, %49, %cst_23 {dimension_numbers = #tpu.dot_dimension_numbers<[1], [0], [0], [1], [0, 0, 1, 1], [], []>} : vector<8x128xbf16>, vector<128x512xbf16>, vector<8x512xf32> -> vector<8x512xf32>
    %51 = arith.addf %47, %50 : vector<8x512xf32>
    %52 = vector.extract_strided_slice %51 {offsets = [0, 0], sizes = [8, 128], strides = [1, 1]} : vector<8x512xf32> to vector<8x128xf32>
    %53 = arith.negf %52 : vector<8x128xf32>
    %54 = math.exp %53 : vector<8x128xf32>
    %cst_24 = arith.constant 1.000000e+00 : f32
    %55 = vector.broadcast %cst_24 : f32 to vector<8x128xf32>
    %56 = arith.addf %55, %54 : vector<8x128xf32>
    %57 = arith.divf %55, %56 : vector<8x128xf32>
    %58 = vector.extract_strided_slice %51 {offsets = [0, 128], sizes = [8, 128], strides = [1, 1]} : vector<8x512xf32> to vector<8x128xf32>
    %59 = arith.negf %58 : vector<8x128xf32>
    %60 = math.exp %59 : vector<8x128xf32>
    %cst_25 = arith.constant 1.000000e+00 : f32
    %61 = vector.broadcast %cst_25 : f32 to vector<8x128xf32>
    %62 = arith.addf %61, %60 : vector<8x128xf32>
    %63 = arith.divf %61, %62 : vector<8x128xf32>
    %64 = vector.extract_strided_slice %51 {offsets = [0, 256], sizes = [8, 128], strides = [1, 1]} : vector<8x512xf32> to vector<8x128xf32>
    %65 = math.tanh %64 : vector<8x128xf32>
    %66 = vector.extract_strided_slice %51 {offsets = [0, 384], sizes = [8, 128], strides = [1, 1]} : vector<8x512xf32> to vector<8x128xf32>
    %67 = arith.negf %66 : vector<8x128xf32>
    %68 = math.exp %67 : vector<8x128xf32>
    %cst_26 = arith.constant 1.000000e+00 : f32
    %69 = vector.broadcast %cst_26 : f32 to vector<8x128xf32>
    %70 = arith.addf %69, %68 : vector<8x128xf32>
    %71 = arith.divf %69, %70 : vector<8x128xf32>
    %72 = arith.mulf %63, %39 : vector<8x128xf32>
    %73 = arith.mulf %57, %65 : vector<8x128xf32>
    %74 = arith.addf %72, %73 : vector<8x128xf32>
    %75 = math.tanh %74 : vector<8x128xf32>
    %76 = arith.mulf %71, %75 : vector<8x128xf32>
    %77 = arith.index_cast %45 : i32 to index
    %c0_27 = arith.constant 0 : index
    %78 = vector.load %arg12[%77, %c0_27] : memref<64x128xf32, #tpu.memory_space<vmem>>, vector<8x128xf32>
    tpu.vector_store %arg12[%77, %c0_27], %76 {strides = array<i32>} : memref<64x128xf32, #tpu.memory_space<vmem>>, vector<8x128xf32>,
    %c2_i32 = arith.constant 2 : i32
    %c8_i32_28 = arith.constant 8 : i32
    %79 = arith.muli %c2_i32, %c8_i32_28 : i32
    %80 = tpu.assume_multiple %79, 8 : i32
    %81 = arith.index_cast %80 : i32 to index
    %c0_29 = arith.constant 0 : index
    %82 = vector.load %arg11[%81, %c0_29] : memref<64x512xf32, #tpu.memory_space<vmem>>, vector<8x512xf32>
    %83 = arith.truncf %76 : vector<8x128xf32> to vector<8x128xbf16>
    %c0_30 = arith.constant 0 : index
    %c0_31 = arith.constant 0 : index
    %84 = vector.load %arg2[%c0_30, %c0_31] : memref<128x512xbf16, #tpu.memory_space<vmem>>, vector<128x512xbf16>
    %cst_32 = arith.constant dense<0.000000e+00> : vector<8x512xf32>
    %85 = tpu.matmul %83, %84, %cst_32 {dimension_numbers = #tpu.dot_dimension_numbers<[1], [0], [0], [1], [0, 0, 1, 1], [], []>} : vector<8x128xbf16>, vector<128x512xbf16>, vector<8x512xf32> -> vector<8x512xf32>
    %86 = arith.addf %82, %85 : vector<8x512xf32>
    %87 = vector.extract_strided_slice %86 {offsets = [0, 0], sizes = [8, 128], strides = [1, 1]} : vector<8x512xf32> to vector<8x128xf32>
    %88 = arith.negf %87 : vector<8x128xf32>
    %89 = math.exp %88 : vector<8x128xf32>
    %cst_33 = arith.constant 1.000000e+00 : f32
    %90 = vector.broadcast %cst_33 : f32 to vector<8x128xf32>
    %91 = arith.addf %90, %89 : vector<8x128xf32>
    %92 = arith.divf %90, %91 : vector<8x128xf32>
    %93 = vector.extract_strided_slice %86 {offsets = [0, 128], sizes = [8, 128], strides = [1, 1]} : vector<8x512xf32> to vector<8x128xf32>
    %94 = arith.negf %93 : vector<8x128xf32>
    %95 = math.exp %94 : vector<8x128xf32>
    %cst_34 = arith.constant 1.000000e+00 : f32
    %96 = vector.broadcast %cst_34 : f32 to vector<8x128xf32>
    %97 = arith.addf %96, %95 : vector<8x128xf32>
    %98 = arith.divf %96, %97 : vector<8x128xf32>
    %99 = vector.extract_strided_slice %86 {offsets = [0, 256], sizes = [8, 128], strides = [1, 1]} : vector<8x512xf32> to vector<8x128xf32>
    %100 = math.tanh %99 : vector<8x128xf32>
    %101 = vector.extract_strided_slice %86 {offsets = [0, 384], sizes = [8, 128], strides = [1, 1]} : vector<8x512xf32> to vector<8x128xf32>
    %102 = arith.negf %101 : vector<8x128xf32>
    %103 = math.exp %102 : vector<8x128xf32>
    %cst_35 = arith.constant 1.000000e+00 : f32
    %104 = vector.broadcast %cst_35 : f32 to vector<8x128xf32>
    %105 = arith.addf %104, %103 : vector<8x128xf32>
    %106 = arith.divf %104, %105 : vector<8x128xf32>
    %107 = arith.mulf %98, %74 : vector<8x128xf32>
    %108 = arith.mulf %92, %100 : vector<8x128xf32>
    %109 = arith.addf %107, %108 : vector<8x128xf32>
    %110 = math.tanh %109 : vector<8x128xf32>
    %111 = arith.mulf %106, %110 : vector<8x128xf32>
    %112 = arith.index_cast %80 : i32 to index
    %c0_36 = arith.constant 0 : index
    %113 = vector.load %arg12[%112, %c0_36] : memref<64x128xf32, #tpu.memory_space<vmem>>, vector<8x128xf32>
    tpu.vector_store %arg12[%112, %c0_36], %111 {strides = array<i32>} : memref<64x128xf32, #tpu.memory_space<vmem>>, vector<8x128xf32>,
    %c3_i32 = arith.constant 3 : i32
    %c8_i32_37 = arith.constant 8 : i32
    %114 = arith.muli %c3_i32, %c8_i32_37 : i32
    %115 = tpu.assume_multiple %114, 8 : i32
    %116 = arith.index_cast %115 : i32 to index
    %c0_38 = arith.constant 0 : index
    %117 = vector.load %arg11[%116, %c0_38] : memref<64x512xf32, #tpu.memory_space<vmem>>, vector<8x512xf32>
    %118 = arith.truncf %111 : vector<8x128xf32> to vector<8x128xbf16>
    %c0_39 = arith.constant 0 : index
    %c0_40 = arith.constant 0 : index
    %119 = vector.load %arg2[%c0_39, %c0_40] : memref<128x512xbf16, #tpu.memory_space<vmem>>, vector<128x512xbf16>
    %cst_41 = arith.constant dense<0.000000e+00> : vector<8x512xf32>
    %120 = tpu.matmul %118, %119, %cst_41 {dimension_numbers = #tpu.dot_dimension_numbers<[1], [0], [0], [1], [0, 0, 1, 1], [], []>} : vector<8x128xbf16>, vector<128x512xbf16>, vector<8x512xf32> -> vector<8x512xf32>
    %121 = arith.addf %117, %120 : vector<8x512xf32>
    %122 = vector.extract_strided_slice %121 {offsets = [0, 0], sizes = [8, 128], strides = [1, 1]} : vector<8x512xf32> to vector<8x128xf32>
    %123 = arith.negf %122 : vector<8x128xf32>
    %124 = math.exp %123 : vector<8x128xf32>
    %cst_42 = arith.constant 1.000000e+00 : f32
    %125 = vector.broadcast %cst_42 : f32 to vector<8x128xf32>
    %126 = arith.addf %125, %124 : vector<8x128xf32>
    %127 = arith.divf %125, %126 : vector<8x128xf32>
    %128 = vector.extract_strided_slice %121 {offsets = [0, 128], sizes = [8, 128], strides = [1, 1]} : vector<8x512xf32> to vector<8x128xf32>
    %129 = arith.negf %128 : vector<8x128xf32>
    %130 = math.exp %129 : vector<8x128xf32>
    %cst_43 = arith.constant 1.000000e+00 : f32
    %131 = vector.broadcast %cst_43 : f32 to vector<8x128xf32>
    %132 = arith.addf %131, %130 : vector<8x128xf32>
    %133 = arith.divf %131, %132 : vector<8x128xf32>
    %134 = vector.extract_strided_slice %121 {offsets = [0, 256], sizes = [8, 128], strides = [1, 1]} : vector<8x512xf32> to vector<8x128xf32>
    %135 = math.tanh %134 : vector<8x128xf32>
    %136 = vector.extract_strided_slice %121 {offsets = [0, 384], sizes = [8, 128], strides = [1, 1]} : vector<8x512xf32> to vector<8x128xf32>
    %137 = arith.negf %136 : vector<8x128xf32>
    %138 = math.exp %137 : vector<8x128xf32>
    %cst_44 = arith.constant 1.000000e+00 : f32
    %139 = vector.broadcast %cst_44 : f32 to vector<8x128xf32>
    %140 = arith.addf %139, %138 : vector<8x128xf32>
    %141 = arith.divf %139, %140 : vector<8x128xf32>
    %142 = arith.mulf %133, %109 : vector<8x128xf32>
    %143 = arith.mulf %127, %135 : vector<8x128xf32>
    %144 = arith.addf %142, %143 : vector<8x128xf32>
    %145 = math.tanh %144 : vector<8x128xf32>
    %146 = arith.mulf %141, %145 : vector<8x128xf32>
    %147 = arith.index_cast %115 : i32 to index
    %c0_45 = arith.constant 0 : index
    %148 = vector.load %arg12[%147, %c0_45] : memref<64x128xf32, #tpu.memory_space<vmem>>, vector<8x128xf32>
    tpu.vector_store %arg12[%147, %c0_45], %146 {strides = array<i32>} : memref<64x128xf32, #tpu.memory_space<vmem>>, vector<8x128xf32>,
    %c4_i32 = arith.constant 4 : i32
    %c8_i32_46 = arith.constant 8 : i32
    %149 = arith.muli %c4_i32, %c8_i32_46 : i32
    %150 = tpu.assume_multiple %149, 8 : i32
    %151 = arith.index_cast %150 : i32 to index
    %c0_47 = arith.constant 0 : index
    %152 = vector.load %arg11[%151, %c0_47] : memref<64x512xf32, #tpu.memory_space<vmem>>, vector<8x512xf32>
    %153 = arith.truncf %146 : vector<8x128xf32> to vector<8x128xbf16>
    %c0_48 = arith.constant 0 : index
    %c0_49 = arith.constant 0 : index
    %154 = vector.load %arg2[%c0_48, %c0_49] : memref<128x512xbf16, #tpu.memory_space<vmem>>, vector<128x512xbf16>
    %cst_50 = arith.constant dense<0.000000e+00> : vector<8x512xf32>
    %155 = tpu.matmul %153, %154, %cst_50 {dimension_numbers = #tpu.dot_dimension_numbers<[1], [0], [0], [1], [0, 0, 1, 1], [], []>} : vector<8x128xbf16>, vector<128x512xbf16>, vector<8x512xf32> -> vector<8x512xf32>
    %156 = arith.addf %152, %155 : vector<8x512xf32>
    %157 = vector.extract_strided_slice %156 {offsets = [0, 0], sizes = [8, 128], strides = [1, 1]} : vector<8x512xf32> to vector<8x128xf32>
    %158 = arith.negf %157 : vector<8x128xf32>
    %159 = math.exp %158 : vector<8x128xf32>
    %cst_51 = arith.constant 1.000000e+00 : f32
    %160 = vector.broadcast %cst_51 : f32 to vector<8x128xf32>
    %161 = arith.addf %160, %159 : vector<8x128xf32>
    %162 = arith.divf %160, %161 : vector<8x128xf32>
    %163 = vector.extract_strided_slice %156 {offsets = [0, 128], sizes = [8, 128], strides = [1, 1]} : vector<8x512xf32> to vector<8x128xf32>
    %164 = arith.negf %163 : vector<8x128xf32>
    %165 = math.exp %164 : vector<8x128xf32>
    %cst_52 = arith.constant 1.000000e+00 : f32
    %166 = vector.broadcast %cst_52 : f32 to vector<8x128xf32>
    %167 = arith.addf %166, %165 : vector<8x128xf32>
    %168 = arith.divf %166, %167 : vector<8x128xf32>
    %169 = vector.extract_strided_slice %156 {offsets = [0, 256], sizes = [8, 128], strides = [1, 1]} : vector<8x512xf32> to vector<8x128xf32>
    %170 = math.tanh %169 : vector<8x128xf32>
    %171 = vector.extract_strided_slice %156 {offsets = [0, 384], sizes = [8, 128], strides = [1, 1]} : vector<8x512xf32> to vector<8x128xf32>
    %172 = arith.negf %171 : vector<8x128xf32>
    %173 = math.exp %172 : vector<8x128xf32>
    %cst_53 = arith.constant 1.000000e+00 : f32
    %174 = vector.broadcast %cst_53 : f32 to vector<8x128xf32>
    %175 = arith.addf %174, %173 : vector<8x128xf32>
    %176 = arith.divf %174, %175 : vector<8x128xf32>
    %177 = arith.mulf %168, %144 : vector<8x128xf32>
    %178 = arith.mulf %162, %170 : vector<8x128xf32>
    %179 = arith.addf %177, %178 : vector<8x128xf32>
    %180 = math.tanh %179 : vector<8x128xf32>
    %181 = arith.mulf %176, %180 : vector<8x128xf32>
    %182 = arith.index_cast %150 : i32 to index
    %c0_54 = arith.constant 0 : index
    %183 = vector.load %arg12[%182, %c0_54] : memref<64x128xf32, #tpu.memory_space<vmem>>, vector<8x128xf32>
    tpu.vector_store %arg12[%182, %c0_54], %181 {strides = array<i32>} : memref<64x128xf32, #tpu.memory_space<vmem>>, vector<8x128xf32>,
    %c5_i32 = arith.constant 5 : i32
    %c8_i32_55 = arith.constant 8 : i32
    %184 = arith.muli %c5_i32, %c8_i32_55 : i32
    %185 = tpu.assume_multiple %184, 8 : i32
    %186 = arith.index_cast %185 : i32 to index
    %c0_56 = arith.constant 0 : index
    %187 = vector.load %arg11[%186, %c0_56] : memref<64x512xf32, #tpu.memory_space<vmem>>, vector<8x512xf32>
    %188 = arith.truncf %181 : vector<8x128xf32> to vector<8x128xbf16>
    %c0_57 = arith.constant 0 : index
    %c0_58 = arith.constant 0 : index
    %189 = vector.load %arg2[%c0_57, %c0_58] : memref<128x512xbf16, #tpu.memory_space<vmem>>, vector<128x512xbf16>
    %cst_59 = arith.constant dense<0.000000e+00> : vector<8x512xf32>
    %190 = tpu.matmul %188, %189, %cst_59 {dimension_numbers = #tpu.dot_dimension_numbers<[1], [0], [0], [1], [0, 0, 1, 1], [], []>} : vector<8x128xbf16>, vector<128x512xbf16>, vector<8x512xf32> -> vector<8x512xf32>
    %191 = arith.addf %187, %190 : vector<8x512xf32>
    %192 = vector.extract_strided_slice %191 {offsets = [0, 0], sizes = [8, 128], strides = [1, 1]} : vector<8x512xf32> to vector<8x128xf32>
    %193 = arith.negf %192 : vector<8x128xf32>
    %194 = math.exp %193 : vector<8x128xf32>
    %cst_60 = arith.constant 1.000000e+00 : f32
    %195 = vector.broadcast %cst_60 : f32 to vector<8x128xf32>
    %196 = arith.addf %195, %194 : vector<8x128xf32>
    %197 = arith.divf %195, %196 : vector<8x128xf32>
    %198 = vector.extract_strided_slice %191 {offsets = [0, 128], sizes = [8, 128], strides = [1, 1]} : vector<8x512xf32> to vector<8x128xf32>
    %199 = arith.negf %198 : vector<8x128xf32>
    %200 = math.exp %199 : vector<8x128xf32>
    %cst_61 = arith.constant 1.000000e+00 : f32
    %201 = vector.broadcast %cst_61 : f32 to vector<8x128xf32>
    %202 = arith.addf %201, %200 : vector<8x128xf32>
    %203 = arith.divf %201, %202 : vector<8x128xf32>
    %204 = vector.extract_strided_slice %191 {offsets = [0, 256], sizes = [8, 128], strides = [1, 1]} : vector<8x512xf32> to vector<8x128xf32>
    %205 = math.tanh %204 : vector<8x128xf32>
    %206 = vector.extract_strided_slice %191 {offsets = [0, 384], sizes = [8, 128], strides = [1, 1]} : vector<8x512xf32> to vector<8x128xf32>
    %207 = arith.negf %206 : vector<8x128xf32>
    %208 = math.exp %207 : vector<8x128xf32>
    %cst_62 = arith.constant 1.000000e+00 : f32
    %209 = vector.broadcast %cst_62 : f32 to vector<8x128xf32>
    %210 = arith.addf %209, %208 : vector<8x128xf32>
    %211 = arith.divf %209, %210 : vector<8x128xf32>
    %212 = arith.mulf %203, %179 : vector<8x128xf32>
    %213 = arith.mulf %197, %205 : vector<8x128xf32>
    %214 = arith.addf %212, %213 : vector<8x128xf32>
    %215 = math.tanh %214 : vector<8x128xf32>
    %216 = arith.mulf %211, %215 : vector<8x128xf32>
    %217 = arith.index_cast %185 : i32 to index
    %c0_63 = arith.constant 0 : index
    %218 = vector.load %arg12[%217, %c0_63] : memref<64x128xf32, #tpu.memory_space<vmem>>, vector<8x128xf32>
    tpu.vector_store %arg12[%217, %c0_63], %216 {strides = array<i32>} : memref<64x128xf32, #tpu.memory_space<vmem>>, vector<8x128xf32>,
    %c6_i32 = arith.constant 6 : i32
    %c8_i32_64 = arith.constant 8 : i32
    %219 = arith.muli %c6_i32, %c8_i32_64 : i32
    %220 = tpu.assume_multiple %219, 8 : i32
    %221 = arith.index_cast %220 : i32 to index
    %c0_65 = arith.constant 0 : index
    %222 = vector.load %arg11[%221, %c0_65] : memref<64x512xf32, #tpu.memory_space<vmem>>, vector<8x512xf32>
    %223 = arith.truncf %216 : vector<8x128xf32> to vector<8x128xbf16>
    %c0_66 = arith.constant 0 : index
    %c0_67 = arith.constant 0 : index
    %224 = vector.load %arg2[%c0_66, %c0_67] : memref<128x512xbf16, #tpu.memory_space<vmem>>, vector<128x512xbf16>
    %cst_68 = arith.constant dense<0.000000e+00> : vector<8x512xf32>
    %225 = tpu.matmul %223, %224, %cst_68 {dimension_numbers = #tpu.dot_dimension_numbers<[1], [0], [0], [1], [0, 0, 1, 1], [], []>} : vector<8x128xbf16>, vector<128x512xbf16>, vector<8x512xf32> -> vector<8x512xf32>
    %226 = arith.addf %222, %225 : vector<8x512xf32>
    %227 = vector.extract_strided_slice %226 {offsets = [0, 0], sizes = [8, 128], strides = [1, 1]} : vector<8x512xf32> to vector<8x128xf32>
    %228 = arith.negf %227 : vector<8x128xf32>
    %229 = math.exp %228 : vector<8x128xf32>
    %cst_69 = arith.constant 1.000000e+00 : f32
    %230 = vector.broadcast %cst_69 : f32 to vector<8x128xf32>
    %231 = arith.addf %230, %229 : vector<8x128xf32>
    %232 = arith.divf %230, %231 : vector<8x128xf32>
    %233 = vector.extract_strided_slice %226 {offsets = [0, 128], sizes = [8, 128], strides = [1, 1]} : vector<8x512xf32> to vector<8x128xf32>
    %234 = arith.negf %233 : vector<8x128xf32>
    %235 = math.exp %234 : vector<8x128xf32>
    %cst_70 = arith.constant 1.000000e+00 : f32
    %236 = vector.broadcast %cst_70 : f32 to vector<8x128xf32>
    %237 = arith.addf %236, %235 : vector<8x128xf32>
    %238 = arith.divf %236, %237 : vector<8x128xf32>
    %239 = vector.extract_strided_slice %226 {offsets = [0, 256], sizes = [8, 128], strides = [1, 1]} : vector<8x512xf32> to vector<8x128xf32>
    %240 = math.tanh %239 : vector<8x128xf32>
    %241 = vector.extract_strided_slice %226 {offsets = [0, 384], sizes = [8, 128], strides = [1, 1]} : vector<8x512xf32> to vector<8x128xf32>
    %242 = arith.negf %241 : vector<8x128xf32>
    %243 = math.exp %242 : vector<8x128xf32>
    %cst_71 = arith.constant 1.000000e+00 : f32
    %244 = vector.broadcast %cst_71 : f32 to vector<8x128xf32>
    %245 = arith.addf %244, %243 : vector<8x128xf32>
    %246 = arith.divf %244, %245 : vector<8x128xf32>
    %247 = arith.mulf %238, %214 : vector<8x128xf32>
    %248 = arith.mulf %232, %240 : vector<8x128xf32>
    %249 = arith.addf %247, %248 : vector<8x128xf32>
    %250 = math.tanh %249 : vector<8x128xf32>
    %251 = arith.mulf %246, %250 : vector<8x128xf32>
    %252 = arith.index_cast %220 : i32 to index
    %c0_72 = arith.constant 0 : index
    %253 = vector.load %arg12[%252, %c0_72] : memref<64x128xf32, #tpu.memory_space<vmem>>, vector<8x128xf32>
    tpu.vector_store %arg12[%252, %c0_72], %251 {strides = array<i32>} : memref<64x128xf32, #tpu.memory_space<vmem>>, vector<8x128xf32>,
    %c7_i32 = arith.constant 7 : i32
    %c8_i32_73 = arith.constant 8 : i32
    %254 = arith.muli %c7_i32, %c8_i32_73 : i32
    %255 = tpu.assume_multiple %254, 8 : i32
    %256 = arith.index_cast %255 : i32 to index
    %c0_74 = arith.constant 0 : index
    %257 = vector.load %arg11[%256, %c0_74] : memref<64x512xf32, #tpu.memory_space<vmem>>, vector<8x512xf32>
    %258 = arith.truncf %251 : vector<8x128xf32> to vector<8x128xbf16>
    %c0_75 = arith.constant 0 : index
    %c0_76 = arith.constant 0 : index
    %259 = vector.load %arg2[%c0_75, %c0_76] : memref<128x512xbf16, #tpu.memory_space<vmem>>, vector<128x512xbf16>
    %cst_77 = arith.constant dense<0.000000e+00> : vector<8x512xf32>
    %260 = tpu.matmul %258, %259, %cst_77 {dimension_numbers = #tpu.dot_dimension_numbers<[1], [0], [0], [1], [0, 0, 1, 1], [], []>} : vector<8x128xbf16>, vector<128x512xbf16>, vector<8x512xf32> -> vector<8x512xf32>
    %261 = arith.addf %257, %260 : vector<8x512xf32>
    %262 = vector.extract_strided_slice %261 {offsets = [0, 0], sizes = [8, 128], strides = [1, 1]} : vector<8x512xf32> to vector<8x128xf32>
    %263 = arith.negf %262 : vector<8x128xf32>
    %264 = math.exp %263 : vector<8x128xf32>
    %cst_78 = arith.constant 1.000000e+00 : f32
    %265 = vector.broadcast %cst_78 : f32 to vector<8x128xf32>
    %266 = arith.addf %265, %264 : vector<8x128xf32>
    %267 = arith.divf %265, %266 : vector<8x128xf32>
    %268 = vector.extract_strided_slice %261 {offsets = [0, 128], sizes = [8, 128], strides = [1, 1]} : vector<8x512xf32> to vector<8x128xf32>
    %269 = arith.negf %268 : vector<8x128xf32>
    %270 = math.exp %269 : vector<8x128xf32>
    %cst_79 = arith.constant 1.000000e+00 : f32
    %271 = vector.broadcast %cst_79 : f32 to vector<8x128xf32>
    %272 = arith.addf %271, %270 : vector<8x128xf32>
    %273 = arith.divf %271, %272 : vector<8x128xf32>
    %274 = vector.extract_strided_slice %261 {offsets = [0, 256], sizes = [8, 128], strides = [1, 1]} : vector<8x512xf32> to vector<8x128xf32>
    %275 = math.tanh %274 : vector<8x128xf32>
    %276 = vector.extract_strided_slice %261 {offsets = [0, 384], sizes = [8, 128], strides = [1, 1]} : vector<8x512xf32> to vector<8x128xf32>
    %277 = arith.negf %276 : vector<8x128xf32>
    %278 = math.exp %277 : vector<8x128xf32>
    %cst_80 = arith.constant 1.000000e+00 : f32
    %279 = vector.broadcast %cst_80 : f32 to vector<8x128xf32>
    %280 = arith.addf %279, %278 : vector<8x128xf32>
    %281 = arith.divf %279, %280 : vector<8x128xf32>
    %282 = arith.mulf %273, %249 : vector<8x128xf32>
    %283 = arith.mulf %267, %275 : vector<8x128xf32>
    %284 = arith.addf %282, %283 : vector<8x128xf32>
    %285 = math.tanh %284 : vector<8x128xf32>
    %286 = arith.mulf %281, %285 : vector<8x128xf32>
    %287 = arith.index_cast %255 : i32 to index
    %c0_81 = arith.constant 0 : index
    %288 = vector.load %arg12[%287, %c0_81] : memref<64x128xf32, #tpu.memory_space<vmem>>, vector<8x128xf32>
    tpu.vector_store %arg12[%287, %c0_81], %286 {strides = array<i32>} : memref<64x128xf32, #tpu.memory_space<vmem>>, vector<8x128xf32>,
    %c8_i32_82 = arith.constant 8 : i32
    %c0_83 = arith.constant 0 : index
    %c0_84 = arith.constant 0 : index
    %289 = vector.load %arg9[%c0_83, %c0_84] : memref<8x128xf32, #tpu.memory_space<vmem>>, vector<8x128xf32>
    tpu.vector_store %arg9[%c0_83, %c0_84], %286 {strides = array<i32>} : memref<8x128xf32, #tpu.memory_space<vmem>>, vector<8x128xf32>,
    %c0_85 = arith.constant 0 : index
    %c0_86 = arith.constant 0 : index
    %290 = vector.load %arg10[%c0_85, %c0_86] : memref<8x128xf32, #tpu.memory_space<vmem>>, vector<8x128xf32>
    tpu.vector_store %arg10[%c0_85, %c0_86], %284 {strides = array<i32>} : memref<8x128xf32, #tpu.memory_space<vmem>>, vector<8x128xf32>,
    %c0_87 = arith.constant 0 : index
    %c0_88 = arith.constant 0 : index
    %291 = vector.load %arg12[%c0_87, %c0_88] : memref<64x128xf32, #tpu.memory_space<vmem>>, vector<64x128xf32>
    %292 = arith.truncf %291 : vector<64x128xf32> to vector<64x128xbf16>
    %c0_89 = arith.constant 0 : index
    %c0_90 = arith.constant 0 : index
    %293 = vector.load %arg4[%c0_89, %c0_90] : memref<128x128xbf16, #tpu.memory_space<vmem>>, vector<128x128xbf16>
    %cst_91 = arith.constant dense<0.000000e+00> : vector<64x128xf32>
    %294 = tpu.matmul %292, %293, %cst_91 {dimension_numbers = #tpu.dot_dimension_numbers<[1], [0], [0], [1], [0, 0, 1, 1], [], []>} : vector<64x128xbf16>, vector<128x128xbf16>, vector<64x128xf32> -> vector<64x128xf32>
    %c0_92 = arith.constant 0 : index
    %c0_93 = arith.constant 0 : index
    %295 = vector.load %arg5[%c0_92, %c0_93] : memref<1x128xf32, #tpu.memory_space<vmem>>, vector<1x128xf32>
    %296 = vector.broadcast %295 : vector<1x128xf32> to vector<64x128xf32>
    %297 = arith.addf %294, %296 : vector<64x128xf32>
    %c0_94 = arith.constant 0 : index
    %c0_95 = arith.constant 0 : index
    %298 = vector.load %arg8[%c0_94, %c0_95] : memref<64x128xf32, #tpu.memory_space<vmem>>, vector<64x128xf32>
    tpu.vector_store %arg8[%c0_94, %c0_95], %297 {strides = array<i32>} : memref<64x128xf32, #tpu.memory_space<vmem>>, vector<64x128xf32>,
    return
  }
}

</mosaic_0001>

<bundles_post_ra>
// kernel: char_lstm_forward.1
= control target key start
LH: loop header
LB: loop body
LE: loop exit
PB: predicated region body
PF: predicated region fallthrough
CT: control target
= control target key end

     0   :  { %16 = vsyncpa [#allocation5], 0  ;;  %s4828_s16 = smov [#allocation4]   ;;  %s4829_s18 = smov 256   ;;  %s5424_s0 = inlined_call_operand.vmem [shape: bf16[64,128], index: 0, kind: input, shape index: {}]   ;;  %s5425_s1 = inlined_call_operand.vmem [shape: bf16[128,512], index: 1, kind: input, shape index: {}]   ;;  %s5426_s2 = inlined_call_operand.hbm [shape: bf16[128,512], index: 2, kind: input, shape index: {}]   ;;  %s5427_s3 = inlined_call_operand.vmem [shape: f32[1,512], index: 3, kind: input, shape index: {}]   ;;  %s5428_s4 = inlined_call_operand.vmem [shape: bf16[128,128], index: 4, kind: input, shape index: {}]   ;;  %s5429_s5 = inlined_call_operand.vmem [shape: f32[1,128], index: 5, kind: input, shape index: {}]   ;;  %s5430_s6 = inlined_call_operand.vmem [shape: f32[8,128], index: 6, kind: input, shape index: {}]   ;;  %s5431_s7 = inlined_call_operand.vmem [shape: f32[8,128], index: 7, kind: input, shape index: {}]   ;;  %s5432_s8 = inlined_call_operand.vmem [shape: f32[64,128], index: 8, kind: output, shape index: {0}]   ;;  %s5433_s9 = inlined_call_operand.vmem [shape: f32[8,128], index: 9, kind: output, shape index: {1}]   ;;  %s5434_s10 = inlined_call_operand.vmem [shape: f32[8,128], index: 10, kind: output, shape index: {2}]  }
   0x1   :  { %s25_s15 = sshll.u32 %s5426_s2, 4  ;;  %s27_s17 = sshll.u32 %s4828_s16, 4  ;;  %s26_s15 = int_to_ptr.hbm [resolvable:$true] %s25_s15  ;;  %s28_s17 = int_to_ptr.vmem [resolvable:$true] %s27_s17 }
   0x2   :  { %s4830_s19 = smov 16  }
   0x3   :  { %33 = dma.hbm_to_vmem [thread:$0]  %s26_s15, 4096, %s28_s17, [#allocation5], %s4829_s18, %s4829_s18, %s4830_s19  }
   0x4   :  { %4826 = dma.done.wait [#allocation5], 4096  }
   0x5   :  { %4827 = vsyncadd [#allocation5], 4294963200  ;;  %v3268_v0 = vld [vmem:[%s5425_s1 + $0xe0] sm:$0xf]  ;;  %v4396_v1 = vld [vmem:[%s5425_s1 + $0xec] sm:$0xf0] }
   0x6   :  { %v4395_v2 = vld [vmem:[%s5425_s1 + $0xec] sm:$0xf]  ;;  %v3269_v3 = vor.u32 %v4396_v1, %v3268_v0  ;;  %v3278_v4 = vld [vmem:[%s5425_s1 + $0xf8] sm:$0xf0]  ;;  %v3396_v5 = vld [vmem:[#allocation4 + $0xe0] sm:$0xf] }
   0x7   :  { %v4428_v6 = vld [vmem:[#allocation4 + $0xec] sm:$0xf0]  ;;  %v3281_v7 = vor.u32 %v4395_v2, %v3278_v4  ;;  %v3252_v9 = vld [vmem:[%s5425_s1 + $0xc0] sm:$0xf]  ;;  %v4391_v11 = vld [vmem:[%s5425_s1 + $0xcc] sm:$0xf] }
   0x8   :  { %v3397_v8 = vor.u32 %v4428_v6, %v3396_v5  ;;  %v4392_v10 = vld [vmem:[%s5425_s1 + $0xcc] sm:$0xf0]  ;;  %282 = vmatpush.bf16.msra.mxu1 %v3269_v3  ;;  %4662 = vmatpush.bf16.msra.mxu2 %v3269_v3  ;;  %v3262_v13 = vld [vmem:[%s5425_s1 + $0xd8] sm:$0xf0]  ;;  %v3380_v14 = vld [vmem:[#allocation4 + $0xc0] sm:$0xf] }
   0x9   :  { %v3253_v12 = vor.u32 %v4392_v10, %v3252_v9  ;;  %v4424_v15 = vld [vmem:[#allocation4 + $0xcc] sm:$0xf0]  ;;  %369 = vmatpush.bf16.msra.mxu3 %v3281_v7  ;;  %v3265_v16 = vor.u32 %v4391_v11, %v3262_v13  ;;  %v3236_v18 = vld [vmem:[%s5425_s1 + $0xa0] sm:$0xf]  ;;  %v4387_v20 = vld [vmem:[%s5425_s1 + $0xac] sm:$0xf] }
   0xa   :  { %632 = vmatpush.bf16.msra.mxu0 %v3397_v8  ;;  %v3381_v17 = vor.u32 %v4424_v15, %v3380_v14  ;;  %v4388_v19 = vld [vmem:[%s5425_s1 + $0xac] sm:$0xf0]  ;;  %v3246_v21 = vld [vmem:[%s5425_s1 + $0xb8] sm:$0xf0]  ;;  %v3364_v22 = vld [vmem:[#allocation4 + $0xa0] sm:$0xf] }
   0xb   :  { %v4420_v23 = vld [vmem:[#allocation4 + $0xac] sm:$0xf0]  ;;  %v3237_v24 = vor.u32 %v4388_v19, %v3236_v18  ;;  %v3249_v25 = vor.u32 %v4387_v20, %v3246_v21  ;;  %v3220_v27 = vld [vmem:[%s5425_s1 + $0x80] sm:$0xf]  ;;  %v4383_v29 = vld [vmem:[%s5425_s1 + $0x8c] sm:$0xf] }
   0xc   :  { %283 = vmatpush.bf16.msra.mxu1 %v3253_v12  ;;  %4663 = vmatpush.bf16.msra.mxu2 %v3253_v12  ;;  %v3365_v26 = vor.u32 %v4420_v23, %v3364_v22  ;;  %v4384_v28 = vld [vmem:[%s5425_s1 + $0x8c] sm:$0xf0]  ;;  %v3230_v30 = vld [vmem:[%s5425_s1 + $0x98] sm:$0xf0]  ;;  %v3348_v31 = vld [vmem:[#allocation4 + $0x80] sm:$0xf] }
   0xd   :  { %370 = vmatpush.bf16.msra.mxu3 %v3265_v16  ;;  %v4416_v32 = vld [vmem:[#allocation4 + $0x8c] sm:$0xf0]  ;;  %v3221_v33 = vor.u32 %v4384_v28, %v3220_v27  ;;  %v3233_v34 = vor.u32 %v4383_v29, %v3230_v30  ;;  %v3204_v36 = vld [vmem:[%s5425_s1 + $0x60] sm:$0xf]  ;;  %v4379_v38 = vld [vmem:[%s5425_s1 + $0x6c] sm:$0xf] }
   0xe   :  { %633 = vmatpush.bf16.msra.mxu0 %v3381_v17  ;;  %v3349_v35 = vor.u32 %v4416_v32, %v3348_v31  ;;  %v4380_v37 = vld [vmem:[%s5425_s1 + $0x6c] sm:$0xf0]  ;;  %v3214_v39 = vld [vmem:[%s5425_s1 + $0x78] sm:$0xf0]  ;;  %v3332_v40 = vld [vmem:[#allocation4 + $0x60] sm:$0xf] }
   0xf   :  { %v4412_v41 = vld [vmem:[#allocation4 + $0x6c] sm:$0xf0]  ;;  %v3205_v42 = vor.u32 %v4380_v37, %v3204_v36  ;;  %v3217_v43 = vor.u32 %v4379_v38, %v3214_v39  ;;  %v3188_v45 = vld [vmem:[%s5425_s1 + $0x40] sm:$0xf]  ;;  %v4375_v47 = vld [vmem:[%s5425_s1 + $0x4c] sm:$0xf] }
  0x10   :  { %284 = vmatpush.bf16.msra.mxu1 %v3237_v24  ;;  %4664 = vmatpush.bf16.msra.mxu2 %v3237_v24  ;;  %v3333_v44 = vor.u32 %v4412_v41, %v3332_v40  ;;  %v4376_v46 = vld [vmem:[%s5425_s1 + $0x4c] sm:$0xf0]  ;;  %v3198_v48 = vld [vmem:[%s5425_s1 + $0x58] sm:$0xf0]  ;;  %v3316_v49 = vld [vmem:[#allocation4 + $0x40] sm:$0xf] }
  0x11   :  { %371 = vmatpush.bf16.msra.mxu3 %v3249_v25  ;;  %v4408_v50 = vld [vmem:[#allocation4 + $0x4c] sm:$0xf0]  ;;  %v3189_v51 = vor.u32 %v4376_v46, %v3188_v45  ;;  %v3201_v52 = vor.u32 %v4375_v47, %v3198_v48  ;;  %v3172_v54 = vld [vmem:[%s5425_s1 + $0x20] sm:$0xf]  ;;  %v4371_v56 = vld [vmem:[%s5425_s1 + $0x2c] sm:$0xf] }
  0x12   :  { %634 = vmatpush.bf16.msra.mxu0 %v3365_v26  ;;  %v3317_v53 = vor.u32 %v4408_v50, %v3316_v49  ;;  %v4372_v55 = vld [vmem:[%s5425_s1 + $0x2c] sm:$0xf0]  ;;  %v3182_v57 = vld [vmem:[%s5425_s1 + $0x38] sm:$0xf0]  ;;  %v3300_v58 = vld [vmem:[#allocation4 + $0x20] sm:$0xf] }
  0x13   :  { %v4404_v59 = vld [vmem:[#allocation4 + $0x2c] sm:$0xf0]  ;;  %v3173_v60 = vor.u32 %v4372_v55, %v3172_v54  ;;  %v3156_v61 = vld [vmem:[%s5425_s1] sm:$0xf]  ;;  %v3185_v62 = vor.u32 %v4371_v56, %v3182_v57  ;;  %v4367_v1 = vld [vmem:[%s5425_s1 + $0xc] sm:$0xf] }
  0x14   :  { %285 = vmatpush.bf16.msra.mxu1 %v3221_v33  ;;  %4665 = vmatpush.bf16.msra.mxu2 %v3221_v33  ;;  %v3301_v63 = vor.u32 %v4404_v59, %v3300_v58  ;;  %v4368_v0 = vld [vmem:[%s5425_s1 + $0xc] sm:$0xf0]  ;;  %v3166_v2 = vld [vmem:[%s5425_s1 + $0x18] sm:$0xf0]  ;;  %v3284_v3 = vld [vmem:[#allocation4] sm:$0xf] }
  0x15   :  { %372 = vmatpush.bf16.msra.mxu3 %v3233_v34  ;;  %v4400_v4 = vld [vmem:[#allocation4 + $0xc] sm:$0xf0]  ;;  %v4394_v5 = vld [vmem:[%s5425_s1 + $0xe4] sm:$0xf]  ;;  %v3270_v6 = vld [vmem:[%s5425_s1 + $0xf0] sm:$0xf0]  ;;  %v3157_v9 = vor.u32 %v4368_v0, %v3156_v61  ;;  %v3169_v10 = vor.u32 %v4367_v1, %v3166_v2 }
  0x16   :  { %635 = vmatpush.bf16.msra.mxu0 %v3349_v35  ;;  %v3276_v7 = vld [vmem:[%s5425_s1 + $0xe8] sm:$0xf]  ;;  %v4397_v8 = vld [vmem:[%s5425_s1 + $0xf4] sm:$0xf0]  ;;  %v3285_v11 = vor.u32 %v4400_v4, %v3284_v3  ;;  %v430_v12 = vld [vmem:[%s5430_s6] sm:$0xff]  ;;  %v3273_v15 = vor.u32 %v4394_v5, %v3270_v6 }
  0x17   :  { %v5003_v13 = vld [vmem:[%s5424_s0] sm:$0xff]  ;;  %v5008_v14 = vld [vmem:[%s5424_s0 + $0x10] sm:$0xff]  ;;  %v3277_v16 = vor.u32 %v4397_v8, %v3276_v7  ;;  %v3260_v19 = vld [vmem:[%s5425_s1 + $0xc8] sm:$0xf]  ;;  %v5022_v21 = vpack.c.bf16 %v430_v12, %v430_v12 }
  0x18   :  { %286 = vmatpush.bf16.msra.mxu1 %v3205_v42  ;;  %4666 = vmatpush.bf16.msra.mxu2 %v3205_v42  ;;  %v4390_v17 = vld [vmem:[%s5425_s1 + $0xc4] sm:$0xf]  ;;  %v3254_v18 = vld [vmem:[%s5425_s1 + $0xd0] sm:$0xf0]  ;;  %v4393_v20 = vld [vmem:[%s5425_s1 + $0xd4] sm:$0xf0] }
  0x19   :  { %373 = vmatpush.bf16.msra.mxu3 %v3217_v43  ;;  %v3257_v22 = vor.u32 %v4390_v17, %v3254_v18  ;;  %v3261_v23 = vor.u32 %v4393_v20, %v3260_v19  ;;  %v4386_v24 = vld [vmem:[%s5425_s1 + $0xa4] sm:$0xf]  ;;  %v4427_v25 = vld [vmem:[#allocation4 + $0xec] sm:$0xf]  ;;  %v3406_v26 = vld [vmem:[#allocation4 + $0xf8] sm:$0xf0] }
  0x1a   :  { %636 = vmatpush.bf16.msra.mxu0 %v3333_v44  ;;  %v3238_v27 = vld [vmem:[%s5425_s1 + $0xb0] sm:$0xf0]  ;;  %v3244_v28 = vld [vmem:[%s5425_s1 + $0xa8] sm:$0xf]  ;;  %v4389_v29 = vld [vmem:[%s5425_s1 + $0xb4] sm:$0xf0]  ;;  %v3409_v30 = vor.u32 %v4427_v25, %v3406_v26 }
  0x1b   :  { %v4423_v31 = vld [vmem:[#allocation4 + $0xcc] sm:$0xf]  ;;  %v3390_v32 = vld [vmem:[#allocation4 + $0xd8] sm:$0xf0]  ;;  %v3241_v33 = vor.u32 %v4386_v24, %v3238_v27  ;;  %v3245_v34 = vor.u32 %v4389_v29, %v3244_v28  ;;  %v4382_v35 = vld [vmem:[%s5425_s1 + $0x84] sm:$0xf] }
  0x1c   :  { %287 = vmatpush.bf16.msra.mxu1 %v3189_v51  ;;  %4667 = vmatpush.bf16.msra.mxu2 %v3189_v51  ;;  %v3393_v36 = vor.u32 %v4423_v31, %v3390_v32  ;;  %v4419_v37 = vld [vmem:[#allocation4 + $0xac] sm:$0xf]  ;;  %v3374_v38 = vld [vmem:[#allocation4 + $0xb8] sm:$0xf0]  ;;  %v3222_v39 = vld [vmem:[%s5425_s1 + $0x90] sm:$0xf0] }
  0x1d   :  { %374 = vmatpush.bf16.msra.mxu3 %v3201_v52  ;;  %v3228_v40 = vld [vmem:[%s5425_s1 + $0x88] sm:$0xf]  ;;  %v4385_v41 = vld [vmem:[%s5425_s1 + $0x94] sm:$0xf0]  ;;  %v3377_v42 = vor.u32 %v4419_v37, %v3374_v38  ;;  %v3225_v43 = vor.u32 %v4382_v35, %v3222_v39  ;;  %v4378_v45 = vld [vmem:[%s5425_s1 + $0x64] sm:$0xf] }
  0x1e   :  { %637 = vmatpush.bf16.msra.mxu0 %v3317_v53  ;;  %v3229_v44 = vor.u32 %v4385_v41, %v3228_v40  ;;  %v4415_v46 = vld [vmem:[#allocation4 + $0x8c] sm:$0xf]  ;;  %v3358_v47 = vld [vmem:[#allocation4 + $0x98] sm:$0xf0]  ;;  %v3206_v48 = vld [vmem:[%s5425_s1 + $0x70] sm:$0xf0] }
  0x1f   :  { %v3212_v49 = vld [vmem:[%s5425_s1 + $0x68] sm:$0xf]  ;;  %v4381_v50 = vld [vmem:[%s5425_s1 + $0x74] sm:$0xf0]  ;;  %v3361_v51 = vor.u32 %v4415_v46, %v3358_v47  ;;  %v3209_v54 = vor.u32 %v4378_v45, %v3206_v48  ;;  %v4374_v56 = vld [vmem:[%s5425_s1 + $0x44] sm:$0xf] }
  0x20   :  { %288 = vmatpush.bf16.msra.mxu1 %v3173_v60  ;;  %4668 = vmatpush.bf16.msra.mxu2 %v3173_v60  ;;  %v5067_v52 = vld [vmem:[%s5424_s0 + $0x8] sm:$0xff]  ;;  %v5072_v53 = vld [vmem:[%s5424_s0 + $0x18] sm:$0xff]  ;;  %v3213_v55 = vor.u32 %v4381_v50, %v3212_v49  ;;  %v3190_v57 = vld [vmem:[%s5425_s1 + $0x50] sm:$0xf0] }
  0x21   :  { %375 = vmatpush.bf16.msra.mxu3 %v3185_v62  ;;  %v3196_v58 = vld [vmem:[%s5425_s1 + $0x48] sm:$0xf]  ;;  %v4377_v59 = vld [vmem:[%s5425_s1 + $0x54] sm:$0xf0]  ;;  %v3193_v60 = vor.u32 %v4374_v56, %v3190_v57  ;;  %v4370_v62 = vld [vmem:[%s5425_s1 + $0x24] sm:$0xf] }
  0x22   :  { %638 = vmatpush.bf16.msra.mxu0 %v3301_v63  ;;  %v3197_v61 = vor.u32 %v4377_v59, %v3196_v58  ;;  %v4411_v63 = vld [vmem:[#allocation4 + $0x6c] sm:$0xf]  ;;  %v3342_v0 = vld [vmem:[#allocation4 + $0x78] sm:$0xf0]  ;;  %v3174_v1 = vld [vmem:[%s5425_s1 + $0x30] sm:$0xf0] }
  0x23   :  { %v3180_v2 = vld [vmem:[%s5425_s1 + $0x28] sm:$0xf]  ;;  %v4373_v3 = vld [vmem:[%s5425_s1 + $0x34] sm:$0xf0]  ;;  %v3345_v4 = vor.u32 %v4411_v63, %v3342_v0  ;;  %v4407_v5 = vld [vmem:[#allocation4 + $0x4c] sm:$0xf]  ;;  %v3177_v8 = vor.u32 %v4370_v62, %v3174_v1 }
  0x24   :  { %289 = vmatpush.bf16.msra.mxu1 %v3157_v9  ;;  %4669 = vmatpush.bf16.msra.mxu2 %v3157_v9  ;;  %v4366_v6 = vld [vmem:[%s5425_s1 + $0x4] sm:$0xf]  ;;  %v3326_v7 = vld [vmem:[#allocation4 + $0x58] sm:$0xf0]  ;;  %v3181_v9 = vor.u32 %v4373_v3, %v3180_v2  ;;  %v3398_v19 = vld [vmem:[#allocation4 + $0xf0] sm:$0xf0] }
  0x25   :  { %376 = vmatpush.bf16.msra.mxu3 %v3169_v10  ;;  %v3158_v10 = vld [vmem:[%s5425_s1 + $0x10] sm:$0xf0]  ;;  %v3329_v12 = vor.u32 %v4407_v5, %v3326_v7  ;;  %v4426_v17 = vld [vmem:[#allocation4 + $0xe4] sm:$0xf]  ;;  %v3310_v18 = vld [vmem:[#allocation4 + $0x38] sm:$0xf0] }
  0x26   :  { %639 = vmatpush.bf16.msra.mxu0 %v3285_v11  ;;  %v3164_v11 = vld [vmem:[%s5425_s1 + $0x8] sm:$0xf]  ;;  %v3161_v24 = vor.u32 %v4366_v6, %v3158_v10  ;;  %v4399_v26 = vld [vmem:[#allocation4 + $0xc] sm:$0xf]  ;;  %v3294_v27 = vld [vmem:[#allocation4 + $0x18] sm:$0xf0]  ;;  %v3401_v28 = vor.u32 %v4426_v17, %v3398_v19 }
  0x27   :  { %290 = vmatmul.bf16.vlgmr.msra.gmra.mxu1 %v5003_v13  ;;  %300 = vmatmul.bf16.vlgmr.msra.gmra.mxu2 %v5008_v14  ;;  %v3404_v20 = vld [vmem:[#allocation4 + $0xe8] sm:$0xf]  ;;  %v3382_v31 = vld [vmem:[#allocation4 + $0xd0] sm:$0xf0]  ;;  %v3297_v32 = vor.u32 %v4399_v26, %v3294_v27  ;;  %v4421_v40 = vld [vmem:[#allocation4 + $0xb4] sm:$0xf0] }
  0x28   :  { %311 = vmatpush.bf16.msrb.mxu1 %v3273_v15  ;;  %340 = vmatpush.bf16.msrb.mxu2 %v3277_v16  ;;  %v4403_v15 = vld [vmem:[#allocation4 + $0x2c] sm:$0xf]  ;;  %v4369_v16 = vld [vmem:[%s5425_s1 + $0x14] sm:$0xf0]  ;;  %v3366_v37 = vld [vmem:[#allocation4 + $0xb0] sm:$0xf0] }
  0x29   :  { %377 = vmatmul.bf16.vlgmr.msra.gmra.mxu3 %v5003_v13  ;;  %640 = vmatmul.bf16.vlgmr.msra.gmra.mxu0 %v5022_v21  ;;  %v3165_v25 = vor.u32 %v4369_v16, %v3164_v11  ;;  %v3372_v39 = vld [vmem:[#allocation4 + $0xa8] sm:$0xf]  ;;  %v4417_v46 = vld [vmem:[#allocation4 + $0x94] sm:$0xf0]  ;;  %v4410_v48 = vld [vmem:[#allocation4 + $0x64] sm:$0xf] }
  0x2a   :  { %671 = vmatpush.bf16.msrb.mxu3 %v3409_v30  ;;  %v4422_v30 = vld [vmem:[#allocation4 + $0xc4] sm:$0xf]  ;;  %v3356_v45 = vld [vmem:[#allocation4 + $0x88] sm:$0xf]  ;;  %v3334_v49 = vld [vmem:[#allocation4 + $0x70] sm:$0xf0] }
  0x2b   :  { %v3385_v35 = vor.u32 %v4422_v30, %v3382_v31  ;;  %v3357_v50 = vor.u32 %v4417_v46, %v3356_v45  ;;  %v3318_v56 = vld [vmem:[#allocation4 + $0x50] sm:$0xf0]  ;;  %v4402_v59 = vld [vmem:[#allocation4 + $0x24] sm:$0xf]  ;;  %v4409_v63 = vld [vmem:[#allocation4 + $0x54] sm:$0xf0] }
  0x2c   :  { %312 = vmatpush.bf16.msrb.mxu1 %v3257_v22  ;;  %341 = vmatpush.bf16.msrb.mxu2 %v3261_v23  ;;  %v4429_v22 = vld [vmem:[#allocation4 + $0xf4] sm:$0xf0]  ;;  %v3313_v23 = vor.u32 %v4403_v15, %v3310_v18  ;;  %v4398_v0 = vld [vmem:[#allocation4 + $0x4] sm:$0xf]  ;;  %v3286_v2 = vld [vmem:[#allocation4 + $0x10] sm:$0xf0] }
  0x2d   :  { %v3405_v29 = vor.u32 %v4429_v22, %v3404_v20  ;;  %v3308_v3 = vld [vmem:[#allocation4 + $0x28] sm:$0xf]  ;;  %v3289_v6 = vor.u32 %v4398_v0, %v3286_v2 }
  0x2e   :  { %672 = vmatpush.bf16.msrb.mxu3 %v3393_v36  ;;  %v4418_v36 = vld [vmem:[#allocation4 + $0xa4] sm:$0xf]  ;;  %v3292_v7 = vld [vmem:[#allocation4 + $0x8] sm:$0xf] }
  0x2f   :  { %v3369_v41 = vor.u32 %v4418_v36, %v3366_v37 }
  0x30   :  { %313 = vmatpush.bf16.msrb.mxu1 %v3241_v33  ;;  %342 = vmatpush.bf16.msrb.mxu2 %v3245_v34  ;;  %v3388_v33 = vld [vmem:[#allocation4 + $0xc8] sm:$0xf]  ;;  %v4425_v34 = vld [vmem:[#allocation4 + $0xd4] sm:$0xf0] }
  0x31   :  { %v3389_v38 = vor.u32 %v4425_v34, %v3388_v33 }
  0x32   :  { %673 = vmatpush.bf16.msrb.mxu3 %v3377_v42  ;;  %v4414_v42 = vld [vmem:[#allocation4 + $0x84] sm:$0xf] }
  0x34   :  { %314 = vmatpush.bf16.msrb.mxu1 %v3225_v43  ;;  %343 = vmatpush.bf16.msrb.mxu2 %v3229_v44  ;;  %v3350_v43 = vld [vmem:[#allocation4 + $0x90] sm:$0xf0]  ;;  %v3373_v44 = vor.u32 %v4421_v40, %v3372_v39 }
  0x35   :  { %v3353_v47 = vor.u32 %v4414_v42, %v3350_v43 }
  0x36   :  { %674 = vmatpush.bf16.msrb.mxu3 %v3361_v51  ;;  %v3340_v51 = vld [vmem:[#allocation4 + $0x68] sm:$0xf] }
  0x37   :  { %295 = vmatmul.bf16.gmra.mxu1 %v5067_v52  ;;  %305 = vmatmul.bf16.gmra.mxu2 %v5072_v53 }
  0x38   :  { %315 = vmatpush.bf16.msrb.mxu1 %v3209_v54  ;;  %344 = vmatpush.bf16.msrb.mxu2 %v3213_v55  ;;  %v4413_v54 = vld [vmem:[#allocation4 + $0x74] sm:$0xf0]  ;;  %v4406_v55 = vld [vmem:[#allocation4 + $0x44] sm:$0xf] }
  0x39   :  { %382 = vmatmul.bf16.gmra.mxu3 %v5067_v52  ;;  %v3341_v57 = vor.u32 %v4413_v54, %v3340_v51  ;;  %v3321_v58 = vor.u32 %v4406_v55, %v3318_v56 }
  0x3a   :  { %675 = vmatpush.bf16.msrb.mxu3 %v3345_v4  ;;  %v4405_v4 = vld [vmem:[#allocation4 + $0x34] sm:$0xf0] }
  0x3b   :  { %v3309_v5 = vor.u32 %v4405_v4, %v3308_v3  ;;  %v3527_v4 = vld [vmem:[#allocation4 + $0xe0] sm:$0xf] }
  0x3c   :  { %316 = vmatpush.bf16.msrb.mxu1 %v3193_v60  ;;  %345 = vmatpush.bf16.msrb.mxu2 %v3197_v61  ;;  %v3302_v60 = vld [vmem:[#allocation4 + $0x30] sm:$0xf0]  ;;  %v3324_v61 = vld [vmem:[#allocation4 + $0x48] sm:$0xf] }
  0x3d   :  { %v3305_v62 = vor.u32 %v4402_v59, %v3302_v60  ;;  %v3325_v1 = vor.u32 %v4409_v63, %v3324_v61 }
  0x3e   :  { %676 = vmatpush.bf16.msrb.mxu3 %v3329_v12 }
  0x40   :  { %317 = vmatpush.bf16.msrb.mxu1 %v3177_v8  ;;  %346 = vmatpush.bf16.msrb.mxu2 %v3181_v9  ;;  %v4401_v8 = vld [vmem:[#allocation4 + $0x14] sm:$0xf0]  ;;  %v88_v9 = vld [vmem:[%s5427_s3] sm:$0xf] }
  0x41   :  { %v5129_v10 = vperm.slane %v88_v9, 0  ;;  %v5139_v19 = vperm.slane %v88_v9, 3  ;;  %v5166_v36 = vperm.slane %v88_v9, 1 }
  0x42   :  { %677 = vmatpush.bf16.msrb.mxu3 %v3313_v23 }
  0x44   :  { %318 = vmatpush.bf16.msrb.mxu1 %v3161_v24  ;;  %347 = vmatpush.bf16.msrb.mxu2 %v3165_v25 }
  0x46   :  { %678 = vmatpush.bf16.msrb.mxu3 %v3297_v32 }
  0x47   :  { %319 = vmatmul.bf16.vlgmr.msrb.gmra.mxu1 %v5003_v13  ;;  %348 = vmatmul.bf16.vlgmr.msrb.gmra.mxu2 %v5003_v13  ;;  %v3337_v13 = vor.u32 %v4410_v48, %v3334_v49 }
  0x48   :  { %645 = vmatpush.bf16.msra.mxu1 %v3401_v28  ;;  %658 = vmatpush.bf16.msra.mxu2 %v3405_v29 }
  0x49   :  { %387 = vmatmul.bf16.gmra.mxu3 %v5008_v14 }
  0x4c   :  { %646 = vmatpush.bf16.msra.mxu1 %v3385_v35  ;;  %659 = vmatpush.bf16.msra.mxu2 %v3389_v38 }
  0x50   :  { %647 = vmatpush.bf16.msra.mxu1 %v3369_v41  ;;  %660 = vmatpush.bf16.msra.mxu2 %v3373_v44  ;;  %v5174_v41 = vperm.slane %v88_v9, 2  ;;  %v3535_v9 = vld [vmem:[#allocation4 + $0xe8] sm:$0xf] }
  0x54   :  { %648 = vmatpush.bf16.msra.mxu1 %v3353_v47  ;;  %661 = vmatpush.bf16.msra.mxu2 %v3357_v50 }
  0x57   :  { %324 = vmatmul.bf16.gmra.mxu1 %v5067_v52  ;;  %353 = vmatmul.bf16.gmra.mxu2 %v5067_v52  ;;  %v3293_v52 = vor.u32 %v4401_v8, %v3292_v7 }
  0x58   :  { %649 = vmatpush.bf16.msra.mxu1 %v3337_v13  ;;  %662 = vmatpush.bf16.msra.mxu2 %v3341_v57 }
  0x59   :  { %392 = vmatmul.bf16.gmra.mxu3 %v5072_v53 }
  0x5c   :  { %650 = vmatpush.bf16.msra.mxu1 %v3321_v58  ;;  %663 = vmatpush.bf16.msra.mxu2 %v3325_v1 }
  0x60   :  { %651 = vmatpush.bf16.msra.mxu1 %v3305_v62  ;;  %664 = vmatpush.bf16.msra.mxu2 %v3309_v5  ;;  %v4460_v5 = vld [vmem:[#allocation4 + $0xec] sm:$0xf0] }
  0x61   :  { %v3528_v8 = vor.u32 %v4460_v5, %v3527_v4 }
  0x63   :  { %952 = vmatpush.bf16.msrb.mxu0 %v3528_v8  ;;  %v3503_v8 = vld [vmem:[#allocation4 + $0xa8] sm:$0xf] }
  0x64   :  { %652 = vmatpush.bf16.msra.mxu1 %v3289_v6  ;;  %665 = vmatpush.bf16.msra.mxu2 %v3293_v52  ;;  %v4458_v6 = vld [vmem:[#allocation4 + $0xe4] sm:$0xf]  ;;  %v3529_v52 = vld [vmem:[#allocation4 + $0xf0] sm:$0xf0] }
  0x67   :  { %329 = vmatmul.bf16.gmra.mxu1 %v5008_v14  ;;  %358 = vmatmul.bf16.gmra.mxu2 %v5008_v14 }
  0x69   :  { %679 = vmatmul.bf16.vlgmr.msrb.gmra.mxu3 %v5022_v21 }
  0x77   :  { %334 = vmatmul.bf16.gmra.mxu1 %v5072_v53  ;;  %363 = vmatmul.bf16.gmra.mxu2 %v5072_v53 }
  0x87   :  { %653 = vmatmul.bf16.vlgmr.msra.gmra.mxu1 %v5022_v21  ;;  %666 = vmatmul.bf16.vlgmr.msra.gmra.mxu2 %v5022_v21 }
  0xa4   :  { %v291_v11 = vpop.f32.mrf.mxu1 }
  0xa5   :  { %v292_v12 = vadd.f32 %v291_v11, %v5129_v10  ;;  %v4461_v11 = vld [vmem:[#allocation4 + $0xf4] sm:$0xf0] }
  0xa6   :  { %v641_v14 = vpop.f32.mrf.mxu0 }
  0xa7   :  { %v684_v15 = vadd.f32 %v641_v14, %v292_v12 }
  0xa9   :  { %v3410_v61 = vmul.f32 -1.442695, %v684_v15 }
  0xaa   :  { %v301_v16 = vpop.f32.mrf.mxu2 }
  0xab   :  { %v5133_v17 = vadd.f32 %v301_v16, %v5129_v10  ;;  %4674 = vpow2.f32 %v3410_v61  ;;  %v3532_v16 = vor.u32 %v4458_v6, %v3529_v52  ;;  %v4453_v52 = vld [vmem:[#allocation4 + $0xb4] sm:$0xf0] }
  0xac   :  { %v5135_v53 = vpop.f32.mrf.mxu3  ;;  %v5137_v18 = vpop.f32.mrf.mxu1 }
  0xad   :  { %965 = vmatpush.bf16.msrb.mxu1 %v3532_v16  ;;  %v379_v4 = vadd.f32 %v5135_v53, %v5139_v19  ;;  %v4451_v16 = vld [vmem:[#allocation4 + $0xac] sm:$0xf] }
  0xae   :  { %v643_v21 = vpop.f32.mrf.mxu0 }
  0xaf   :  { %v3536_v21 = vor.u32 %v4461_v11, %v3535_v9 }
  0xb1   :  { %v4675_v3 = vpop.eup %4674  ;;  %978 = vmatpush.bf16.msrb.mxu2 %v3536_v21  ;;  %v3505_v21 = vld [vmem:[#allocation4 + $0xb8] sm:$0xf0] }
  0xb2   :  { %v5141_v20 = vpop.f32.mrf.mxu2  ;;  %v5209_v12 = vadd.f32 1.0, %v4675_v3  ;;  %v4450_v3 = vld [vmem:[#allocation4 + $0xa4] sm:$0xf] }
  0xb4   :  { %v380_v22 = vpop.f32.mrf.mxu3  ;;  %v296_v24 = vpop.f32.mrf.mxu1  ;;  %4676 = vrcp.f32 %v5209_v12  ;;  %vm697_vm1 = vweird.f32 %v5209_v12 }
  0xb5   :  { %v5144_v23 = vadd.f32 %v380_v22, %v5139_v19  ;;  %v5147_v25 = vadd.f32 %v296_v24, %v5129_v10  ;;  %v4459_v22 = vld [vmem:[#allocation4 + $0xec] sm:$0xf]  ;;  %v3537_v24 = vld [vmem:[#allocation4 + $0xf8] sm:$0xf0] }
  0xba   :  { %v306_v26 = vpop.f32.mrf.mxu2 }
  0xbb   :  { %v5150_v27 = vadd.f32 %v306_v26, %v5129_v10 }
  0xbc   :  { %v383_v28 = vpop.f32.mrf.mxu3  ;;  %v5155_v30 = vpop.f32.mrf.mxu1 }
  0xbd   :  { %v5153_v29 = vadd.f32 %v383_v28, %v5139_v19  ;;  %v3540_v28 = vor.u32 %v4459_v22, %v3537_v24 }
  0xbf   :  { %991 = vmatpush.bf16.msra.mxu3 %v3540_v28  ;;  %v5223_v28 = vpop.eup %4676 }
  0xc0   :  { %vm698_vm0 = vweird.f32 %v5223_v28 }
  0xc1   :  { %vm699_vm2 = vmor %vm697_vm1, %vm698_vm0 }
  0xc2   :  { %v5157_v31 = vpop.f32.mrf.mxu2 }
  0xc4   :  { %v385_v32 = vpop.f32.mrf.mxu3  ;;  %v5162_v34 = vpop.f32.mrf.mxu1 }
  0xc5   :  { %v5160_v33 = vadd.f32 %v385_v32, %v5139_v19 }
  0xca   :  { %v5164_v35 = vpop.f32.mrf.mxu2 }
  0xcc   :  { %v388_v37 = vpop.f32.mrf.mxu3  ;;  %v322_v39 = vpop.f32.mrf.mxu1 }
  0xcd   :  { %v5169_v38 = vadd.f32 %v388_v37, %v5139_v19  ;;  %v5172_v40 = vadd.f32 %v322_v39, %v5166_v36  ;;  %v3511_v37 = vld [vmem:[#allocation4 + $0xc0] sm:$0xf]  ;;  %v4456_v39 = vld [vmem:[#allocation4 + $0xcc] sm:$0xf0] }
  0xd2   :  { %v351_v42 = vpop.f32.mrf.mxu2 }
  0xd3   :  { %v5177_v43 = vadd.f32 %v351_v42, %v5174_v41  ;;  %v4454_v42 = vld [vmem:[#allocation4 + $0xc4] sm:$0xf] }
  0xd4   :  { %v390_v44 = vpop.f32.mrf.mxu3  ;;  %v325_v46 = vpop.f32.mrf.mxu1 }
  0xd5   :  { %v5180_v45 = vadd.f32 %v390_v44, %v5139_v19  ;;  %v5183_v47 = vadd.f32 %v325_v46, %v5166_v36  ;;  %v3512_v44 = vor.u32 %v4456_v39, %v3511_v37  ;;  %v3513_v46 = vld [vmem:[#allocation4 + $0xd0] sm:$0xf0]  ;;  %v4448_v37 = vld [vmem:[#allocation4 + $0x8c] sm:$0xf0] }
  0xd7   :  { %953 = vmatpush.bf16.msrb.mxu0 %v3512_v44  ;;  %v3481_v44 = vld [vmem:[#allocation4 + $0x90] sm:$0xf0] }
  0xda   :  { %v354_v48 = vpop.f32.mrf.mxu2 }
  0xdb   :  { %v5186_v49 = vadd.f32 %v354_v48, %v5174_v41  ;;  %v3519_v48 = vld [vmem:[#allocation4 + $0xc8] sm:$0xf] }
  0xdc   :  { %v393_v50 = vpop.f32.mrf.mxu3  ;;  %v327_v54 = vpop.f32.mrf.mxu1 }
  0xdd   :  { %v5189_v51 = vadd.f32 %v393_v50, %v5139_v19  ;;  %v5192_v13 = vadd.f32 %v327_v54, %v5166_v36  ;;  %v4457_v50 = vld [vmem:[#allocation4 + $0xd4] sm:$0xf0]  ;;  %v3516_v54 = vor.u32 %v4454_v42, %v3513_v46  ;;  %v4446_v42 = vld [vmem:[#allocation4 + $0x84] sm:$0xf]  ;;  %v3487_v46 = vld [vmem:[#allocation4 + $0x88] sm:$0xf] }
  0xdf   :  { %966 = vmatpush.bf16.msrb.mxu1 %v3516_v54  ;;  %v3489_v54 = vld [vmem:[#allocation4 + $0x98] sm:$0xf0] }
  0xe2   :  { %v356_v55 = vpop.f32.mrf.mxu2 }
  0xe3   :  { %v5195_v56 = vadd.f32 %v356_v55, %v5174_v41  ;;  %v3520_v55 = vor.u32 %v4457_v50, %v3519_v48  ;;  %v3484_v48 = vor.u32 %v4446_v42, %v3481_v44  ;;  %v4449_v50 = vld [vmem:[#allocation4 + $0x94] sm:$0xf0]  ;;  %v4440_v42 = vld [vmem:[#allocation4 + $0x4c] sm:$0xf0]  ;;  %v4438_v44 = vld [vmem:[#allocation4 + $0x44] sm:$0xf] }
  0xe4   :  { %v395_v57 = vpop.f32.mrf.mxu3  ;;  %v330_v59 = vpop.f32.mrf.mxu1 }
  0xe5   :  { %v5198_v58 = vadd.f32 %v395_v57, %v5139_v19  ;;  %v5201_v60 = vadd.f32 %v330_v59, %v5166_v36  ;;  %v4455_v57 = vld [vmem:[#allocation4 + $0xcc] sm:$0xf]  ;;  %v3521_v59 = vld [vmem:[#allocation4 + $0xd8] sm:$0xf0]  ;;  %979 = vmatpush.bf16.msrb.mxu2 %v3520_v55  ;;  %v3479_v19 = vld [vmem:[#allocation4 + $0x80] sm:$0xf]  ;;  %v693_v55 = vmul.f32 %v5223_v28, %v5209_v12 }
  0xe6   :  { %v3524_v61 = vor.u32 %v4455_v57, %v3521_v59  ;;  %v3480_v39 = vor.u32 %v4448_v37, %v3479_v19  ;;  %v3488_v59 = vor.u32 %v4449_v50, %v3487_v46  ;;  %v3455_v46 = vld [vmem:[#allocation4 + $0x48] sm:$0xf] }
  0xe8   :  { %992 = vmatpush.bf16.msra.mxu3 %v3524_v61 }
  0xea   :  { %v359_v62 = vpop.f32.mrf.mxu2 }
  0xeb   :  { %v5204_v63 = vadd.f32 %v359_v62, %v5174_v41  ;;  %v3495_v62 = vld [vmem:[#allocation4 + $0xa0] sm:$0xf] }
  0xec   :  { %v680_v0 = vpop.f32.mrf.mxu3  ;;  %v332_v1 = vpop.f32.mrf.mxu1 }
  0xed   :  { %v5207_v2 = vadd.f32 %v332_v1, %v5166_v36  ;;  %v4452_v1 = vld [vmem:[#allocation4 + $0xac] sm:$0xf0]  ;;  %v687_v22 = vadd.f32 %v680_v0, %v379_v4  ;;  %v4447_v0 = vld [vmem:[#allocation4 + $0x8c] sm:$0xf] }
  0xee   :  { %v3496_v6 = vor.u32 %v4452_v1, %v3495_v62  ;;  %v3492_v61 = vor.u32 %v4447_v0, %v3489_v54  ;;  %v3463_v62 = vld [vmem:[#allocation4 + $0x60] sm:$0xf]  ;;  %v4444_v1 = vld [vmem:[#allocation4 + $0x6c] sm:$0xf0] }
  0xef   :  { %v3412_v57 = vmul.f32 -1.442695, %v687_v22  ;;  %v694_v22 = vsub.f32 1.0, %v693_v55  ;;  %v4439_v55 = vld [vmem:[#allocation4 + $0x4c] sm:$0xf] }
  0xf0   :  { %954 = vmatpush.bf16.msrb.mxu0 %v3496_v6  ;;  %v3465_v6 = vld [vmem:[#allocation4 + $0x70] sm:$0xf0] }
  0xf1   :  { %4678 = vpow2.f32 %v3412_v57  ;;  %v3457_v57 = vld [vmem:[#allocation4 + $0x58] sm:$0xf0] }
  0xf2   :  { %v361_v7 = vpop.f32.mrf.mxu2 }
  0xf3   :  { %v5212_v14 = vadd.f32 %v361_v7, %v5174_v41  ;;  %v3497_v7 = vld [vmem:[#allocation4 + $0xb0] sm:$0xf0] }
  0xf4   :  { %v682_v15 = vpop.f32.mrf.mxu3  ;;  %v335_v26 = vpop.f32.mrf.mxu1  ;;  %v3500_v11 = vor.u32 %v4450_v3, %v3497_v7  ;;  %955 = vmatpush.bf16.msrb.mxu0 %v3480_v39  ;;  %v4442_v3 = vld [vmem:[#allocation4 + $0x64] sm:$0xf]  ;;  %v3471_v7 = vld [vmem:[#allocation4 + $0x68] sm:$0xf]  ;;  %v3447_v39 = vld [vmem:[#allocation4 + $0x40] sm:$0xf] }
  0xf5   :  { %v5215_v32 = vadd.f32 %v335_v26, %v5166_v36  ;;  %v3504_v15 = vor.u32 %v4453_v52, %v3503_v8  ;;  %v3508_v26 = vor.u32 %v4451_v16, %v3505_v21  ;;  %v321_v8 = vadd.f32 %v5162_v34, %v5166_v36  ;;  %v4443_v16 = vld [vmem:[#allocation4 + $0x6c] sm:$0xf]  ;;  %v3473_v21 = vld [vmem:[#allocation4 + $0x78] sm:$0xf0] }
  0xf6   :  { %967 = vmatpush.bf16.msrb.mxu1 %v3500_v11  ;;  %v3468_v11 = vor.u32 %v4442_v3, %v3465_v6  ;;  %v3476_v19 = vor.u32 %v4443_v16, %v3473_v21  ;;  %v3448_v34 = vor.u32 %v4440_v42, %v3447_v39  ;;  %v4434_v3 = vld [vmem:[#allocation4 + $0x24] sm:$0xf]  ;;  %v3433_v6 = vld [vmem:[#allocation4 + $0x30] sm:$0xf0]  ;;  %v4432_v39 = vld [vmem:[#allocation4 + $0xc] sm:$0xf0] }
  0xf7   :  { %980 = vmatpush.bf16.msrb.mxu2 %v3504_v15  ;;  %993 = vmatpush.bf16.msra.mxu3 %v3508_v26  ;;  %v4445_v15 = vld [vmem:[#allocation4 + $0x74] sm:$0xf0]  ;;  %v3436_v16 = vor.u32 %v4434_v3, %v3433_v6  ;;  %v4430_v42 = vld [vmem:[#allocation4 + $0x4] sm:$0xf] }
  0xf8   :  { %v3472_v26 = vor.u32 %v4445_v15, %v3471_v7  ;;  %v3439_v7 = vld [vmem:[#allocation4 + $0x28] sm:$0xf] }
  0xfa   :  { %v364_v5 = vpop.f32.mrf.mxu2  ;;  %968 = vmatpush.bf16.msrb.mxu1 %v3484_v48  ;;  %v4441_v48 = vld [vmem:[#allocation4 + $0x54] sm:$0xf0] }
  0xfb   :  { %v5221_v9 = vadd.f32 %v364_v5, %v5174_v41  ;;  %981 = vmatpush.bf16.msrb.mxu2 %v3488_v59  ;;  %994 = vmatpush.bf16.msra.mxu3 %v3492_v61  ;;  %v3464_v5 = vor.u32 %v4444_v1, %v3463_v62  ;;  %v3456_v54 = vor.u32 %v4441_v48, %v3455_v46  ;;  %v3431_v62 = vld [vmem:[#allocation4 + $0x20] sm:$0xf]  ;;  %v4436_v1 = vld [vmem:[#allocation4 + $0x2c] sm:$0xf0]  ;;  %v4433_v46 = vld [vmem:[#allocation4 + $0x14] sm:$0xf0] }
  0xfc   :  { %v337_v24 = vpop.f32.mrf.mxu1  ;;  %v695_v59 = vmul.f32 %v5223_v28, %v694_v22  ;;  %v3460_v61 = vor.u32 %v4439_v55, %v3457_v57  ;;  %v4435_v22 = vld [vmem:[#allocation4 + $0x2c] sm:$0xf]  ;;  %v3425_v55 = vld [vmem:[#allocation4 + $0x18] sm:$0xf0]  ;;  %v701_v57 = vand.u32 2147483647, %v5209_v12 }
  0xfd   :  { %v5226_v53 = vadd.f32 %v337_v24, %v5166_v36  ;;  %956 = vmatpush.bf16.msrb.mxu0 %v3464_v5  ;;  %v3449_v36 = vld [vmem:[#allocation4 + $0x50] sm:$0xf0]  ;;  %v3432_v5 = vor.u32 %v4436_v1, %v3431_v62  ;;  %v4431_v48 = vld [vmem:[#allocation4 + $0xc] sm:$0xf] }
  0xfe   :  { %969 = vmatpush.bf16.msrb.mxu1 %v3468_v11  ;;  %v3452_v0 = vor.u32 %v4438_v44, %v3449_v36  ;;  %v4679_v11 = vpop.eup %4678  ;;  %v3423_v36 = vld [vmem:[#allocation4 + $0x8] sm:$0xf]  ;;  %vm702_vm3 = vcmp.eq.f32.partialorder %v701_v57, 8.507059e+37 }
  0xff   :  { %982 = vmatpush.bf16.msrb.mxu2 %v3472_v26  ;;  %995 = vmatpush.bf16.msra.mxu3 %v3476_v19  ;;  %v3415_v26 = vld [vmem:[#allocation4] sm:$0xf] }
 0x101   :  { %957 = vmatpush.bf16.msrb.mxu0 %v3448_v34  ;;  %v3416_v34 = vor.u32 %v4432_v39, %v3415_v26  ;;  %v431_v39 = vld [vmem:[%s5431_s7] sm:$0xff] }
 0x102   :  { %v366_v4 = vpop.f32.mrf.mxu2  ;;  %970 = vmatpush.bf16.msrb.mxu1 %v3452_v0  ;;  %v703_v0 = vand.u32 2147483648, %v5209_v12 }
 0x103   :  { %v5233_v52 = vadd.f32 %v366_v4, %v5174_v41  ;;  %v350_v4 = vadd.f32 %v5164_v35, %v5174_v41  ;;  %983 = vmatpush.bf16.msrb.mxu2 %v3456_v54  ;;  %996 = vmatpush.bf16.msra.mxu3 %v3460_v61  ;;  %v3417_v35 = vld [vmem:[#allocation4 + $0x10] sm:$0xf0]  ;;  %v696_v41 = vadd.f32 %v5223_v28, %v695_v59 }
 0x104   :  { %v654_v24 = vpop.f32.mrf.mxu1  ;;  %v3420_v54 = vor.u32 %v4430_v42, %v3417_v35  ;;  %v3424_v59 = vor.u32 %v4433_v46, %v3423_v36  ;;  %v3428_v61 = vor.u32 %v4431_v48, %v3425_v55 }
 0x105   :  { %v685_v37 = vadd.f32 %v654_v24, %v321_v8  ;;  %v4437_v8 = vld [vmem:[#allocation4 + $0x34] sm:$0xf0]  ;;  %v3441_v24 = vld [vmem:[#allocation4 + $0x38] sm:$0xf0]  ;;  %958 = vmatpush.bf16.msrb.mxu0 %v3432_v5  ;;  %v700_v3 = vsel %vm699_vm2, %v5223_v28, %v696_v41 }
 0x106   :  { %v3440_v21 = vor.u32 %v4437_v8, %v3439_v7  ;;  %971 = vmatpush.bf16.msrb.mxu1 %v3436_v16 }
 0x107   :  { %v3411_v50 = vmul.f32 -1.442695, %v685_v37  ;;  %v3444_v37 = vor.u32 %v4435_v22, %v3441_v24 }
 0x108   :  { %984 = vmatpush.bf16.msrb.mxu2 %v3440_v21 }
 0x109   :  { %4680 = vpow2.f32 %v3411_v50  ;;  %v730_v50 = vadd.f32 1.0, %v4679_v11  ;;  %997 = vmatpush.bf16.msra.mxu3 %v3444_v37  ;;  %959 = vmatpush.bf16.msrb.mxu0 %v3416_v34 }
 0x10a   :  { %v667_v15 = vpop.f32.mrf.mxu2  ;;  %972 = vmatpush.bf16.msrb.mxu1 %v3420_v54 }
 0x10b   :  { %v686_v19 = vadd.f32 %v667_v15, %v350_v4  ;;  %v704_v4 = vor.u32 1.1754944e-38, %v703_v0  ;;  %v742_v46 = vand.u32 2147483648, %v730_v50  ;;  %vm736_vm9 = vweird.f32 %v730_v50 }
 0x10c   :  { %v656_v44 = vpop.f32.mrf.mxu1  ;;  %985 = vmatpush.bf16.msrb.mxu2 %v3424_v59  ;;  %v740_v48 = vand.u32 2147483647, %v730_v50 }
 0x10d   :  { %4682 = vtanh.f32 %v686_v19  ;;  %998 = vmatpush.bf16.msra.mxu3 %v3428_v61  ;;  %v705_v6 = vsel %vm702_vm3, %v704_v4, %v700_v3  ;;  %v743_v54 = vor.u32 1.1754944e-38, %v742_v46  ;;  %v4490_v3 = vld [vmem:[#allocation4 + $0xe4] sm:$0xf] }
 0x10e   :  { %4684 = vrcp.f32 %v730_v50  ;;  %vm741_vm11 = vcmp.eq.f32.partialorder %v740_v48, 8.507059e+37  ;;  %v4482_v46 = vld [vmem:[#allocation4 + $0xa4] sm:$0xf] }
 0x10f   :  { %v4681_v62 = vpop.eup %4680 }
 0x110   :  { %v710_v1 = vadd.f32 1.0, %v4681_v62  ;;  %v3658_v62 = vld [vmem:[#allocation4 + $0xe0] sm:$0xf] }
 0x112   :  { %4686 = vrcp.f32 %v710_v1  ;;  %v669_v5 = vpop.f32.mrf.mxu2  ;;  %v722_v22 = vand.u32 2147483648, %v710_v1  ;;  %v720_v28 = vand.u32 2147483647, %v710_v1  ;;  %vm716_vm5 = vweird.f32 %v710_v1 }
 0x113   :  { %v4683_v12 = vpop.eup %4682  ;;  %v3666_v5 = vld [vmem:[#allocation4 + $0xe8] sm:$0xf] }
 0x114   :  { %v747_v7 = vmul.f32 %v4683_v12, %v705_v6  ;;  %v4685_v8 = vpop.eup %4684  ;;  %v723_v37 = vor.u32 1.1754944e-38, %v722_v22  ;;  %vm721_vm7 = vcmp.eq.f32.partialorder %v720_v28, 8.507059e+37  ;;  %v4493_v12 = vld [vmem:[#allocation4 + $0xf4] sm:$0xf0]  ;;  %v4486_v22 = vld [vmem:[#allocation4 + $0xc4] sm:$0xf] }
 0x115   :  { %v732_v16 = vmul.f32 %v4685_v8, %v730_v50  ;;  %vm737_vm8 = vweird.f32 %v4685_v8  ;;  %v3660_v50 = vld [vmem:[#allocation4 + $0xf0] sm:$0xf0] }
 0x116   :  { %vm738_vm10 = vmor %vm736_vm9, %vm737_vm8  ;;  %v3663_v6 = vor.u32 %v4490_v3, %v3660_v50  ;;  %v3644_v28 = vld [vmem:[#allocation4 + $0xd0] sm:$0xf0]  ;;  %v294_v3 = vadd.f32 %v5137_v18, %v5129_v10  ;;  %v4479_v18 = vld [vmem:[#allocation4 + $0x8c] sm:$0xf] }
 0x117   :  { %v733_v26 = vsub.f32 1.0, %v732_v16  ;;  %v3642_v16 = vld [vmem:[#allocation4 + $0xc0] sm:$0xf] }
 0x118   :  { %v4687_v11 = vpop.eup %4686  ;;  %1286 = vmatpush.bf16.msra.mxu1 %v3663_v6  ;;  %v4480_v6 = vld [vmem:[#allocation4 + $0x8c] sm:$0xf0] }
 0x119   :  { %v712_v15 = vmul.f32 %v4687_v11, %v710_v1  ;;  %vm717_vm4 = vweird.f32 %v4687_v11  ;;  %v734_v35 = vmul.f32 %v4685_v8, %v733_v26  ;;  %v4492_v1 = vld [vmem:[#allocation4 + $0xec] sm:$0xf0]  ;;  %v3650_v26 = vld [vmem:[#allocation4 + $0xc8] sm:$0xf] }
 0x11a   :  { %vm718_vm6 = vmor %vm716_vm5, %vm717_vm4  ;;  %v3659_v4 = vor.u32 %v4492_v1, %v3658_v62  ;;  %v4483_v62 = vld [vmem:[#allocation4 + $0xac] sm:$0xf]  ;;  %v3636_v1 = vld [vmem:[#allocation4 + $0xb8] sm:$0xf0] }
 0x11b   :  { %v713_v21 = vsub.f32 1.0, %v712_v15  ;;  %v735_v36 = vadd.f32 %v4685_v8, %v734_v35  ;;  %v3652_v35 = vld [vmem:[#allocation4 + $0xd8] sm:$0xf0] }
 0x11c   :  { %1273 = vmatpush.bf16.msra.mxu0 %v3659_v4  ;;  %v3639_v4 = vor.u32 %v4483_v62, %v3636_v1 }
 0x11d   :  { %v714_v24 = vmul.f32 %v4687_v11, %v713_v21  ;;  %v739_v0 = vsel %vm738_vm10, %v4685_v8, %v735_v36  ;;  %v4491_v8 = vld [vmem:[#allocation4 + $0xec] sm:$0xf]  ;;  %v4488_v21 = vld [vmem:[#allocation4 + $0xcc] sm:$0xf0] }
 0x11e   :  { %v744_v57 = vsel %vm741_vm11, %v743_v54, %v739_v0  ;;  %v4484_v36 = vld [vmem:[#allocation4 + $0xac] sm:$0xf0]  ;;  %v3628_v0 = vld [vmem:[#allocation4 + $0xb0] sm:$0xf0]  ;;  %v3634_v54 = vld [vmem:[#allocation4 + $0xa8] sm:$0xf] }
 0x11f   :  { %v715_v19 = vadd.f32 %v4687_v11, %v714_v24  ;;  %v3643_v24 = vor.u32 %v4488_v21, %v3642_v16  ;;  %v3612_v16 = vld [vmem:[#allocation4 + $0x90] sm:$0xf0]  ;;  %v3618_v21 = vld [vmem:[#allocation4 + $0x88] sm:$0xf] }
 0x121   :  { %v719_v42 = vsel %vm718_vm6, %v4687_v11, %v715_v19  ;;  %v3668_v11 = vld [vmem:[#allocation4 + $0xf8] sm:$0xf0]  ;;  %v4489_v19 = vld [vmem:[#allocation4 + $0xd4] sm:$0xf0]  ;;  %1274 = vmatpush.bf16.msra.mxu0 %v3643_v24 }
 0x122   :  { %v724_v41 = vsel %vm721_vm7, %v723_v37, %v719_v42  ;;  %v3671_v15 = vor.u32 %v4491_v8, %v3668_v11  ;;  %v3647_v37 = vor.u32 %v4486_v22, %v3644_v28  ;;  %v4487_v42 = vld [vmem:[#allocation4 + $0xcc] sm:$0xf]  ;;  %v4481_v22 = vld [vmem:[#allocation4 + $0x94] sm:$0xf0] }
 0x123   :  { %v746_v44 = vmul.f32 %v724_v41, %v431_v39  ;;  %v3651_v39 = vor.u32 %v4489_v19, %v3650_v26  ;;  %v3655_v41 = vor.u32 %v4487_v42, %v3652_v35  ;;  %v3619_v28 = vor.u32 %v4481_v22, %v3618_v21  ;;  %v3620_v26 = vld [vmem:[#allocation4 + $0x98] sm:$0xf0]  ;;  %v3594_v42 = vld [vmem:[#allocation4 + $0x60] sm:$0xf]  ;;  %v4476_v35 = vld [vmem:[#allocation4 + $0x6c] sm:$0xf0] }
 0x124   :  { %1312 = vmatpush.bf16.msrb.mxu3 %v3671_v15  ;;  %1287 = vmatpush.bf16.msra.mxu1 %v3647_v37  ;;  %v3588_v22 = vld [vmem:[#allocation4 + $0x58] sm:$0xf0] }
 0x125   :  { %v5249_v34 = vadd.f32 %v747_v7, %v746_v44  ;;  %v3667_v7 = vor.u32 %v4493_v12, %v3666_v5  ;;  %v3626_v44 = vld [vmem:[#allocation4 + $0xa0] sm:$0xf] }
 0x126   :  { %v3627_v48 = vor.u32 %v4484_v36, %v3626_v44  ;;  %v3610_v12 = vld [vmem:[#allocation4 + $0x80] sm:$0xf]  ;;  %v3596_v44 = vld [vmem:[#allocation4 + $0x70] sm:$0xf0]  ;;  %v3602_v36 = vld [vmem:[#allocation4 + $0x68] sm:$0xf] }
 0x127   :  { %4688 = vtanh.f32 %v5249_v34  ;;  %1299 = vmatpush.bf16.msra.mxu2 %v3667_v7  ;;  %v4478_v7 = vld [vmem:[#allocation4 + $0x84] sm:$0xf]  ;;  %v3611_v15 = vor.u32 %v4480_v6, %v3610_v12 }
 0x128   :  { %1313 = vmatpush.bf16.msrb.mxu3 %v3655_v41  ;;  %1275 = vmatpush.bf16.msra.mxu0 %v3627_v48  ;;  %v3615_v24 = vor.u32 %v4478_v7, %v3612_v16  ;;  %v4474_v41 = vld [vmem:[#allocation4 + $0x64] sm:$0xf] }
 0x129   :  { %v3599_v48 = vor.u32 %v4474_v41, %v3596_v44  ;;  %v4467_v41 = vld [vmem:[#allocation4 + $0x2c] sm:$0xf] }
 0x12b   :  { %1300 = vmatpush.bf16.msra.mxu2 %v3651_v39  ;;  %v3623_v39 = vor.u32 %v4479_v18, %v3620_v26 }
 0x12c   :  { %1314 = vmatpush.bf16.msrb.mxu3 %v3639_v4  ;;  %1276 = vmatpush.bf16.msra.mxu0 %v3611_v15  ;;  %v4470_v4 = vld [vmem:[#allocation4 + $0x44] sm:$0xf]  ;;  %v4471_v15 = vld [vmem:[#allocation4 + $0x4c] sm:$0xf] }
 0x12d   :  { %v4689_v55 = vpop.eup %4688  ;;  %v3591_v26 = vor.u32 %v4471_v15, %v3588_v22 }
 0x12e   :  { %v5252_v59 = vmul.f32 %v4689_v55, %v744_v57  ;;  %v4485_v55 = vld [vmem:[#allocation4 + $0xb4] sm:$0xf0]  ;;  %v3631_v57 = vor.u32 %v4482_v46, %v3628_v0 }
 0x12f   :  { %v4477_v46 = vld [vmem:[#allocation4 + $0x74] sm:$0xf0] }
 0x130   :  { %v759_v61 = vpack.c.bf16 %v5252_v59, %v5252_v59  ;;  %1288 = vmatpush.bf16.msra.mxu1 %v3631_v57  ;;  %1315 = vmatpush.bf16.msrb.mxu3 %v3623_v39  ;;  %v3603_v0 = vor.u32 %v4477_v46, %v3602_v36  ;;  %v3578_v57 = vld [vmem:[#allocation4 + $0x40] sm:$0xf] }
 0x132   :  { %960 = vmatmul.bf16.vlgmr.msrb.gmra.mxu0 %v759_v61  ;;  %973 = vmatmul.bf16.vlgmr.msrb.gmra.mxu1 %v759_v61 }
 0x133   :  { %986 = vmatmul.bf16.vlgmr.msrb.gmra.mxu2 %v759_v61  ;;  %999 = vmatmul.bf16.vlgmr.msra.gmra.mxu3 %v759_v61  ;;  %v3635_v61 = vor.u32 %v4485_v55, %v3634_v54  ;;  %v4475_v54 = vld [vmem:[#allocation4 + $0x6c] sm:$0xf]  ;;  %v3604_v55 = vld [vmem:[#allocation4 + $0x78] sm:$0xf0] }
 0x134   :  { %1289 = vmatpush.bf16.msra.mxu1 %v3615_v24  ;;  %v3607_v1 = vor.u32 %v4475_v54, %v3604_v55  ;;  %v3562_v24 = vld [vmem:[#allocation4 + $0x20] sm:$0xf] }
 0x135   :  { %1301 = vmatpush.bf16.msra.mxu2 %v3635_v61 }
 0x136   :  { %1316 = vmatpush.bf16.msrb.mxu3 %v3607_v1  ;;  %v3548_v1 = vld [vmem:[#allocation4 + $0x10] sm:$0xf0] }
 0x138   :  { %1290 = vmatpush.bf16.msra.mxu1 %v3599_v48  ;;  %v3572_v48 = vld [vmem:[#allocation4 + $0x38] sm:$0xf0] }
 0x139   :  { %1302 = vmatpush.bf16.msra.mxu2 %v3619_v28  ;;  %v4468_v28 = vld [vmem:[#allocation4 + $0x2c] sm:$0xf0]  ;;  %v3575_v55 = vor.u32 %v4467_v41, %v3572_v48 }
 0x13a   :  { %1317 = vmatpush.bf16.msrb.mxu3 %v3591_v26 }
 0x13d   :  { %1303 = vmatpush.bf16.msra.mxu2 %v3603_v0  ;;  %v3546_v0 = vld [vmem:[#allocation4] sm:$0xf] }
 0x13e   :  { %1318 = vmatpush.bf16.msrb.mxu3 %v3575_v55 }
 0x1af   :  { %v961_v50 = vpop.f32.mrf.mxu0  ;;  %v974_v5 = vpop.f32.mrf.mxu1 }
 0x1b0   :  { %v1004_v8 = vadd.f32 %v961_v50, %v294_v3  ;;  %v1005_v11 = vadd.f32 %v974_v5, %v5172_v40  ;;  %v3595_v40 = vor.u32 %v4476_v35, %v3594_v42  ;;  %v4472_v3 = vld [vmem:[#allocation4 + $0x4c] sm:$0xf0]  ;;  %v3580_v50 = vld [vmem:[#allocation4 + $0x50] sm:$0xf0]  ;;  %v3570_v42 = vld [vmem:[#allocation4 + $0x28] sm:$0xf] }
 0x1b1   :  { %v3579_v7 = vor.u32 %v4472_v3, %v3578_v57  ;;  %v3583_v16 = vor.u32 %v4470_v4, %v3580_v50  ;;  %v4469_v35 = vld [vmem:[#allocation4 + $0x34] sm:$0xf0]  ;;  %v4464_v57 = vld [vmem:[#allocation4 + $0xc] sm:$0xf0]  ;;  %v3554_v50 = vld [vmem:[#allocation4 + $0x8] sm:$0xf] }
 0x1b2   :  { %v3541_v19 = vmul.f32 -1.442695, %v1004_v8  ;;  %v3542_v37 = vmul.f32 -1.442695, %v1005_v11  ;;  %1277 = vmatpush.bf16.msra.mxu0 %v3595_v40  ;;  %v3586_v8 = vld [vmem:[#allocation4 + $0x48] sm:$0xf]  ;;  %v3571_v46 = vor.u32 %v4469_v35, %v3570_v42 }
 0x1b3   :  { %v4473_v11 = vld [vmem:[#allocation4 + $0x54] sm:$0xf0]  ;;  %1291 = vmatpush.bf16.msra.mxu1 %v3583_v16 }
 0x1b4   :  { %4690 = vpow2.f32 %v3541_v19  ;;  %v3587_v21 = vor.u32 %v4473_v11, %v3586_v8  ;;  %v4466_v19 = vld [vmem:[#allocation4 + $0x24] sm:$0xf]  ;;  %v3556_v11 = vld [vmem:[#allocation4 + $0x18] sm:$0xf0] }
 0x1b5   :  { %4692 = vpow2.f32 %v3542_v37  ;;  %v3564_v37 = vld [vmem:[#allocation4 + $0x30] sm:$0xf0] }
 0x1b6   :  { %v5259_v61 = vpop.f32.mrf.mxu2  ;;  %v1000_v62 = vpop.f32.mrf.mxu3  ;;  %1278 = vmatpush.bf16.msra.mxu0 %v3579_v7  ;;  %1304 = vmatpush.bf16.msra.mxu2 %v3587_v21  ;;  %v3567_v36 = vor.u32 %v4466_v19, %v3564_v37  ;;  %v4463_v7 = vld [vmem:[#allocation4 + $0xc] sm:$0xf] }
 0x1b7   :  { %v1007_v5 = vadd.f32 %v1000_v62, %v5144_v23  ;;  %v963_v12 = vpop.f32.mrf.mxu0  ;;  %v976_v6 = vpop.f32.mrf.mxu1  ;;  %v3563_v23 = vor.u32 %v4468_v28, %v3562_v24  ;;  %v4462_v62 = vld [vmem:[#allocation4 + $0x4] sm:$0xf]  ;;  %v3559_v16 = vor.u32 %v4463_v7, %v3556_v11  ;;  %v1006_v24 = vadd.f32 %v5259_v61, %v5177_v43 }
 0x1b8   :  { %1292 = vmatpush.bf16.msra.mxu1 %v3567_v36  ;;  %v3551_v12 = vor.u32 %v4462_v62, %v3548_v1  ;;  %v4465_v6 = vld [vmem:[#allocation4 + $0x14] sm:$0xf0] }
 0x1b9   :  { %v3543_v18 = vmul.f32 -1.442695, %v1007_v5  ;;  %v3547_v5 = vor.u32 %v4464_v57, %v3546_v0  ;;  %v3555_v8 = vor.u32 %v4465_v6, %v3554_v50  ;;  %1319 = vmatpush.bf16.msrb.mxu3 %v3559_v16 }
 0x1ba   :  { %v4691_v39 = vpop.eup %4690  ;;  %1279 = vmatpush.bf16.msra.mxu0 %v3563_v23  ;;  %1305 = vmatpush.bf16.msra.mxu2 %v3571_v46 }
 0x1bb   :  { %v4693_v40 = vpop.eup %4692  ;;  %v5262_v44 = vadd.f32 1.0, %v4691_v39  ;;  %4694 = vpow2.f32 %v3543_v18 }
 0x1bc   :  { %v1030_v54 = vadd.f32 1.0, %v4693_v40  ;;  %1293 = vmatpush.bf16.msra.mxu1 %v3551_v12 }
 0x1bd   :  { %4696 = vrcp.f32 %v5262_v44  ;;  %v1023_v39 = vand.u32 2147483648, %v5262_v44  ;;  %v1021_v35 = vand.u32 2147483647, %v5262_v44  ;;  %vm1017_vm14 = vweird.f32 %v5262_v44 }
 0x1be   :  { %4698 = vrcp.f32 %v1030_v54  ;;  %v989_v3 = vpop.f32.mrf.mxu2  ;;  %v1002_v4 = vpop.f32.mrf.mxu3  ;;  %1280 = vmatpush.bf16.msra.mxu0 %v3547_v5  ;;  %1306 = vmatpush.bf16.msra.mxu2 %v3555_v8  ;;  %v1042_v23 = vand.u32 2147483648, %v1030_v54  ;;  %v1040_v43 = vand.u32 2147483647, %v1030_v54  ;;  %vm1036_vm15 = vweird.f32 %v1030_v54 }
 0x1bf   :  { %v1024_v36 = vor.u32 1.1754944e-38, %v1023_v39  ;;  %vm1022_vm2 = vcmp.eq.f32.partialorder %v1021_v35, 8.507059e+37  ;;  %v3799_v35 = vld [vmem:[#allocation4 + $0xf8] sm:$0xf0] }
 0x1c0   :  { %v1043_v0 = vor.u32 1.1754944e-38, %v1042_v23  ;;  %vm1041_vm3 = vcmp.eq.f32.partialorder %v1040_v43, 8.507059e+37  ;;  %v3773_v43 = vld [vmem:[#allocation4 + $0xc0] sm:$0xf] }
 0x1c1   :  { %v4695_v15 = vpop.eup %4694 }
 0x1c2   :  { %v1050_v21 = vadd.f32 1.0, %v4695_v15 }
 0x1c3   :  { %v4697_v22 = vpop.eup %4696 }
 0x1c4   :  { %v4699_v28 = vpop.eup %4698  ;;  %v1013_v18 = vmul.f32 %v4697_v22, %v5262_v44  ;;  %4700 = vrcp.f32 %v1050_v21  ;;  %vm1018_vm12 = vweird.f32 %v4697_v22  ;;  %v1062_v6 = vand.u32 2147483648, %v1050_v21 }
 0x1c5   :  { %v1032_v26 = vmul.f32 %v4699_v28, %v1030_v54  ;;  %4702 = vtanh.f32 %v1006_v24  ;;  %vm1037_vm13 = vweird.f32 %v4699_v28  ;;  %vm1019_vm0 = vmor %vm1017_vm14, %vm1018_vm12  ;;  %vm1056_vm5 = vweird.f32 %v1050_v21  ;;  %v3789_v24 = vld [vmem:[#allocation4 + $0xe0] sm:$0xf] }
 0x1c6   :  { %v1014_v19 = vsub.f32 1.0, %v1013_v18  ;;  %vm1038_vm1 = vmor %vm1036_vm15, %vm1037_vm13  ;;  %v1060_v7 = vand.u32 2147483647, %v1050_v21  ;;  %v1063_v11 = vor.u32 1.1754944e-38, %v1062_v6  ;;  %v4522_v18 = vld [vmem:[#allocation4 + $0xe4] sm:$0xf] }
 0x1c7   :  { %v1033_v37 = vsub.f32 1.0, %v1032_v26  ;;  %v3765_v6 = vld [vmem:[#allocation4 + $0xa8] sm:$0xf] }
 0x1c8   :  { %v1015_v42 = vmul.f32 %v4697_v22, %v1014_v19  ;;  %vm1061_vm7 = vcmp.eq.f32.partialorder %v1060_v7, 8.507059e+37  ;;  %v3797_v19 = vld [vmem:[#allocation4 + $0xe8] sm:$0xf]  ;;  %v4517_v7 = vld [vmem:[#allocation4 + $0xb4] sm:$0xf0] }
 0x1c9   :  { %v1034_v41 = vmul.f32 %v4699_v28, %v1033_v37  ;;  %v4525_v37 = vld [vmem:[#allocation4 + $0xf4] sm:$0xf0] }
 0x1ca   :  { %v4701_v61 = vpop.eup %4700  ;;  %v1016_v40 = vadd.f32 %v4697_v22, %v1015_v42  ;;  %v3798_v23 = vor.u32 %v4525_v37, %v3797_v19  ;;  %v4523_v42 = vld [vmem:[#allocation4 + $0xec] sm:$0xf]  ;;  %v3743_v37 = vld [vmem:[#allocation4 + $0x90] sm:$0xf0] }
 0x1cb   :  { %v1035_v46 = vadd.f32 %v4699_v28, %v1034_v41  ;;  %v1052_v48 = vmul.f32 %v4701_v61, %v1050_v21  ;;  %v4703_v57 = vpop.eup %4702  ;;  %vm1057_vm4 = vweird.f32 %v4701_v61  ;;  %v3791_v21 = vld [vmem:[#allocation4 + $0xf0] sm:$0xf0]  ;;  %v3802_v41 = vor.u32 %v4523_v42, %v3799_v35 }
 0x1cc   :  { %v1020_v55 = vsel %vm1019_vm0, %v4697_v22, %v1016_v40  ;;  %vm1058_vm6 = vmor %vm1056_vm5, %vm1057_vm4  ;;  %v3794_v39 = vor.u32 %v4522_v18, %v3791_v21  ;;  %1620 = vmatpush.bf16.msrb.mxu2 %v3798_v23  ;;  %v4518_v40 = vld [vmem:[#allocation4 + $0xc4] sm:$0xf]  ;;  %v4513_v23 = vld [vmem:[#allocation4 + $0x94] sm:$0xf0] }
 0x1cd   :  { %v1025_v62 = vsel %vm1022_vm2, %v1024_v36, %v1020_v55  ;;  %v1039_v1 = vsel %vm1038_vm1, %v4699_v28, %v1035_v46  ;;  %v1053_v3 = vsub.f32 1.0, %v1052_v48  ;;  %v4524_v28 = vld [vmem:[#allocation4 + $0xec] sm:$0xf0]  ;;  %1633 = vmatpush.bf16.msra.mxu3 %v3802_v41  ;;  %v3775_v46 = vld [vmem:[#allocation4 + $0xd0] sm:$0xf0] }
 0x1ce   :  { %v1044_v4 = vsel %vm1041_vm3, %v1043_v0, %v1039_v1  ;;  %v1067_v50 = vmul.f32 %v4703_v57, %v1025_v62  ;;  %v3790_v26 = vor.u32 %v4524_v28, %v3789_v24  ;;  %1607 = vmatpush.bf16.msrb.mxu1 %v3794_v39  ;;  %v3781_v48 = vld [vmem:[#allocation4 + $0xc8] sm:$0xf]  ;;  %v4521_v0 = vld [vmem:[#allocation4 + $0xd4] sm:$0xf0]  ;;  %v3778_v55 = vor.u32 %v4518_v40, %v3775_v46  ;;  %v4519_v62 = vld [vmem:[#allocation4 + $0xcc] sm:$0xf] }
 0x1cf   :  { %v1066_v5 = vmul.f32 %v1044_v4, %v5249_v34  ;;  %v1054_v12 = vmul.f32 %v4701_v61, %v1053_v3  ;;  %v3782_v57 = vor.u32 %v4521_v0, %v3781_v48  ;;  %v3783_v1 = vld [vmem:[#allocation4 + $0xd8] sm:$0xf0]  ;;  %v3757_v4 = vld [vmem:[#allocation4 + $0xa0] sm:$0xf]  ;;  %v4512_v28 = vld [vmem:[#allocation4 + $0x8c] sm:$0xf0] }
 0x1d0   :  { %1594 = vmatpush.bf16.msrb.mxu0 %v3790_v26  ;;  %v3786_v3 = vor.u32 %v4519_v62, %v3783_v1  ;;  %v3741_v24 = vld [vmem:[#allocation4 + $0x80] sm:$0xf]  ;;  %v4510_v18 = vld [vmem:[#allocation4 + $0x84] sm:$0xf]  ;;  %v3749_v39 = vld [vmem:[#allocation4 + $0x88] sm:$0xf] }
 0x1d1   :  { %v5272_v44 = vadd.f32 %v1067_v50, %v1066_v5  ;;  %v1055_v54 = vadd.f32 %v4701_v61, %v1054_v12  ;;  %1621 = vmatpush.bf16.msrb.mxu2 %v3782_v57  ;;  %v4516_v50 = vld [vmem:[#allocation4 + $0xac] sm:$0xf0]  ;;  %v4514_v5 = vld [vmem:[#allocation4 + $0xa4] sm:$0xf]  ;;  %v3742_v19 = vor.u32 %v4512_v28, %v3741_v24  ;;  %v3746_v41 = vor.u32 %v4510_v18, %v3743_v37  ;;  %v3751_v40 = vld [vmem:[#allocation4 + $0x98] sm:$0xf0] }
 0x1d2   :  { %1608 = vmatpush.bf16.msrb.mxu1 %v3778_v55  ;;  %1634 = vmatpush.bf16.msra.mxu3 %v3786_v3  ;;  %v3758_v12 = vor.u32 %v4516_v50, %v3757_v4  ;;  %v3725_v0 = vld [vmem:[#allocation4 + $0x60] sm:$0xf]  ;;  %v4508_v55 = vld [vmem:[#allocation4 + $0x6c] sm:$0xf0]  ;;  %v4506_v57 = vld [vmem:[#allocation4 + $0x64] sm:$0xf] }
 0x1d3   :  { %4704 = vtanh.f32 %v5272_v44  ;;  %v1059_v8 = vsel %vm1058_vm6, %v4701_v61, %v1055_v54  ;;  %v4520_v61 = vld [vmem:[#allocation4 + $0xcc] sm:$0xf0]  ;;  %v3759_v54 = vld [vmem:[#allocation4 + $0xb0] sm:$0xf0]  ;;  %v3726_v1 = vor.u32 %v4508_v55, %v3725_v0  ;;  %v3733_v3 = vld [vmem:[#allocation4 + $0x68] sm:$0xf] }
 0x1d4   :  { %v1064_v16 = vsel %vm1061_vm7, %v1063_v11, %v1059_v8  ;;  %v3774_v36 = vor.u32 %v4520_v61, %v3773_v43  ;;  %v3762_v8 = vor.u32 %v4514_v5, %v3759_v54  ;;  %v3766_v11 = vor.u32 %v4517_v7, %v3765_v6  ;;  %v4511_v61 = vld [vmem:[#allocation4 + $0x8c] sm:$0xf]  ;;  %v3727_v62 = vld [vmem:[#allocation4 + $0x70] sm:$0xf0]  ;;  %v3735_v5 = vld [vmem:[#allocation4 + $0x78] sm:$0xf0] }
 0x1d5   :  { %v3750_v43 = vor.u32 %v4513_v23, %v3749_v39  ;;  %v4507_v4 = vld [vmem:[#allocation4 + $0x6c] sm:$0xf]  ;;  %v4504_v54 = vld [vmem:[#allocation4 + $0x4c] sm:$0xf0]  ;;  %v3719_v37 = vld [vmem:[#allocation4 + $0x58] sm:$0xf0] }
 0x1d6   :  { %1595 = vmatpush.bf16.msrb.mxu0 %v3774_v36  ;;  %1609 = vmatpush.bf16.msrb.mxu1 %v3762_v8  ;;  %v3754_v36 = vor.u32 %v4511_v61, %v3751_v40  ;;  %v3738_v8 = vor.u32 %v4507_v4, %v3735_v5  ;;  %v3695_v61 = vld [vmem:[#allocation4 + $0x30] sm:$0xf0]  ;;  %v3701_v40 = vld [vmem:[#allocation4 + $0x28] sm:$0xf]  ;;  %v4499_v0 = vld [vmem:[#allocation4 + $0x2c] sm:$0xf] }
 0x1d7   :  { %1622 = vmatpush.bf16.msrb.mxu2 %v3766_v11  ;;  %v3703_v55 = vld [vmem:[#allocation4 + $0x38] sm:$0xf0]  ;;  %v3679_v5 = vld [vmem:[#allocation4 + $0x10] sm:$0xf0] }
 0x1d8   :  { %v3706_v4 = vor.u32 %v4499_v0, %v3703_v55 }
 0x1d9   :  { %v4705_v15 = vpop.eup %4704 }
 0x1da   :  { %v5275_v22 = vmul.f32 %v4705_v15, %v1064_v16  ;;  %v4515_v15 = vld [vmem:[#allocation4 + $0xac] sm:$0xf]  ;;  %v3767_v16 = vld [vmem:[#allocation4 + $0xb8] sm:$0xf0]  ;;  %1596 = vmatpush.bf16.msrb.mxu0 %v3758_v12  ;;  %1610 = vmatpush.bf16.msrb.mxu1 %v3746_v41  ;;  %v3709_v12 = vld [vmem:[#allocation4 + $0x40] sm:$0xf] }
 0x1db   :  { %1623 = vmatpush.bf16.msrb.mxu2 %v3750_v43  ;;  %v3710_v11 = vor.u32 %v4504_v54, %v3709_v12  ;;  %v4498_v41 = vld [vmem:[#allocation4 + $0x24] sm:$0xf]  ;;  %v3685_v12 = vld [vmem:[#allocation4 + $0x8] sm:$0xf] }
 0x1dc   :  { %v1080_v34 = vpack.c.bf16 %v5275_v22, %v5275_v22 }
 0x1de   :  { %1281 = vmatmul.bf16.vlgmr.msra.gmra.mxu0 %v1080_v34  ;;  %1294 = vmatmul.bf16.vlgmr.msra.gmra.mxu1 %v1080_v34 }
 0x1df   :  { %1307 = vmatmul.bf16.vlgmr.msra.gmra.mxu2 %v1080_v34  ;;  %1320 = vmatmul.bf16.vlgmr.msrb.gmra.mxu3 %v1080_v34  ;;  %v3770_v34 = vor.u32 %v4515_v15, %v3767_v16  ;;  %v4502_v15 = vld [vmem:[#allocation4 + $0x44] sm:$0xf]  ;;  %v3711_v16 = vld [vmem:[#allocation4 + $0x50] sm:$0xf0] }
 0x1e0   :  { %1597 = vmatpush.bf16.msrb.mxu0 %v3742_v19  ;;  %v4503_v19 = vld [vmem:[#allocation4 + $0x4c] sm:$0xf] }
 0x1e1   :  { %1635 = vmatpush.bf16.msra.mxu3 %v3770_v34  ;;  %v3717_v34 = vld [vmem:[#allocation4 + $0x48] sm:$0xf]  ;;  %v3722_v23 = vor.u32 %v4503_v19, %v3719_v37 }
 0x1e4   :  { %1598 = vmatpush.bf16.msrb.mxu0 %v3726_v1 }
 0x1e5   :  { %1636 = vmatpush.bf16.msra.mxu3 %v3754_v36 }
 0x1e8   :  { %1599 = vmatpush.bf16.msrb.mxu0 %v3710_v11  ;;  %v4497_v11 = vld [vmem:[#allocation4 + $0x14] sm:$0xf0] }
 0x1e9   :  { %1637 = vmatpush.bf16.msra.mxu3 %v3738_v8 }
 0x1ed   :  { %1638 = vmatpush.bf16.msra.mxu3 %v3722_v23 }
 0x1f1   :  { %1639 = vmatpush.bf16.msra.mxu3 %v3706_v4 }
 0x25b   :  { %v1282_v26 = vpop.f32.mrf.mxu0  ;;  %v1295_v21 = vpop.f32.mrf.mxu1 }
 0x25c   :  { %v1325_v42 = vadd.f32 %v1282_v26, %v5147_v25  ;;  %v1326_v35 = vadd.f32 %v1295_v21, %v5183_v47  ;;  %v3730_v25 = vor.u32 %v4506_v57, %v3727_v62  ;;  %v4509_v47 = vld [vmem:[#allocation4 + $0x74] sm:$0xf0]  ;;  %v3714_v26 = vor.u32 %v4502_v15, %v3711_v16 }
 0x25d   :  { %v3734_v50 = vor.u32 %v4509_v47, %v3733_v3  ;;  %v4505_v21 = vld [vmem:[#allocation4 + $0x54] sm:$0xf0]  ;;  %v4496_v3 = vld [vmem:[#allocation4 + $0xc] sm:$0xf0]  ;;  %v3686_v16 = vor.u32 %v4497_v11, %v3685_v12 }
 0x25e   :  { %v3672_v46 = vmul.f32 -1.442695, %v1325_v42  ;;  %v3673_v48 = vmul.f32 -1.442695, %v1326_v35  ;;  %1611 = vmatpush.bf16.msrb.mxu1 %v3730_v25  ;;  %v3718_v39 = vor.u32 %v4505_v21, %v3717_v34  ;;  %v3693_v42 = vld [vmem:[#allocation4 + $0x20] sm:$0xf] }
 0x25f   :  { %1624 = vmatpush.bf16.msrb.mxu2 %v3734_v50  ;;  %v4500_v35 = vld [vmem:[#allocation4 + $0x2c] sm:$0xf0]  ;;  %v3677_v25 = vld [vmem:[#allocation4] sm:$0xf]  ;;  %v4494_v50 = vld [vmem:[#allocation4 + $0x4] sm:$0xf] }
 0x260   :  { %4706 = vpow2.f32 %v3672_v46  ;;  %v3698_v46 = vor.u32 %v4498_v41, %v3695_v61  ;;  %v3678_v8 = vor.u32 %v4496_v3, %v3677_v25  ;;  %v3682_v15 = vor.u32 %v4494_v50, %v3679_v5  ;;  %v4495_v34 = vld [vmem:[#allocation4 + $0xc] sm:$0xf] }
 0x261   :  { %4708 = vpow2.f32 %v3673_v48  ;;  %v4501_v48 = vld [vmem:[#allocation4 + $0x34] sm:$0xf0] }
 0x262   :  { %v5281_v6 = vpop.f32.mrf.mxu2  ;;  %v1321_v7 = vpop.f32.mrf.mxu3  ;;  %1612 = vmatpush.bf16.msrb.mxu1 %v3714_v26  ;;  %v3702_v1 = vor.u32 %v4501_v48, %v3701_v40 }
 0x263   :  { %v1328_v24 = vadd.f32 %v1321_v7, %v5153_v29  ;;  %v1284_v28 = vpop.f32.mrf.mxu0  ;;  %v1297_v18 = vpop.f32.mrf.mxu1  ;;  %v3694_v29 = vor.u32 %v4500_v35, %v3693_v42  ;;  %1625 = vmatpush.bf16.msrb.mxu2 %v3718_v39  ;;  %v1327_v19 = vadd.f32 %v5281_v6, %v5186_v49 }
 0x265   :  { %v3674_v43 = vmul.f32 -1.442695, %v1328_v24  ;;  %1600 = vmatpush.bf16.msrb.mxu0 %v3694_v29  ;;  %v3687_v24 = vld [vmem:[#allocation4 + $0x18] sm:$0xf0] }
 0x266   :  { %v4707_v36 = vpop.eup %4706  ;;  %1613 = vmatpush.bf16.msrb.mxu1 %v3698_v46  ;;  %v3690_v28 = vor.u32 %v4495_v34, %v3687_v24 }
 0x267   :  { %v4709_v57 = vpop.eup %4708  ;;  %v1332_v62 = vadd.f32 1.0, %v4707_v36  ;;  %4710 = vpow2.f32 %v3674_v43  ;;  %1626 = vmatpush.bf16.msrb.mxu2 %v3702_v1 }
 0x268   :  { %v1351_v47 = vadd.f32 1.0, %v4709_v57  ;;  %1640 = vmatpush.bf16.msra.mxu3 %v3690_v28  ;;  %v3920_v28 = vld [vmem:[#allocation4 + $0xe0] sm:$0xf] }
 0x269   :  { %4712 = vrcp.f32 %v1332_v62  ;;  %1601 = vmatpush.bf16.msrb.mxu0 %v3678_v8  ;;  %v1344_v41 = vand.u32 2147483648, %v1332_v62  ;;  %v1342_v40 = vand.u32 2147483647, %v1332_v62  ;;  %vm1338_vm10 = vweird.f32 %v1332_v62 }
 0x26a   :  { %4714 = vrcp.f32 %v1351_v47  ;;  %v1310_v54 = vpop.f32.mrf.mxu2  ;;  %v1323_v7 = vpop.f32.mrf.mxu3  ;;  %1614 = vmatpush.bf16.msrb.mxu1 %v3682_v15  ;;  %v1363_v43 = vand.u32 2147483648, %v1351_v47  ;;  %v1361_v29 = vand.u32 2147483647, %v1351_v47  ;;  %vm1357_vm11 = vweird.f32 %v1351_v47 }
 0x26b   :  { %1627 = vmatpush.bf16.msrb.mxu2 %v3686_v16  ;;  %v1345_v49 = vor.u32 1.1754944e-38, %v1344_v41  ;;  %vm1343_vm14 = vcmp.eq.f32.partialorder %v1342_v40, 8.507059e+37  ;;  %v3930_v41 = vld [vmem:[#allocation4 + $0xf8] sm:$0xf0]  ;;  %v4552_v40 = vld [vmem:[#allocation4 + $0xcc] sm:$0xf0] }
 0x26c   :  { %v1364_v55 = vor.u32 1.1754944e-38, %v1363_v43  ;;  %vm1362_vm15 = vcmp.eq.f32.partialorder %v1361_v29, 8.507059e+37 }
 0x26d   :  { %v4711_v18 = vpop.eup %4710 }
 0x26e   :  { %v1371_v26 = vadd.f32 1.0, %v4711_v18  ;;  %v4556_v18 = vld [vmem:[#allocation4 + $0xec] sm:$0xf0] }
 0x26f   :  { %v4713_v21 = vpop.eup %4712 }
 0x270   :  { %v4715_v37 = vpop.eup %4714  ;;  %v1334_v39 = vmul.f32 %v4713_v21, %v1332_v62  ;;  %4716 = vrcp.f32 %v1371_v26  ;;  %vm1339_vm8 = vweird.f32 %v4713_v21  ;;  %v1383_v7 = vand.u32 2147483648, %v1371_v26 }
 0x271   :  { %v1353_v23 = vmul.f32 %v4715_v37, %v1351_v47  ;;  %4718 = vtanh.f32 %v1327_v19  ;;  %vm1358_vm9 = vweird.f32 %v4715_v37  ;;  %vm1340_vm12 = vmor %vm1338_vm10, %vm1339_vm8  ;;  %vm1377_vm1 = vweird.f32 %v1371_v26 }
 0x272   :  { %v1335_v42 = vsub.f32 1.0, %v1334_v39  ;;  %vm1359_vm13 = vmor %vm1357_vm11, %vm1358_vm9  ;;  %v1381_v8 = vand.u32 2147483647, %v1371_v26  ;;  %v1384_v15 = vor.u32 1.1754944e-38, %v1383_v7  ;;  %v3921_v19 = vor.u32 %v4556_v18, %v3920_v28  ;;  %v4557_v39 = vld [vmem:[#allocation4 + $0xf4] sm:$0xf0] }
 0x273   :  { %v1354_v35 = vsub.f32 1.0, %v1353_v23  ;;  %v299_v28 = vadd.f32 %v5155_v30, %v5129_v10  ;;  %v4540_v30 = vld [vmem:[#allocation4 + $0x6c] sm:$0xf0] }
 0x274   :  { %v1336_v61 = vmul.f32 %v4713_v21, %v1335_v42  ;;  %vm1382_vm3 = vcmp.eq.f32.partialorder %v1381_v8, 8.507059e+37  ;;  %1915 = vmatpush.bf16.msra.mxu0 %v3921_v19  ;;  %v4547_v8 = vld [vmem:[#allocation4 + $0xac] sm:$0xf]  ;;  %v3880_v19 = vld [vmem:[#allocation4 + $0x88] sm:$0xf] }
 0x275   :  { %v1355_v36 = vmul.f32 %v4715_v37, %v1354_v35  ;;  %v4555_v35 = vld [vmem:[#allocation4 + $0xec] sm:$0xf] }
 0x276   :  { %v4717_v46 = vpop.eup %4716  ;;  %v1337_v48 = vadd.f32 %v4713_v21, %v1336_v61  ;;  %v3933_v43 = vor.u32 %v4555_v35, %v3930_v41  ;;  %v3904_v61 = vld [vmem:[#allocation4 + $0xc0] sm:$0xf]  ;;  %v4543_v35 = vld [vmem:[#allocation4 + $0x8c] sm:$0xf]  ;;  %v3882_v41 = vld [vmem:[#allocation4 + $0x98] sm:$0xf0] }
 0x277   :  { %v1356_v6 = vadd.f32 %v4715_v37, %v1355_v36  ;;  %v1373_v0 = vmul.f32 %v4717_v46, %v1371_v26  ;;  %v4719_v1 = vpop.eup %4718  ;;  %vm1378_vm0 = vweird.f32 %v4717_v46  ;;  %v3922_v26 = vld [vmem:[#allocation4 + $0xf0] sm:$0xf0]  ;;  %v4550_v36 = vld [vmem:[#allocation4 + $0xc4] sm:$0xf]  ;;  %v3905_v29 = vor.u32 %v4552_v40, %v3904_v61 }
 0x278   :  { %v1341_v57 = vsel %vm1340_vm12, %v4713_v21, %v1337_v48  ;;  %vm1379_vm2 = vmor %vm1377_vm1, %vm1378_vm0  ;;  %v4554_v21 = vld [vmem:[#allocation4 + $0xe4] sm:$0xf]  ;;  %1954 = vmatpush.bf16.msrb.mxu3 %v3933_v43  ;;  %v3912_v48 = vld [vmem:[#allocation4 + $0xc8] sm:$0xf]  ;;  %v3885_v40 = vor.u32 %v4543_v35, %v3882_v41 }
 0x279   :  { %v1346_v25 = vsel %vm1343_vm14, %v1345_v49, %v1341_v57  ;;  %v1360_v3 = vsel %vm1359_vm13, %v4715_v37, %v1356_v6  ;;  %v1374_v4 = vsub.f32 1.0, %v1373_v0  ;;  %v3928_v37 = vld [vmem:[#allocation4 + $0xe8] sm:$0xf]  ;;  %v3925_v23 = vor.u32 %v4554_v21, %v3922_v26  ;;  %v4553_v49 = vld [vmem:[#allocation4 + $0xd4] sm:$0xf0]  ;;  %1916 = vmatpush.bf16.msra.mxu0 %v3905_v29 }
 0x27a   :  { %v1365_v50 = vsel %vm1362_vm15, %v1364_v55, %v1360_v3  ;;  %v1388_v5 = vmul.f32 %v4719_v1, %v1346_v25  ;;  %v3929_v42 = vor.u32 %v4557_v39, %v3928_v37  ;;  %v3913_v0 = vor.u32 %v4553_v49, %v3912_v48  ;;  %v4551_v55 = vld [vmem:[#allocation4 + $0xcc] sm:$0xf]  ;;  %v3914_v57 = vld [vmem:[#allocation4 + $0xd8] sm:$0xf0]  ;;  %v3888_v25 = vld [vmem:[#allocation4 + $0xa0] sm:$0xf] }
 0x27b   :  { %v1387_v12 = vmul.f32 %v1365_v50, %v5272_v44  ;;  %v1375_v54 = vmul.f32 %v4717_v46, %v1374_v4  ;;  %1928 = vmatpush.bf16.msra.mxu1 %v3925_v23  ;;  %v3917_v1 = vor.u32 %v4551_v55, %v3914_v57  ;;  %v4548_v3 = vld [vmem:[#allocation4 + $0xac] sm:$0xf0]  ;;  %v4546_v4 = vld [vmem:[#allocation4 + $0xa4] sm:$0xf]  ;;  %v3874_v21 = vld [vmem:[#allocation4 + $0x90] sm:$0xf0] }
 0x27c   :  { %1941 = vmatpush.bf16.msra.mxu2 %v3929_v42  ;;  %v3889_v50 = vor.u32 %v4548_v3, %v3888_v25  ;;  %v4545_v26 = vld [vmem:[#allocation4 + $0x94] sm:$0xf0]  ;;  %v4538_v29 = vld [vmem:[#allocation4 + $0x64] sm:$0xf]  ;;  %v3864_v55 = vld [vmem:[#allocation4 + $0x68] sm:$0xf] }
 0x27d   :  { %v5287_v62 = vadd.f32 %v1388_v5, %v1387_v12  ;;  %v1376_v47 = vadd.f32 %v4717_v46, %v1375_v54  ;;  %1955 = vmatpush.bf16.msrb.mxu3 %v3917_v1  ;;  %v3890_v5 = vld [vmem:[#allocation4 + $0xb0] sm:$0xf0]  ;;  %v3896_v12 = vld [vmem:[#allocation4 + $0xa8] sm:$0xf]  ;;  %v4549_v54 = vld [vmem:[#allocation4 + $0xb4] sm:$0xf0]  ;;  %v3881_v42 = vor.u32 %v4545_v26, %v3880_v19 }
 0x27e   :  { %v3897_v7 = vor.u32 %v4549_v54, %v3896_v12  ;;  %1917 = vmatpush.bf16.msra.mxu0 %v3889_v50  ;;  %v4541_v57 = vld [vmem:[#allocation4 + $0x74] sm:$0xf0]  ;;  %v4539_v1 = vld [vmem:[#allocation4 + $0x6c] sm:$0xf]  ;;  %v3840_v3 = vld [vmem:[#allocation4 + $0x40] sm:$0xf] }
 0x27f   :  { %4720 = vtanh.f32 %v5287_v62  ;;  %v1380_v11 = vsel %vm1379_vm2, %v4717_v46, %v1376_v47  ;;  %v3906_v46 = vld [vmem:[#allocation4 + $0xd0] sm:$0xf0]  ;;  %v3893_v47 = vor.u32 %v4546_v4, %v3890_v5  ;;  %v3865_v25 = vor.u32 %v4541_v57, %v3864_v55  ;;  %v4536_v4 = vld [vmem:[#allocation4 + $0x4c] sm:$0xf0]  ;;  %v4534_v12 = vld [vmem:[#allocation4 + $0x44] sm:$0xf] }
 0x280   :  { %v1385_v34 = vsel %vm1382_vm3, %v1384_v15, %v1380_v11  ;;  %v3909_v6 = vor.u32 %v4550_v36, %v3906_v46  ;;  %1942 = vmatpush.bf16.msra.mxu2 %v3913_v0  ;;  %v3898_v11 = vld [vmem:[#allocation4 + $0xb8] sm:$0xf0]  ;;  %v3856_v36 = vld [vmem:[#allocation4 + $0x60] sm:$0xf]  ;;  %v3841_v5 = vor.u32 %v4536_v4, %v3840_v3  ;;  %v3842_v54 = vld [vmem:[#allocation4 + $0x50] sm:$0xf0] }
 0x281   :  { %v3901_v15 = vor.u32 %v4547_v8, %v3898_v11  ;;  %v3857_v49 = vor.u32 %v4540_v30, %v3856_v36  ;;  %v3845_v11 = vor.u32 %v4534_v12, %v3842_v54  ;;  %v3824_v26 = vld [vmem:[#allocation4 + $0x20] sm:$0xf]  ;;  %v3832_v35 = vld [vmem:[#allocation4 + $0x28] sm:$0xf]  ;;  %v4533_v41 = vld [vmem:[#allocation4 + $0x34] sm:$0xf0] }
 0x282   :  { %1929 = vmatpush.bf16.msra.mxu1 %v3909_v6  ;;  %v3858_v6 = vld [vmem:[#allocation4 + $0x70] sm:$0xf0]  ;;  %v3834_v36 = vld [vmem:[#allocation4 + $0x38] sm:$0xf0]  ;;  %v3816_v57 = vld [vmem:[#allocation4 + $0x8] sm:$0xf] }
 0x283   :  { %1956 = vmatpush.bf16.msrb.mxu3 %v3901_v15  ;;  %v3861_v0 = vor.u32 %v4538_v29, %v3858_v6  ;;  %v4537_v15 = vld [vmem:[#allocation4 + $0x54] sm:$0xf0]  ;;  %v3808_v29 = vld [vmem:[#allocation4] sm:$0xf]  ;;  %v3810_v55 = vld [vmem:[#allocation4 + $0x10] sm:$0xf0] }
 0x284   :  { %1943 = vmatpush.bf16.msra.mxu2 %v3897_v7  ;;  %v4527_v3 = vld [vmem:[#allocation4 + $0xc] sm:$0xf] }
 0x285   :  { %v4721_v16 = vpop.eup %4720 }
 0x286   :  { %v5290_v24 = vmul.f32 %v4721_v16, %v1385_v34  ;;  %1930 = vmatpush.bf16.msra.mxu1 %v3893_v47  ;;  %v3872_v16 = vld [vmem:[#allocation4 + $0x80] sm:$0xf]  ;;  %v4544_v34 = vld [vmem:[#allocation4 + $0x8c] sm:$0xf0]  ;;  %v3848_v47 = vld [vmem:[#allocation4 + $0x48] sm:$0xf] }
 0x287   :  { %v3873_v18 = vor.u32 %v4544_v34, %v3872_v16  ;;  %1957 = vmatpush.bf16.msrb.mxu3 %v3885_v40  ;;  %v4535_v16 = vld [vmem:[#allocation4 + $0x4c] sm:$0xf]  ;;  %v3850_v34 = vld [vmem:[#allocation4 + $0x58] sm:$0xf0] }
 0x288   :  { %v1401_v44 = vpack.c.bf16 %v5290_v24, %v5290_v24  ;;  %1944 = vmatpush.bf16.msra.mxu2 %v3881_v42  ;;  %v3853_v19 = vor.u32 %v4535_v16, %v3850_v34  ;;  %v3826_v42 = vld [vmem:[#allocation4 + $0x30] sm:$0xf0]  ;;  %v4531_v40 = vld [vmem:[#allocation4 + $0x2c] sm:$0xf] }
 0x289   :  { %1918 = vmatpush.bf16.msra.mxu0 %v3873_v18 }
 0x28a   :  { %1602 = vmatmul.bf16.vlgmr.msrb.gmra.mxu0 %v1401_v44  ;;  %1615 = vmatmul.bf16.vlgmr.msrb.gmra.mxu1 %v1401_v44 }
 0x28b   :  { %1628 = vmatmul.bf16.vlgmr.msrb.gmra.mxu2 %v1401_v44  ;;  %1641 = vmatmul.bf16.vlgmr.msra.gmra.mxu3 %v1401_v44  ;;  %v4542_v44 = vld [vmem:[#allocation4 + $0x84] sm:$0xf] }
 0x28c   :  { %v3877_v23 = vor.u32 %v4542_v44, %v3874_v21  ;;  %1945 = vmatpush.bf16.msra.mxu2 %v3865_v25  ;;  %v3849_v21 = vor.u32 %v4537_v15, %v3848_v47 }
 0x28d   :  { %1919 = vmatpush.bf16.msra.mxu0 %v3857_v49 }
 0x28e   :  { %1931 = vmatpush.bf16.msra.mxu1 %v3877_v23 }
 0x290   :  { %1946 = vmatpush.bf16.msra.mxu2 %v3849_v21 }
 0x291   :  { %1920 = vmatpush.bf16.msra.mxu0 %v3841_v5 }
 0x292   :  { %1932 = vmatpush.bf16.msra.mxu1 %v3861_v0  ;;  %v3837_v0 = vor.u32 %v4531_v40, %v3834_v36 }
 0x296   :  { %1933 = vmatpush.bf16.msra.mxu1 %v3845_v11 }
 0x307   :  { %v1603_v37 = vpop.f32.mrf.mxu0  ;;  %v1616_v39 = vpop.f32.mrf.mxu1 }
 0x308   :  { %v1646_v43 = vadd.f32 %v1603_v37, %v299_v28  ;;  %v1647_v61 = vadd.f32 %v1616_v39, %v5192_v13  ;;  %v3866_v13 = vld [vmem:[#allocation4 + $0x78] sm:$0xf0]  ;;  %v4532_v37 = vld [vmem:[#allocation4 + $0x2c] sm:$0xf0]  ;;  %v4530_v39 = vld [vmem:[#allocation4 + $0x24] sm:$0xf] }
 0x309   :  { %v3869_v50 = vor.u32 %v4539_v1, %v3866_v13  ;;  %v3825_v23 = vor.u32 %v4532_v37, %v3824_v26  ;;  %v4529_v13 = vld [vmem:[#allocation4 + $0x14] sm:$0xf0] }
 0x30a   :  { %v3803_v46 = vmul.f32 -1.442695, %v1646_v43  ;;  %v3804_v48 = vmul.f32 -1.442695, %v1647_v61  ;;  %v3829_v61 = vor.u32 %v4530_v39, %v3826_v42  ;;  %v3817_v54 = vor.u32 %v4529_v13, %v3816_v57 }
 0x30b   :  { %1958 = vmatpush.bf16.msrb.mxu3 %v3869_v50  ;;  %1921 = vmatpush.bf16.msra.mxu0 %v3825_v23  ;;  %v3818_v50 = vld [vmem:[#allocation4 + $0x18] sm:$0xf0] }
 0x30c   :  { %4722 = vpow2.f32 %v3803_v46  ;;  %v4528_v46 = vld [vmem:[#allocation4 + $0xc] sm:$0xf0]  ;;  %1934 = vmatpush.bf16.msra.mxu1 %v3829_v61  ;;  %v3821_v47 = vor.u32 %v4527_v3, %v3818_v50 }
 0x30d   :  { %4724 = vpow2.f32 %v3804_v48  ;;  %v4526_v48 = vld [vmem:[#allocation4 + $0x4] sm:$0xf]  ;;  %v3809_v25 = vor.u32 %v4528_v46, %v3808_v29 }
 0x30e   :  { %v1629_v7 = vpop.f32.mrf.mxu2  ;;  %v1642_v8 = vpop.f32.mrf.mxu3  ;;  %v3813_v4 = vor.u32 %v4526_v48, %v3810_v55 }
 0x30f   :  { %v1649_v44 = vadd.f32 %v1642_v8, %v5160_v33  ;;  %v1605_v28 = vpop.f32.mrf.mxu0  ;;  %v1618_v18 = vpop.f32.mrf.mxu1  ;;  %v3833_v33 = vor.u32 %v4533_v41, %v3832_v35  ;;  %1959 = vmatpush.bf16.msrb.mxu3 %v3853_v19  ;;  %1922 = vmatpush.bf16.msra.mxu0 %v3809_v25  ;;  %v1648_v16 = vadd.f32 %v1629_v7, %v5195_v56 }
 0x310   :  { %1935 = vmatpush.bf16.msra.mxu1 %v3813_v4 }
 0x311   :  { %v3805_v43 = vmul.f32 -1.442695, %v1649_v44  ;;  %1947 = vmatpush.bf16.msra.mxu2 %v3833_v33 }
 0x312   :  { %v4723_v30 = vpop.eup %4722 }
 0x313   :  { %v4725_v49 = vpop.eup %4724  ;;  %v1653_v6 = vadd.f32 1.0, %v4723_v30  ;;  %4726 = vpow2.f32 %v3805_v43  ;;  %1960 = vmatpush.bf16.msrb.mxu3 %v3837_v0 }
 0x314   :  { %v1672_v1 = vadd.f32 1.0, %v4725_v49 }
 0x315   :  { %4728 = vrcp.f32 %v1653_v6  ;;  %1948 = vmatpush.bf16.msra.mxu2 %v3817_v54  ;;  %v1665_v19 = vand.u32 2147483648, %v1653_v6  ;;  %v1663_v39 = vand.u32 2147483647, %v1653_v6  ;;  %vm1659_vm6 = vweird.f32 %v1653_v6  ;;  %v4586_v54 = vld [vmem:[#allocation4 + $0xe4] sm:$0xf] }
 0x316   :  { %4730 = vrcp.f32 %v1672_v1  ;;  %v1631_v5 = vpop.f32.mrf.mxu2  ;;  %v1644_v12 = vpop.f32.mrf.mxu3  ;;  %v1684_v26 = vand.u32 2147483648, %v1672_v1  ;;  %v1682_v42 = vand.u32 2147483647, %v1672_v1  ;;  %vm1678_vm7 = vweird.f32 %v1672_v1 }
 0x317   :  { %1961 = vmatpush.bf16.msrb.mxu3 %v3821_v47  ;;  %v1666_v56 = vor.u32 1.1754944e-38, %v1665_v19  ;;  %vm1664_vm10 = vcmp.eq.f32.partialorder %v1663_v39, 8.507059e+37  ;;  %v4051_v5 = vld [vmem:[#allocation4 + $0xe0] sm:$0xf]  ;;  %v4588_v12 = vld [vmem:[#allocation4 + $0xec] sm:$0xf0] }
 0x318   :  { %v1685_v61 = vor.u32 1.1754944e-38, %v1684_v26  ;;  %vm1683_vm11 = vcmp.eq.f32.partialorder %v1682_v42, 8.507059e+37  ;;  %v4052_v47 = vor.u32 %v4588_v12, %v4051_v5  ;;  %v4584_v19 = vld [vmem:[#allocation4 + $0xcc] sm:$0xf0]  ;;  %v4582_v26 = vld [vmem:[#allocation4 + $0xc4] sm:$0xf] }
 0x319   :  { %v4727_v8 = vpop.eup %4726  ;;  %v4037_v39 = vld [vmem:[#allocation4 + $0xd0] sm:$0xf0]  ;;  %v4585_v42 = vld [vmem:[#allocation4 + $0xd4] sm:$0xf0] }
 0x31a   :  { %v1692_v11 = vadd.f32 1.0, %v4727_v8  ;;  %v4053_v8 = vld [vmem:[#allocation4 + $0xf0] sm:$0xf0]  ;;  %2236 = vmatpush.bf16.msrb.mxu0 %v4052_v47  ;;  %v4577_v5 = vld [vmem:[#allocation4 + $0x94] sm:$0xf0] }
 0x31b   :  { %v4729_v15 = vpop.eup %4728  ;;  %v4575_v47 = vld [vmem:[#allocation4 + $0x8c] sm:$0xf] }
 0x31c   :  { %v4731_v34 = vpop.eup %4730  ;;  %v1655_v44 = vmul.f32 %v4729_v15, %v1653_v6  ;;  %4732 = vrcp.f32 %v1692_v11  ;;  %vm1660_vm4 = vweird.f32 %v4729_v15  ;;  %v1704_v57 = vand.u32 2147483648, %v1692_v11 }
 0x31d   :  { %v1674_v28 = vmul.f32 %v4731_v34, %v1672_v1  ;;  %4734 = vtanh.f32 %v1648_v16  ;;  %vm1679_vm5 = vweird.f32 %v4731_v34  ;;  %vm1661_vm8 = vmor %vm1659_vm6, %vm1660_vm4  ;;  %vm1698_vm13 = vweird.f32 %v1692_v11 }
 0x31e   :  { %v1656_v18 = vsub.f32 1.0, %v1655_v44  ;;  %vm1680_vm9 = vmor %vm1678_vm7, %vm1679_vm5  ;;  %v1702_v1 = vand.u32 2147483647, %v1692_v11  ;;  %v1705_v13 = vor.u32 1.1754944e-38, %v1704_v57  ;;  %v4056_v16 = vor.u32 %v4586_v54, %v4053_v8  ;;  %v4587_v44 = vld [vmem:[#allocation4 + $0xec] sm:$0xf] }
 0x31f   :  { %v1675_v21 = vsub.f32 1.0, %v1674_v28  ;;  %v4061_v28 = vld [vmem:[#allocation4 + $0xf8] sm:$0xf0] }
 0x320   :  { %v1657_v37 = vmul.f32 %v4729_v15, %v1656_v18  ;;  %vm1703_vm15 = vcmp.eq.f32.partialorder %v1702_v1, 8.507059e+37  ;;  %v4064_v18 = vor.u32 %v4587_v44, %v4061_v28  ;;  %2249 = vmatpush.bf16.msrb.mxu1 %v4056_v16  ;;  %v4003_v1 = vld [vmem:[#allocation4 + $0x80] sm:$0xf]  ;;  %v4013_v8 = vld [vmem:[#allocation4 + $0x98] sm:$0xf0] }
 0x321   :  { %v1676_v23 = vmul.f32 %v4731_v34, %v1675_v21  ;;  %v4035_v21 = vld [vmem:[#allocation4 + $0xc0] sm:$0xf]  ;;  %v4016_v16 = vor.u32 %v4575_v47, %v4013_v8  ;;  %v4565_v47 = vld [vmem:[#allocation4 + $0x34] sm:$0xf0] }
 0x322   :  { %v4733_v35 = vpop.eup %4732  ;;  %v1658_v41 = vadd.f32 %v4729_v15, %v1657_v37  ;;  %2275 = vmatpush.bf16.msra.mxu3 %v4064_v18  ;;  %v4036_v37 = vor.u32 %v4584_v19, %v4035_v21  ;;  %v3987_v28 = vld [vmem:[#allocation4 + $0x60] sm:$0xf]  ;;  %v4572_v18 = vld [vmem:[#allocation4 + $0x6c] sm:$0xf0]  ;;  %v4570_v21 = vld [vmem:[#allocation4 + $0x64] sm:$0xf] }
 0x323   :  { %v1677_v7 = vadd.f32 %v4731_v34, %v1676_v23  ;;  %v1694_v43 = vmul.f32 %v4733_v35, %v1692_v11  ;;  %v4735_v36 = vpop.eup %4734  ;;  %vm1699_vm12 = vweird.f32 %v4733_v35  ;;  %v4059_v11 = vld [vmem:[#allocation4 + $0xe8] sm:$0xf]  ;;  %v3988_v19 = vor.u32 %v4572_v18, %v3987_v28  ;;  %v4560_v28 = vld [vmem:[#allocation4 + $0xc] sm:$0xf0]  ;;  %v4558_v18 = vld [vmem:[#allocation4 + $0x4] sm:$0xf] }
 0x324   :  { %v1662_v40 = vsel %vm1661_vm8, %v4729_v15, %v1658_v41  ;;  %vm1700_vm14 = vmor %vm1698_vm13, %vm1699_vm12  ;;  %v4589_v15 = vld [vmem:[#allocation4 + $0xf4] sm:$0xf0]  ;;  %v4043_v23 = vld [vmem:[#allocation4 + $0xc8] sm:$0xf]  ;;  %2237 = vmatpush.bf16.msrb.mxu0 %v4036_v37 }
 0x325   :  { %v1667_v30 = vsel %vm1664_vm10, %v1666_v56, %v1662_v40  ;;  %v1681_v33 = vsel %vm1680_vm9, %v4731_v34, %v1677_v7  ;;  %v1695_v29 = vsub.f32 1.0, %v1694_v43  ;;  %v4060_v34 = vor.u32 %v4589_v15, %v4059_v11  ;;  %v4583_v56 = vld [vmem:[#allocation4 + $0xcc] sm:$0xf]  ;;  %v4045_v7 = vld [vmem:[#allocation4 + $0xd8] sm:$0xf0] }
 0x326   :  { %v1686_v46 = vsel %vm1683_vm11, %v1685_v61, %v1681_v33  ;;  %v1709_v48 = vmul.f32 %v4735_v36, %v1667_v30  ;;  %v4044_v41 = vor.u32 %v4585_v42, %v4043_v23  ;;  %v4048_v43 = vor.u32 %v4583_v56, %v4045_v7  ;;  %v4019_v61 = vld [vmem:[#allocation4 + $0xa0] sm:$0xf]  ;;  %v4580_v40 = vld [vmem:[#allocation4 + $0xac] sm:$0xf0]  ;;  %v4578_v36 = vld [vmem:[#allocation4 + $0xa4] sm:$0xf] }
 0x327   :  { %v1708_v49 = vmul.f32 %v1686_v46, %v5287_v62  ;;  %v1696_v0 = vmul.f32 %v4733_v35, %v1695_v29  ;;  %2262 = vmatpush.bf16.msrb.mxu2 %v4060_v34  ;;  %v4020_v30 = vor.u32 %v4580_v40, %v4019_v61  ;;  %v4021_v33 = vld [vmem:[#allocation4 + $0xb0] sm:$0xf0]  ;;  %v4027_v29 = vld [vmem:[#allocation4 + $0xa8] sm:$0xf]  ;;  %v4581_v46 = vld [vmem:[#allocation4 + $0xb4] sm:$0xf0] }
 0x328   :  { %2276 = vmatpush.bf16.msra.mxu3 %v4048_v43  ;;  %v3995_v37 = vld [vmem:[#allocation4 + $0x68] sm:$0xf]  ;;  %v4571_v56 = vld [vmem:[#allocation4 + $0x6c] sm:$0xf]  ;;  %v3997_v7 = vld [vmem:[#allocation4 + $0x78] sm:$0xf0] }
 0x329   :  { %v5300_v6 = vadd.f32 %v1709_v48, %v1708_v49  ;;  %v1697_v55 = vadd.f32 %v4733_v35, %v1696_v0  ;;  %v4024_v48 = vor.u32 %v4578_v36, %v4021_v33  ;;  %v4028_v49 = vor.u32 %v4581_v46, %v4027_v29  ;;  %v4579_v0 = vld [vmem:[#allocation4 + $0xac] sm:$0xf]  ;;  %2238 = vmatpush.bf16.msrb.mxu0 %v4020_v30  ;;  %v4568_v43 = vld [vmem:[#allocation4 + $0x4c] sm:$0xf0]  ;;  %v4566_v40 = vld [vmem:[#allocation4 + $0x44] sm:$0xf] }
 0x32a   :  { %v3973_v36 = vld [vmem:[#allocation4 + $0x50] sm:$0xf0]  ;;  %v3979_v30 = vld [vmem:[#allocation4 + $0x48] sm:$0xf]  ;;  %v4569_v29 = vld [vmem:[#allocation4 + $0x54] sm:$0xf0] }
 0x32b   :  { %4736 = vtanh.f32 %v5300_v6  ;;  %v1701_v25 = vsel %vm1700_vm14, %v4733_v35, %v1697_v55  ;;  %v4040_v35 = vor.u32 %v4582_v26, %v4037_v39  ;;  %2263 = vmatpush.bf16.msrb.mxu2 %v4044_v41  ;;  %v4029_v55 = vld [vmem:[#allocation4 + $0xb8] sm:$0xf0]  ;;  %v3989_v26 = vld [vmem:[#allocation4 + $0x70] sm:$0xf0]  ;;  %v4573_v39 = vld [vmem:[#allocation4 + $0x74] sm:$0xf0]  ;;  %v3976_v33 = vor.u32 %v4566_v40, %v3973_v36 }
 0x32c   :  { %v1706_v4 = vsel %vm1703_vm15, %v1705_v13, %v1701_v25  ;;  %v4032_v57 = vor.u32 %v4579_v0, %v4029_v55  ;;  %v4576_v25 = vld [vmem:[#allocation4 + $0x8c] sm:$0xf0]  ;;  %v4574_v13 = vld [vmem:[#allocation4 + $0x84] sm:$0xf]  ;;  %v3996_v41 = vor.u32 %v4573_v39, %v3995_v37  ;;  %v4567_v46 = vld [vmem:[#allocation4 + $0x4c] sm:$0xf]  ;;  %v3980_v55 = vor.u32 %v4569_v29, %v3979_v30 }
 0x32d   :  { %2250 = vmatpush.bf16.msrb.mxu1 %v4040_v35  ;;  %v3992_v35 = vor.u32 %v4570_v21, %v3989_v26  ;;  %v3947_v26 = vld [vmem:[#allocation4 + $0x8] sm:$0xf]  ;;  %v4561_v37 = vld [vmem:[#allocation4 + $0x14] sm:$0xf0] }
 0x32e   :  { %2277 = vmatpush.bf16.msra.mxu3 %v4032_v57 }
 0x32f   :  { %2264 = vmatpush.bf16.msrb.mxu2 %v4028_v49 }
 0x331   :  { %v4737_v3 = vpop.eup %4736  ;;  %2251 = vmatpush.bf16.msrb.mxu1 %v4024_v48  ;;  %v3981_v48 = vld [vmem:[#allocation4 + $0x58] sm:$0xf0] }
 0x332   :  { %v5303_v50 = vmul.f32 %v4737_v3, %v1706_v4  ;;  %v4004_v3 = vor.u32 %v4576_v25, %v4003_v1  ;;  %v4005_v4 = vld [vmem:[#allocation4 + $0x90] sm:$0xf0]  ;;  %2278 = vmatpush.bf16.msra.mxu3 %v4016_v16  ;;  %v3984_v57 = vor.u32 %v4567_v46, %v3981_v48  ;;  %v3955_v1 = vld [vmem:[#allocation4 + $0x20] sm:$0xf]  ;;  %v4564_v25 = vld [vmem:[#allocation4 + $0x2c] sm:$0xf0] }
 0x333   :  { %v4008_v12 = vor.u32 %v4574_v13, %v4005_v4  ;;  %v4562_v13 = vld [vmem:[#allocation4 + $0x24] sm:$0xf]  ;;  %v3965_v16 = vld [vmem:[#allocation4 + $0x38] sm:$0xf0] }
 0x334   :  { %v1722_v62 = vpack.c.bf16 %v5303_v50, %v5303_v50  ;;  %2239 = vmatpush.bf16.msrb.mxu0 %v4004_v3 }
 0x335   :  { %2252 = vmatpush.bf16.msrb.mxu1 %v4008_v12  ;;  %v3957_v12 = vld [vmem:[#allocation4 + $0x30] sm:$0xf0] }
 0x336   :  { %1923 = vmatmul.bf16.vlgmr.msra.gmra.mxu0 %v1722_v62  ;;  %1936 = vmatmul.bf16.vlgmr.msra.gmra.mxu1 %v1722_v62  ;;  %v3960_v8 = vor.u32 %v4562_v13, %v3957_v12 }
 0x337   :  { %1949 = vmatmul.bf16.vlgmr.msra.gmra.mxu2 %v1722_v62  ;;  %1962 = vmatmul.bf16.vlgmr.msrb.gmra.mxu3 %v1722_v62  ;;  %v4011_v62 = vld [vmem:[#allocation4 + $0x88] sm:$0xf] }
 0x338   :  { %v4012_v54 = vor.u32 %v4577_v5, %v4011_v62  ;;  %2240 = vmatpush.bf16.msrb.mxu0 %v3988_v19  ;;  %v3956_v5 = vor.u32 %v4564_v25, %v3955_v1  ;;  %v3941_v19 = vld [vmem:[#allocation4 + $0x10] sm:$0xf0] }
 0x339   :  { %2253 = vmatpush.bf16.msrb.mxu1 %v3992_v35  ;;  %v4559_v35 = vld [vmem:[#allocation4 + $0xc] sm:$0xf] }
 0x33a   :  { %2265 = vmatpush.bf16.msrb.mxu2 %v4012_v54  ;;  %v3963_v54 = vld [vmem:[#allocation4 + $0x28] sm:$0xf] }
 0x33d   :  { %2254 = vmatpush.bf16.msrb.mxu1 %v3976_v33 }
 0x33e   :  { %2266 = vmatpush.bf16.msrb.mxu2 %v3996_v41  ;;  %v3949_v41 = vld [vmem:[#allocation4 + $0x18] sm:$0xf0] }
 0x341   :  { %2255 = vmatpush.bf16.msrb.mxu1 %v3960_v8 }
 0x342   :  { %2267 = vmatpush.bf16.msrb.mxu2 %v3980_v55 }
 0x3b3   :  { %v1924_v11 = vpop.f32.mrf.mxu0  ;;  %v1937_v15 = vpop.f32.mrf.mxu1 }
 0x3b4   :  { %v1967_v34 = vadd.f32 %v1924_v11, %v5133_v17  ;;  %v1968_v44 = vadd.f32 %v1937_v15, %v5201_v60  ;;  %v3971_v17 = vld [vmem:[#allocation4 + $0x40] sm:$0xf]  ;;  %v4000_v60 = vor.u32 %v4571_v56, %v3997_v7  ;;  %v3964_v11 = vor.u32 %v4565_v47, %v3963_v54  ;;  %v4563_v15 = vld [vmem:[#allocation4 + $0x2c] sm:$0xf] }
 0x3b5   :  { %v3972_v61 = vor.u32 %v4568_v43, %v3971_v17  ;;  %v3944_v7 = vor.u32 %v4558_v18, %v3941_v19  ;;  %v3948_v17 = vor.u32 %v4561_v37, %v3947_v26 }
 0x3b6   :  { %v3934_v23 = vmul.f32 -1.442695, %v1967_v34  ;;  %v3935_v42 = vmul.f32 -1.442695, %v1968_v44  ;;  %2279 = vmatpush.bf16.msra.mxu3 %v4000_v60  ;;  %v3939_v34 = vld [vmem:[#allocation4] sm:$0xf]  ;;  %2268 = vmatpush.bf16.msrb.mxu2 %v3964_v11 }
 0x3b7   :  { %2241 = vmatpush.bf16.msrb.mxu0 %v3972_v61  ;;  %v3952_v61 = vor.u32 %v4559_v35, %v3949_v41  ;;  %2256 = vmatpush.bf16.msrb.mxu1 %v3944_v7  ;;  %v4182_v41 = vld [vmem:[#allocation4 + $0xe0] sm:$0xf]  ;;  %v4618_v7 = vld [vmem:[#allocation4 + $0xe4] sm:$0xf] }
 0x3b8   :  { %4738 = vpow2.f32 %v3934_v23 }
 0x3b9   :  { %4740 = vpow2.f32 %v3935_v42  ;;  %v3940_v42 = vor.u32 %v4560_v28, %v3939_v34 }
 0x3ba   :  { %v1950_v49 = vpop.f32.mrf.mxu2  ;;  %v1963_v0 = vpop.f32.mrf.mxu3  ;;  %2280 = vmatpush.bf16.msra.mxu3 %v3984_v57  ;;  %2269 = vmatpush.bf16.msrb.mxu2 %v3948_v17 }
 0x3bb   :  { %v1970_v3 = vadd.f32 %v1963_v0, %v5169_v38  ;;  %v1926_v4 = vpop.f32.mrf.mxu0  ;;  %v1939_v62 = vpop.f32.mrf.mxu1  ;;  %v3968_v38 = vor.u32 %v4563_v15, %v3965_v16  ;;  %2242 = vmatpush.bf16.msrb.mxu0 %v3956_v5  ;;  %v1969_v33 = vadd.f32 %v1950_v49, %v5204_v63 }
 0x3bd   :  { %v3936_v44 = vmul.f32 -1.442695, %v1970_v3 }
 0x3be   :  { %v4739_v21 = vpop.eup %4738  ;;  %2281 = vmatpush.bf16.msra.mxu3 %v3968_v38 }
 0x3bf   :  { %v4741_v39 = vpop.eup %4740  ;;  %v1974_v23 = vadd.f32 1.0, %v4739_v21  ;;  %4742 = vpow2.f32 %v3936_v44  ;;  %2243 = vmatpush.bf16.msrb.mxu0 %v3940_v42 }
 0x3c0   :  { %v1993_v56 = vadd.f32 1.0, %v4741_v39 }
 0x3c1   :  { %4744 = vrcp.f32 %v1974_v23  ;;  %v1986_v57 = vand.u32 2147483648, %v1974_v23  ;;  %v1984_v13 = vand.u32 2147483647, %v1974_v23  ;;  %vm1980_vm2 = vweird.f32 %v1974_v23 }
 0x3c2   :  { %4746 = vrcp.f32 %v1993_v56  ;;  %v1952_v43 = vpop.f32.mrf.mxu2  ;;  %v1965_v60 = vpop.f32.mrf.mxu3  ;;  %2282 = vmatpush.bf16.msra.mxu3 %v3952_v61  ;;  %v2005_v1 = vand.u32 2147483648, %v1993_v56  ;;  %v2003_v4 = vand.u32 2147483647, %v1993_v56  ;;  %vm1999_vm3 = vweird.f32 %v1993_v56  ;;  %v4621_v61 = vld [vmem:[#allocation4 + $0xf4] sm:$0xf0] }
 0x3c3   :  { %v1987_v63 = vor.u32 1.1754944e-38, %v1986_v57  ;;  %vm1985_vm6 = vcmp.eq.f32.partialorder %v1984_v13, 8.507059e+37  ;;  %v4184_v43 = vld [vmem:[#allocation4 + $0xf0] sm:$0xf0]  ;;  %v4190_v60 = vld [vmem:[#allocation4 + $0xe8] sm:$0xf] }
 0x3c4   :  { %v2006_v54 = vor.u32 1.1754944e-38, %v2005_v1  ;;  %vm2004_vm7 = vcmp.eq.f32.partialorder %v2003_v4, 8.507059e+37  ;;  %v4168_v57 = vld [vmem:[#allocation4 + $0xd0] sm:$0xf0]  ;;  %v4174_v1 = vld [vmem:[#allocation4 + $0xc8] sm:$0xf] }
 0x3c5   :  { %v4743_v40 = vpop.eup %4742  ;;  %v4615_v4 = vld [vmem:[#allocation4 + $0xcc] sm:$0xf] }
 0x3c6   :  { %v2013_v36 = vadd.f32 1.0, %v4743_v40  ;;  %v4187_v40 = vor.u32 %v4618_v7, %v4184_v43  ;;  %v304_v7 = vadd.f32 %v5141_v20, %v5129_v10  ;;  %v4603_v20 = vld [vmem:[#allocation4 + $0x6c] sm:$0xf] }
 0x3c7   :  { %v4745_v30 = vpop.eup %4744 }
 0x3c8   :  { %v4747_v29 = vpop.eup %4746  ;;  %v1976_v46 = vmul.f32 %v4745_v30, %v1974_v23  ;;  %4748 = vrcp.f32 %v2013_v36  ;;  %vm1981_vm0 = vweird.f32 %v4745_v30  ;;  %v2025_v19 = vand.u32 2147483648, %v2013_v36  ;;  %2570 = vmatpush.bf16.msra.mxu1 %v4187_v40  ;;  %v4604_v40 = vld [vmem:[#allocation4 + $0x6c] sm:$0xf0] }
 0x3c9   :  { %v1995_v48 = vmul.f32 %v4747_v29, %v1993_v56  ;;  %4750 = vtanh.f32 %v1969_v33  ;;  %vm2000_vm1 = vweird.f32 %v4747_v29  ;;  %vm1982_vm4 = vmor %vm1980_vm2, %vm1981_vm0  ;;  %vm2019_vm9 = vweird.f32 %v2013_v36  ;;  %v4620_v56 = vld [vmem:[#allocation4 + $0xec] sm:$0xf0]  ;;  %v4192_v33 = vld [vmem:[#allocation4 + $0xf8] sm:$0xf0] }
 0x3ca   :  { %v1977_v0 = vsub.f32 1.0, %v1976_v46  ;;  %vm2001_vm5 = vmor %vm1999_vm3, %vm2000_vm1  ;;  %v2023_v26 = vand.u32 2147483647, %v2013_v36  ;;  %v2026_v39 = vor.u32 1.1754944e-38, %v2025_v19  ;;  %v4183_v17 = vor.u32 %v4620_v56, %v4182_v41  ;;  %v4166_v46 = vld [vmem:[#allocation4 + $0xc0] sm:$0xf] }
 0x3cb   :  { %v1996_v55 = vsub.f32 1.0, %v1995_v48  ;;  %v4616_v48 = vld [vmem:[#allocation4 + $0xcc] sm:$0xf0]  ;;  %v4606_v19 = vld [vmem:[#allocation4 + $0x84] sm:$0xf] }
 0x3cc   :  { %v1978_v25 = vmul.f32 %v4745_v30, %v1977_v0  ;;  %vm2024_vm11 = vcmp.eq.f32.partialorder %v2023_v26, 8.507059e+37  ;;  %2557 = vmatpush.bf16.msra.mxu0 %v4183_v17  ;;  %v4614_v0 = vld [vmem:[#allocation4 + $0xc4] sm:$0xf]  ;;  %v4607_v41 = vld [vmem:[#allocation4 + $0x8c] sm:$0xf] }
 0x3cd   :  { %v1997_v3 = vmul.f32 %v4747_v29, %v1996_v55  ;;  %v4167_v55 = vor.u32 %v4616_v48, %v4166_v46  ;;  %v4171_v13 = vor.u32 %v4614_v0, %v4168_v57  ;;  %v4144_v56 = vld [vmem:[#allocation4 + $0x98] sm:$0xf0]  ;;  %v4120_v46 = vld [vmem:[#allocation4 + $0x70] sm:$0xf0]  ;;  %v4126_v48 = vld [vmem:[#allocation4 + $0x68] sm:$0xf] }
 0x3ce   :  { %v4749_v62 = vpop.eup %4748  ;;  %v1979_v5 = vadd.f32 %v4745_v30, %v1978_v25  ;;  %v4617_v25 = vld [vmem:[#allocation4 + $0xd4] sm:$0xf0]  ;;  %v4147_v17 = vor.u32 %v4607_v41, %v4144_v56 }
 0x3cf   :  { %v1998_v49 = vadd.f32 %v4747_v29, %v1997_v3  ;;  %v2015_v12 = vmul.f32 %v4749_v62, %v2013_v36  ;;  %v4751_v8 = vpop.eup %4750  ;;  %vm2020_vm8 = vweird.f32 %v4749_v62  ;;  %v4191_v36 = vor.u32 %v4621_v61, %v4190_v60  ;;  %2571 = vmatpush.bf16.msra.mxu1 %v4171_v13  ;;  %v4118_v61 = vld [vmem:[#allocation4 + $0x60] sm:$0xf]  ;;  %v4605_v0 = vld [vmem:[#allocation4 + $0x74] sm:$0xf0] }
 0x3d0   :  { %v1983_v47 = vsel %vm1982_vm4, %v4745_v30, %v1979_v5  ;;  %vm2021_vm10 = vmor %vm2019_vm9, %vm2020_vm8  ;;  %v4619_v30 = vld [vmem:[#allocation4 + $0xec] sm:$0xf]  ;;  %v4175_v3 = vor.u32 %v4617_v25, %v4174_v1  ;;  %2558 = vmatpush.bf16.msra.mxu0 %v4167_v55  ;;  %v4127_v57 = vor.u32 %v4605_v0, %v4126_v48  ;;  %v4128_v1 = vld [vmem:[#allocation4 + $0x78] sm:$0xf0] }
 0x3d1   :  { %v1988_v11 = vsel %vm1985_vm6, %v1987_v63, %v1983_v47  ;;  %v2002_v15 = vsel %vm2001_vm5, %v4747_v29, %v1998_v49  ;;  %v2016_v16 = vsub.f32 1.0, %v2015_v12  ;;  %v4195_v29 = vor.u32 %v4619_v30, %v4192_v33  ;;  %2583 = vmatpush.bf16.msra.mxu2 %v4191_v36  ;;  %v4150_v63 = vld [vmem:[#allocation4 + $0xa0] sm:$0xf]  ;;  %v4612_v49 = vld [vmem:[#allocation4 + $0xac] sm:$0xf0] }
 0x3d2   :  { %v2007_v34 = vsel %vm2004_vm7, %v2006_v54, %v2002_v15  ;;  %v2030_v44 = vmul.f32 %v4751_v8, %v1988_v11  ;;  %v4610_v12 = vld [vmem:[#allocation4 + $0xa4] sm:$0xf]  ;;  %v4151_v54 = vor.u32 %v4612_v49, %v4150_v63  ;;  %v4152_v47 = vld [vmem:[#allocation4 + $0xb0] sm:$0xf0]  ;;  %v4158_v8 = vld [vmem:[#allocation4 + $0xa8] sm:$0xf] }
 0x3d3   :  { %v2029_v28 = vmul.f32 %v2007_v34, %v5300_v6  ;;  %v2017_v18 = vmul.f32 %v4749_v62, %v2016_v16  ;;  %2596 = vmatpush.bf16.msrb.mxu3 %v4195_v29  ;;  %v4613_v11 = vld [vmem:[#allocation4 + $0xb4] sm:$0xf0]  ;;  %v4155_v15 = vor.u32 %v4610_v12, %v4152_v47  ;;  %v4611_v34 = vld [vmem:[#allocation4 + $0xac] sm:$0xf]  ;;  %v4602_v36 = vld [vmem:[#allocation4 + $0x64] sm:$0xf]  ;;  %v4119_v29 = vor.u32 %v4604_v40, %v4118_v61 }
 0x3d4   :  { %v4159_v16 = vor.u32 %v4613_v11, %v4158_v8  ;;  %2559 = vmatpush.bf16.msra.mxu0 %v4151_v54  ;;  %v4123_v55 = vor.u32 %v4602_v36, %v4120_v46  ;;  %v4104_v63 = vld [vmem:[#allocation4 + $0x50] sm:$0xf0]  ;;  %v4110_v49 = vld [vmem:[#allocation4 + $0x48] sm:$0xf]  ;;  %v4601_v12 = vld [vmem:[#allocation4 + $0x54] sm:$0xf0] }
 0x3d5   :  { %v5312_v21 = vadd.f32 %v2030_v44, %v2029_v28  ;;  %v2018_v38 = vadd.f32 %v4749_v62, %v2017_v18  ;;  %2584 = vmatpush.bf16.msra.mxu2 %v4175_v3  ;;  %v4160_v44 = vld [vmem:[#allocation4 + $0xb8] sm:$0xf0]  ;;  %2572 = vmatpush.bf16.msra.mxu1 %v4155_v15  ;;  %v4134_v18 = vld [vmem:[#allocation4 + $0x80] sm:$0xf]  ;;  %v4131_v3 = vor.u32 %v4603_v20, %v4128_v1  ;;  %v4599_v8 = vld [vmem:[#allocation4 + $0x4c] sm:$0xf] }
 0x3d6   :  { %v4163_v28 = vor.u32 %v4611_v34, %v4160_v44  ;;  %v4111_v47 = vor.u32 %v4601_v12, %v4110_v49  ;;  %v4112_v11 = vld [vmem:[#allocation4 + $0x58] sm:$0xf0]  ;;  %v4086_v15 = vld [vmem:[#allocation4 + $0x20] sm:$0xf]  ;;  %v4590_v40 = vld [vmem:[#allocation4 + $0x4] sm:$0xf] }
 0x3d7   :  { %4752 = vtanh.f32 %v5312_v21  ;;  %v2022_v37 = vsel %vm2021_vm10, %v4749_v62, %v2018_v38  ;;  %v4176_v62 = vld [vmem:[#allocation4 + $0xd8] sm:$0xf0]  ;;  %v4608_v38 = vld [vmem:[#allocation4 + $0x8c] sm:$0xf0]  ;;  %v4115_v44 = vor.u32 %v4599_v8, %v4112_v11  ;;  %v4072_v36 = vld [vmem:[#allocation4 + $0x10] sm:$0xf0] }
 0x3d8   :  { %v2027_v42 = vsel %vm2024_vm11, %v2026_v39, %v2022_v37  ;;  %v4179_v5 = vor.u32 %v4615_v4, %v4176_v62  ;;  %v4135_v26 = vor.u32 %v4608_v38, %v4134_v18  ;;  %v4136_v37 = vld [vmem:[#allocation4 + $0x90] sm:$0xf0]  ;;  %v4142_v39 = vld [vmem:[#allocation4 + $0x88] sm:$0xf]  ;;  %v4102_v4 = vld [vmem:[#allocation4 + $0x40] sm:$0xf] }
 0x3d9   :  { %2585 = vmatpush.bf16.msra.mxu2 %v4159_v16  ;;  %v4600_v62 = vld [vmem:[#allocation4 + $0x4c] sm:$0xf0]  ;;  %v4594_v18 = vld [vmem:[#allocation4 + $0x24] sm:$0xf]  ;;  %v4088_v38 = vld [vmem:[#allocation4 + $0x30] sm:$0xf0] }
 0x3da   :  { %2597 = vmatpush.bf16.msrb.mxu3 %v4179_v5  ;;  %2560 = vmatpush.bf16.msra.mxu0 %v4135_v26  ;;  %v4598_v5 = vld [vmem:[#allocation4 + $0x44] sm:$0xf]  ;;  %v4091_v41 = vor.u32 %v4594_v18, %v4088_v38  ;;  %v4591_v46 = vld [vmem:[#allocation4 + $0xc] sm:$0xf]  ;;  %v4080_v20 = vld [vmem:[#allocation4 + $0x18] sm:$0xf0] }
 0x3db   :  { %v4107_v54 = vor.u32 %v4598_v5, %v4104_v63 }
 0x3dd   :  { %v4753_v23 = vpop.eup %4752 }
 0x3de   :  { %v5315_v35 = vmul.f32 %v4753_v23, %v2027_v42  ;;  %2598 = vmatpush.bf16.msrb.mxu3 %v4163_v28  ;;  %v4609_v23 = vld [vmem:[#allocation4 + $0x94] sm:$0xf0]  ;;  %v4139_v42 = vor.u32 %v4606_v19, %v4136_v37  ;;  %2561 = vmatpush.bf16.msra.mxu0 %v4119_v29  ;;  %v4596_v28 = vld [vmem:[#allocation4 + $0x2c] sm:$0xf0] }
 0x3df   :  { %v4593_v29 = vld [vmem:[#allocation4 + $0x14] sm:$0xf0] }
 0x3e0   :  { %v2043_v6 = vpack.c.bf16 %v5315_v35, %v5315_v35  ;;  %2573 = vmatpush.bf16.msra.mxu1 %v4139_v42  ;;  %v4597_v42 = vld [vmem:[#allocation4 + $0x34] sm:$0xf0] }
 0x3e2   :  { %2244 = vmatmul.bf16.vlgmr.msrb.gmra.mxu0 %v2043_v6  ;;  %2257 = vmatmul.bf16.vlgmr.msrb.gmra.mxu1 %v2043_v6 }
 0x3e3   :  { %2270 = vmatmul.bf16.vlgmr.msrb.gmra.mxu2 %v2043_v6  ;;  %2283 = vmatmul.bf16.vlgmr.msra.gmra.mxu3 %v2043_v6  ;;  %v4143_v6 = vor.u32 %v4609_v23, %v4142_v39  ;;  %v4087_v39 = vor.u32 %v4596_v28, %v4086_v15  ;;  %v4094_v23 = vld [vmem:[#allocation4 + $0x28] sm:$0xf] }
 0x3e4   :  { %2599 = vmatpush.bf16.msrb.mxu3 %v4147_v17  ;;  %2574 = vmatpush.bf16.msra.mxu1 %v4123_v55  ;;  %v4095_v56 = vor.u32 %v4597_v42, %v4094_v23  ;;  %v4070_v17 = vld [vmem:[#allocation4] sm:$0xf]  ;;  %v4075_v55 = vor.u32 %v4590_v40, %v4072_v36 }
 0x3e5   :  { %2586 = vmatpush.bf16.msra.mxu2 %v4143_v6  ;;  %v4595_v6 = vld [vmem:[#allocation4 + $0x2c] sm:$0xf] }
 0x3e8   :  { %2600 = vmatpush.bf16.msrb.mxu3 %v4131_v3  ;;  %2575 = vmatpush.bf16.msra.mxu1 %v4107_v54 }
 0x3e9   :  { %2587 = vmatpush.bf16.msra.mxu2 %v4127_v57 }
 0x3ec   :  { %2601 = vmatpush.bf16.msrb.mxu3 %v4115_v44  ;;  %2576 = vmatpush.bf16.msra.mxu1 %v4091_v41 }
 0x3ed   :  { %2588 = vmatpush.bf16.msra.mxu2 %v4111_v47 }
 0x3f0   :  { %2577 = vmatpush.bf16.msra.mxu1 %v4075_v55  ;;  %v4297_v55 = vld [vmem:[#allocation4 + $0xc0] sm:$0xf] }
 0x3f1   :  { %2589 = vmatpush.bf16.msra.mxu2 %v4095_v56 }
 0x45f   :  { %v2245_v43 = vpop.f32.mrf.mxu0  ;;  %v2258_v60 = vpop.f32.mrf.mxu1 }
 0x460   :  { %v2288_v30 = vadd.f32 %v2245_v43, %v304_v7  ;;  %v2289_v33 = vadd.f32 %v2258_v60, %v5207_v2  ;;  %v4103_v2 = vor.u32 %v4600_v62, %v4102_v4  ;;  %v4096_v7 = vld [vmem:[#allocation4 + $0x38] sm:$0xf0]  ;;  %v4592_v43 = vld [vmem:[#allocation4 + $0xc] sm:$0xf0] }
 0x461   :  { %v4099_v61 = vor.u32 %v4595_v6, %v4096_v7 }
 0x462   :  { %v4065_v25 = vmul.f32 -1.442695, %v2288_v30  ;;  %v4066_v13 = vmul.f32 -1.442695, %v2289_v33  ;;  %2562 = vmatpush.bf16.msra.mxu0 %v4103_v2  ;;  %v4078_v33 = vld [vmem:[#allocation4 + $0x8] sm:$0xf] }
 0x463   :  { %v4079_v57 = vor.u32 %v4593_v29, %v4078_v33  ;;  %2602 = vmatpush.bf16.msrb.mxu3 %v4099_v61 }
 0x464   :  { %4754 = vpow2.f32 %v4065_v25  ;;  %v4083_v25 = vor.u32 %v4591_v46, %v4080_v20  ;;  %v4313_v46 = vld [vmem:[#allocation4 + $0xe0] sm:$0xf] }
 0x465   :  { %4756 = vpow2.f32 %v4066_v13  ;;  %2590 = vmatpush.bf16.msra.mxu2 %v4079_v57  ;;  %v4648_v57 = vld [vmem:[#allocation4 + $0xcc] sm:$0xf0] }
 0x466   :  { %v2271_v16 = vpop.f32.mrf.mxu2  ;;  %v2284_v34 = vpop.f32.mrf.mxu3  ;;  %2563 = vmatpush.bf16.msra.mxu0 %v4087_v39  ;;  %v4298_v20 = vor.u32 %v4648_v57, %v4297_v55  ;;  %v4641_v57 = vld [vmem:[#allocation4 + $0x94] sm:$0xf0] }
 0x467   :  { %v2291_v19 = vadd.f32 %v2284_v34, %v5180_v45  ;;  %v2247_v26 = vpop.f32.mrf.mxu0  ;;  %v2260_v37 = vpop.f32.mrf.mxu1  ;;  %v4071_v45 = vor.u32 %v4592_v43, %v4070_v17  ;;  %2603 = vmatpush.bf16.msrb.mxu3 %v4083_v25  ;;  %v2290_v2 = vadd.f32 %v2271_v16, %v5212_v14  ;;  %v4644_v25 = vld [vmem:[#allocation4 + $0xac] sm:$0xf0] }
 0x469   :  { %v4067_v60 = vmul.f32 -1.442695, %v2291_v19 }
 0x46a   :  { %v4755_v30 = vpop.eup %4754  ;;  %2564 = vmatpush.bf16.msra.mxu0 %v4071_v45 }
 0x46b   :  { %v4757_v48 = vpop.eup %4756  ;;  %v2295_v0 = vadd.f32 1.0, %v4755_v30  ;;  %4758 = vpow2.f32 %v4067_v60 }
 0x46c   :  { %v2314_v1 = vadd.f32 1.0, %v4757_v48  ;;  %v4652_v48 = vld [vmem:[#allocation4 + $0xec] sm:$0xf0] }
 0x46d   :  { %4760 = vrcp.f32 %v2295_v0  ;;  %v2307_v8 = vand.u32 2147483648, %v2295_v0  ;;  %v2305_v34 = vand.u32 2147483647, %v2295_v0  ;;  %vm2301_vm14 = vweird.f32 %v2295_v0 }
 0x46e   :  { %4762 = vrcp.f32 %v2314_v1  ;;  %v2273_v13 = vpop.f32.mrf.mxu2  ;;  %v2286_v3 = vpop.f32.mrf.mxu3  ;;  %v2326_v11 = vand.u32 2147483648, %v2314_v1  ;;  %v2324_v28 = vand.u32 2147483647, %v2314_v1  ;;  %vm2320_vm15 = vweird.f32 %v2314_v1 }
 0x46f   :  { %v2308_v14 = vor.u32 1.1754944e-38, %v2307_v8  ;;  %vm2306_vm2 = vcmp.eq.f32.partialorder %v2305_v34, 8.507059e+37  ;;  %v4265_v3 = vld [vmem:[#allocation4 + $0x80] sm:$0xf]  ;;  %v4636_v34 = vld [vmem:[#allocation4 + $0x6c] sm:$0xf0] }
 0x470   :  { %v2327_v26 = vor.u32 1.1754944e-38, %v2326_v11  ;;  %vm2325_vm3 = vcmp.eq.f32.partialorder %v2324_v28, 8.507059e+37  ;;  %v4646_v28 = vld [vmem:[#allocation4 + $0xc4] sm:$0xf] }
 0x471   :  { %v4759_v4 = vpop.eup %4758 }
 0x472   :  { %v2334_v62 = vadd.f32 1.0, %v4759_v4  ;;  %v4640_v4 = vld [vmem:[#allocation4 + $0x8c] sm:$0xf0] }
 0x473   :  { %v4761_v5 = vpop.eup %4760 }
 0x474   :  { %v4763_v63 = vpop.eup %4762  ;;  %v2297_v49 = vmul.f32 %v4761_v5, %v2295_v0  ;;  %4764 = vrcp.f32 %v2334_v62  ;;  %vm2302_vm12 = vweird.f32 %v4761_v5  ;;  %v2346_v61 = vand.u32 2147483648, %v2334_v62 }
 0x475   :  { %v2316_v12 = vmul.f32 %v4763_v63, %v2314_v1  ;;  %4766 = vtanh.f32 %v2290_v2  ;;  %vm2321_vm13 = vweird.f32 %v4763_v63  ;;  %vm2303_vm0 = vmor %vm2301_vm14, %vm2302_vm12  ;;  %vm2340_vm5 = vweird.f32 %v2334_v62  ;;  %v4281_v1 = vld [vmem:[#allocation4 + $0xa0] sm:$0xf]  ;;  %v4315_v2 = vld [vmem:[#allocation4 + $0xf0] sm:$0xf0] }
 0x476   :  { %v2298_v54 = vsub.f32 1.0, %v2297_v49  ;;  %vm2322_vm1 = vmor %vm2320_vm15, %vm2321_vm13  ;;  %v2344_v40 = vand.u32 2147483647, %v2334_v62  ;;  %v2347_v30 = vor.u32 1.1754944e-38, %v2346_v61  ;;  %v4314_v0 = vor.u32 %v4652_v48, %v4313_v46  ;;  %v4643_v61 = vld [vmem:[#allocation4 + $0xac] sm:$0xf] }
 0x477   :  { %v2317_v47 = vsub.f32 1.0, %v2316_v12  ;;  %v4282_v13 = vor.u32 %v4644_v25, %v4281_v1  ;;  %v4653_v12 = vld [vmem:[#allocation4 + $0xf4] sm:$0xf0]  ;;  %v4638_v46 = vld [vmem:[#allocation4 + $0x84] sm:$0xf] }
 0x478   :  { %v2299_v15 = vmul.f32 %v4761_v5, %v2298_v54  ;;  %vm2345_vm7 = vcmp.eq.f32.partialorder %v2344_v40, 8.507059e+37  ;;  %2878 = vmatpush.bf16.msrb.mxu0 %v4314_v0  ;;  %v4651_v54 = vld [vmem:[#allocation4 + $0xec] sm:$0xf]  ;;  %v4291_v40 = vld [vmem:[#allocation4 + $0xb8] sm:$0xf0] }
 0x479   :  { %v2318_v44 = vmul.f32 %v4763_v63, %v2317_v47  ;;  %v4323_v47 = vld [vmem:[#allocation4 + $0xf8] sm:$0xf0]  ;;  %v4267_v48 = vld [vmem:[#allocation4 + $0x90] sm:$0xf0]  ;;  %v4273_v0 = vld [vmem:[#allocation4 + $0x88] sm:$0xf] }
 0x47a   :  { %v4765_v18 = vpop.eup %4764  ;;  %v2300_v38 = vadd.f32 %v4761_v5, %v2299_v15  ;;  %v4326_v11 = vor.u32 %v4651_v54, %v4323_v47  ;;  %v4249_v15 = vld [vmem:[#allocation4 + $0x60] sm:$0xf]  ;;  %v4270_v55 = vor.u32 %v4638_v46, %v4267_v48  ;;  %v4275_v1 = vld [vmem:[#allocation4 + $0x98] sm:$0xf0]  ;;  %v4274_v25 = vor.u32 %v4641_v57, %v4273_v0  ;;  %v4637_v47 = vld [vmem:[#allocation4 + $0x74] sm:$0xf0] }
 0x47b   :  { %v2319_v16 = vadd.f32 %v4763_v63, %v2318_v44  ;;  %v2336_v19 = vmul.f32 %v4765_v18, %v2334_v62  ;;  %v4767_v39 = vpop.eup %4766  ;;  %vm2341_vm4 = vweird.f32 %v4765_v18  ;;  %v4266_v62 = vor.u32 %v4640_v4, %v4265_v3  ;;  %v4201_v3 = vld [vmem:[#allocation4] sm:$0xf]  ;;  %v4624_v4 = vld [vmem:[#allocation4 + $0xc] sm:$0xf0]  ;;  %v4659_v48 = vld [vmem:[%s5428_s4 + $0x28] sm:$0xff] }
 0x47c   :  { %v2304_v37 = vsel %vm2303_vm0, %v4761_v5, %v2300_v38  ;;  %vm2342_vm6 = vmor %vm2340_vm5, %vm2341_vm4  ;;  %2879 = vmatpush.bf16.msrb.mxu0 %v4298_v20  ;;  %v4650_v5 = vld [vmem:[#allocation4 + $0xe4] sm:$0xf]  ;;  %2917 = vmatpush.bf16.msra.mxu3 %v4326_v11  ;;  %v4250_v44 = vor.u32 %v4636_v34, %v4249_v15  ;;  %v4305_v38 = vld [vmem:[#allocation4 + $0xc8] sm:$0xf] }
 0x47d   :  { %v2309_v23 = vsel %vm2306_vm2, %v2308_v14, %v2304_v37  ;;  %v2323_v42 = vsel %vm2322_vm1, %v4763_v63, %v2319_v16  ;;  %v2337_v6 = vsub.f32 1.0, %v2336_v19  ;;  %v4321_v63 = vld [vmem:[#allocation4 + $0xe8] sm:$0xf]  ;;  %v4318_v49 = vor.u32 %v4650_v5, %v4315_v2  ;;  %v4649_v16 = vld [vmem:[#allocation4 + $0xd4] sm:$0xf0] }
 0x47e   :  { %v2328_v41 = vsel %vm2325_vm3, %v2327_v26, %v2323_v42  ;;  %v2351_v56 = vmul.f32 %v4767_v39, %v2309_v23  ;;  %v4322_v8 = vor.u32 %v4653_v12, %v4321_v63  ;;  %v4647_v19 = vld [vmem:[#allocation4 + $0xcc] sm:$0xf]  ;;  %v4307_v26 = vld [vmem:[#allocation4 + $0xd8] sm:$0xf0]  ;;  %v4306_v37 = vor.u32 %v4649_v16, %v4305_v38  ;;  %v4233_v23 = vld [vmem:[#allocation4 + $0x40] sm:$0xf] }
 0x47f   :  { %v2350_v7 = vmul.f32 %v2328_v41, %v5312_v21  ;;  %v2338_v17 = vmul.f32 %v4765_v18, %v2337_v6  ;;  %2891 = vmatpush.bf16.msrb.mxu1 %v4318_v49  ;;  %v4310_v39 = vor.u32 %v4647_v19, %v4307_v26  ;;  %v4632_v42 = vld [vmem:[#allocation4 + $0x4c] sm:$0xf0]  ;;  %v4642_v41 = vld [vmem:[#allocation4 + $0xa4] sm:$0xf]  ;;  %v4639_v20 = vld [vmem:[#allocation4 + $0x8c] sm:$0xf] }
 0x480   :  { %2880 = vmatpush.bf16.msrb.mxu0 %v4282_v13  ;;  %2904 = vmatpush.bf16.msrb.mxu2 %v4322_v8  ;;  %v4234_v6 = vor.u32 %v4632_v42, %v4233_v23  ;;  %v4278_v13 = vor.u32 %v4639_v20, %v4275_v1  ;;  %v4634_v5 = vld [vmem:[#allocation4 + $0x64] sm:$0xf]  ;;  %v4251_v2 = vld [vmem:[#allocation4 + $0x70] sm:$0xf0]  ;;  %v4257_v63 = vld [vmem:[#allocation4 + $0x68] sm:$0xf] }
 0x481   :  { %v5325_v43 = vadd.f32 %v2351_v56, %v2350_v7  ;;  %v2339_v60 = vadd.f32 %v4765_v18, %v2338_v17  ;;  %2918 = vmatpush.bf16.msra.mxu3 %v4310_v39  ;;  %v4283_v56 = vld [vmem:[#allocation4 + $0xb0] sm:$0xf0]  ;;  %v4289_v7 = vld [vmem:[#allocation4 + $0xa8] sm:$0xf]  ;;  %v4254_v54 = vor.u32 %v4634_v5, %v4251_v2  ;;  %v4635_v8 = vld [vmem:[#allocation4 + $0x6c] sm:$0xf] }
 0x482   :  { %v4286_v17 = vor.u32 %v4642_v41, %v4283_v56  ;;  %v4259_v11 = vld [vmem:[#allocation4 + $0x78] sm:$0xf0]  ;;  %v4630_v16 = vld [vmem:[#allocation4 + $0x44] sm:$0xf]  ;;  %v4235_v19 = vld [vmem:[#allocation4 + $0x50] sm:$0xf0] }
 0x483   :  { %4768 = vtanh.f32 %v5325_v43  ;;  %v2343_v36 = vsel %vm2342_vm6, %v4765_v18, %v2339_v60  ;;  %v4299_v18 = vld [vmem:[#allocation4 + $0xd0] sm:$0xf0]  ;;  %v4645_v60 = vld [vmem:[#allocation4 + $0xb4] sm:$0xf0]  ;;  %v4241_v26 = vld [vmem:[#allocation4 + $0x48] sm:$0xf] }
 0x484   :  { %v2348_v33 = vsel %vm2345_vm7, %v2347_v30, %v2343_v36  ;;  %2881 = vmatpush.bf16.msrb.mxu0 %v4266_v62  ;;  %v4302_v14 = vor.u32 %v4646_v28, %v4299_v18  ;;  %2905 = vmatpush.bf16.msrb.mxu2 %v4306_v37  ;;  %v4290_v36 = vor.u32 %v4645_v60, %v4289_v7  ;;  %v4661_v18 = vld [vmem:[%s5428_s4 + $0x38] sm:$0xff]  ;;  %v4631_v39 = vld [vmem:[#allocation4 + $0x4c] sm:$0xf]  ;;  %v4660_v42 = vld [vmem:[%s5428_s4 + $0x30] sm:$0xff] }
 0x485   :  { %v4294_v30 = vor.u32 %v4643_v61, %v4291_v40  ;;  %v4202_v62 = vor.u32 %v4624_v4, %v4201_v3  ;;  %v4262_v28 = vor.u32 %v4635_v8, %v4259_v11  ;;  %v4633_v37 = vld [vmem:[#allocation4 + $0x54] sm:$0xf0]  ;;  %v4243_v23 = vld [vmem:[#allocation4 + $0x58] sm:$0xf0]  ;;  %v4626_v41 = vld [vmem:[#allocation4 + $0x24] sm:$0xf] }
 0x486   :  { %2892 = vmatpush.bf16.msrb.mxu1 %v4302_v14  ;;  %v4219_v56 = vld [vmem:[#allocation4 + $0x30] sm:$0xf0]  ;;  %v4225_v7 = vld [vmem:[#allocation4 + $0x28] sm:$0xf]  ;;  %v4629_v40 = vld [vmem:[#allocation4 + $0x34] sm:$0xf0] }
 0x487   :  { %2919 = vmatpush.bf16.msra.mxu3 %v4294_v30  ;;  %v4222_v61 = vor.u32 %v4626_v41, %v4219_v56  ;;  %v4227_v30 = vld [vmem:[#allocation4 + $0x38] sm:$0xf0]  ;;  %v4226_v46 = vor.u32 %v4629_v40, %v4225_v7  ;;  %v4622_v0 = vld [vmem:[#allocation4 + $0x4] sm:$0xf]  ;;  %v4209_v20 = vld [vmem:[#allocation4 + $0x8] sm:$0xf] }
 0x488   :  { %2882 = vmatpush.bf16.msrb.mxu0 %v4250_v44  ;;  %2906 = vmatpush.bf16.msrb.mxu2 %v4290_v36  ;;  %v4258_v44 = vor.u32 %v4637_v47, %v4257_v63  ;;  %v4627_v36 = vld [vmem:[#allocation4 + $0x2c] sm:$0xf]  ;;  %v4625_v1 = vld [vmem:[#allocation4 + $0x14] sm:$0xf0]  ;;  %v4211_v3 = vld [vmem:[#allocation4 + $0x18] sm:$0xf0] }
 0x489   :  { %v4769_v45 = vpop.eup %4768  ;;  %v4230_v57 = vor.u32 %v4627_v36, %v4227_v30  ;;  %v4657_v8 = vld [vmem:[%s5428_s4 + $0x18] sm:$0xff] }
 0x48a   :  { %v5328_v29 = vmul.f32 %v4769_v45, %v2348_v33  ;;  %2893 = vmatpush.bf16.msrb.mxu1 %v4286_v17  ;;  %v4217_v45 = vld [vmem:[#allocation4 + $0x20] sm:$0xf]  ;;  %v4628_v33 = vld [vmem:[#allocation4 + $0x2c] sm:$0xf0] }
 0x48b   :  { %2920 = vmatpush.bf16.msra.mxu3 %v4278_v13 }
 0x48c   :  { %v2364_v21 = vpack.c.bf16 %v5328_v29, %v5328_v29  ;;  %2883 = vmatpush.bf16.msrb.mxu0 %v4234_v6  ;;  %2907 = vmatpush.bf16.msrb.mxu2 %v4274_v25  ;;  %v4246_v6 = vor.u32 %v4631_v39, %v4243_v23  ;;  %v4623_v25 = vld [vmem:[#allocation4 + $0xc] sm:$0xf] }
 0x48d   :  { %v4214_v63 = vor.u32 %v4623_v25, %v4211_v3 }
 0x48e   :  { %2565 = vmatmul.bf16.vlgmr.msra.gmra.mxu0 %v2364_v21  ;;  %2578 = vmatmul.bf16.vlgmr.msra.gmra.mxu1 %v2364_v21 }
 0x48f   :  { %2591 = vmatmul.bf16.vlgmr.msra.gmra.mxu2 %v2364_v21  ;;  %2604 = vmatmul.bf16.vlgmr.msrb.gmra.mxu3 %v2364_v21  ;;  %v4218_v21 = vor.u32 %v4628_v33, %v4217_v45 }
 0x490   :  { %2894 = vmatpush.bf16.msrb.mxu1 %v4270_v55  ;;  %2908 = vmatpush.bf16.msrb.mxu2 %v4258_v44  ;;  %v4203_v55 = vld [vmem:[#allocation4 + $0x10] sm:$0xf0] }
 0x491   :  { %2884 = vmatpush.bf16.msrb.mxu0 %v4218_v21  ;;  %2921 = vmatpush.bf16.msra.mxu3 %v4262_v28  ;;  %v4656_v28 = vld [vmem:[%s5428_s4 + $0x10] sm:$0xff] }
 0x494   :  { %2895 = vmatpush.bf16.msrb.mxu1 %v4254_v54 }
 0x495   :  { %2885 = vmatpush.bf16.msrb.mxu0 %v4202_v62  ;;  %2922 = vmatpush.bf16.msra.mxu3 %v4246_v6  ;;  %v4210_v62 = vor.u32 %v4625_v1, %v4209_v20 }
 0x499   :  { %3081 = vmatpush.bf16.msra.mxu0 %v4661_v18  ;;  %2923 = vmatpush.bf16.msra.mxu3 %v4230_v57 }
 0x49d   :  { %3082 = vmatpush.bf16.msra.mxu0 %v4660_v42  ;;  %2924 = vmatpush.bf16.msra.mxu3 %v4214_v63 }
 0x4a1   :  { %3083 = vmatpush.bf16.msra.mxu0 %v4659_v48 }
 0x50b   :  { %v2566_v49 = vpop.f32.mrf.mxu0  ;;  %v2579_v12 = vpop.f32.mrf.mxu1 }
 0x50c   :  { %v2609_v15 = vadd.f32 %v2566_v49, %v5150_v27  ;;  %v2610_v34 = vadd.f32 %v2579_v12, %v5215_v32  ;;  %v4238_v27 = vor.u32 %v4630_v16, %v4235_v19  ;;  %v4242_v32 = vor.u32 %v4633_v37, %v4241_v26  ;;  %v4658_v49 = vld [vmem:[%s5428_s4 + $0x20] sm:$0xff]  ;;  %v4655_v37 = vld [vmem:[%s5428_s4 + $0x8] sm:$0xff] }
 0x50d   :  { %3084 = vmatpush.bf16.msra.mxu0 %v4658_v49 }
 0x50e   :  { %v4196_v38 = vmul.f32 -1.442695, %v2609_v15  ;;  %v4197_v14 = vmul.f32 -1.442695, %v2610_v34  ;;  %2896 = vmatpush.bf16.msrb.mxu1 %v4238_v27  ;;  %2909 = vmatpush.bf16.msrb.mxu2 %v4242_v32 }
 0x510   :  { %4770 = vpow2.f32 %v4196_v38 }
 0x511   :  { %4772 = vpow2.f32 %v4197_v14  ;;  %3085 = vmatpush.bf16.msra.mxu0 %v4657_v8 }
 0x512   :  { %v2592_v17 = vpop.f32.mrf.mxu2  ;;  %v2605_v60 = vpop.f32.mrf.mxu3  ;;  %2897 = vmatpush.bf16.msrb.mxu1 %v4222_v61  ;;  %2910 = vmatpush.bf16.msrb.mxu2 %v4226_v46 }
 0x513   :  { %v2612_v45 = vadd.f32 %v2605_v60, %v5189_v51  ;;  %v2568_v33 = vpop.f32.mrf.mxu0  ;;  %v2581_v21 = vpop.f32.mrf.mxu1  ;;  %v4206_v51 = vor.u32 %v4622_v0, %v4203_v55  ;;  %v2611_v44 = vadd.f32 %v2592_v17, %v5221_v9  ;;  %v4654_v17 = vld [vmem:[%s5428_s4] sm:$0xff] }
 0x515   :  { %v4198_v13 = vmul.f32 -1.442695, %v2612_v45  ;;  %3086 = vmatpush.bf16.msra.mxu0 %v4656_v28 }
 0x516   :  { %v4771_v4 = vpop.eup %4770  ;;  %2898 = vmatpush.bf16.msrb.mxu1 %v4206_v51  ;;  %2911 = vmatpush.bf16.msrb.mxu2 %v4210_v62  ;;  %v3009_v51 = vpack.c.bf16 %v5275_v22, %v5252_v59  ;;  %v3010_v62 = vpack.c.bf16 %v5303_v50, %v5290_v24 }
 0x517   :  { %v4773_v5 = vpop.eup %4772  ;;  %v2616_v2 = vadd.f32 1.0, %v4771_v4  ;;  %4774 = vpow2.f32 %v4198_v13 }
 0x518   :  { %v2635_v12 = vadd.f32 1.0, %v4773_v5  ;;  %v3011_v5 = vpack.c.bf16 %v5328_v29, %v5315_v35 }
 0x519   :  { %4776 = vrcp.f32 %v2616_v2  ;;  %v2628_v26 = vand.u32 2147483648, %v2616_v2  ;;  %v2626_v32 = vand.u32 2147483647, %v2616_v2  ;;  %vm2622_vm10 = vweird.f32 %v2616_v2  ;;  %3087 = vmatpush.bf16.msra.mxu0 %v4655_v37 }
 0x51a   :  { %4778 = vrcp.f32 %v2635_v12  ;;  %v2594_v54 = vpop.f32.mrf.mxu2  ;;  %v2607_v47 = vpop.f32.mrf.mxu3  ;;  %v2647_v27 = vand.u32 2147483648, %v2635_v12  ;;  %v2645_v23 = vand.u32 2147483647, %v2635_v12  ;;  %vm2641_vm11 = vweird.f32 %v2635_v12 }
 0x51b   :  { %v2629_v41 = vor.u32 1.1754944e-38, %v2628_v26  ;;  %vm2627_vm14 = vcmp.eq.f32.partialorder %v2626_v32, 8.507059e+37 }
 0x51c   :  { %v2648_v60 = vor.u32 1.1754944e-38, %v2647_v27  ;;  %vm2646_vm15 = vcmp.eq.f32.partialorder %v2645_v23, 8.507059e+37 }
 0x51d   :  { %v4775_v11 = vpop.eup %4774  ;;  %3088 = vmatpush.bf16.msra.mxu0 %v4654_v17 }
 0x51e   :  { %v2655_v15 = vadd.f32 1.0, %v4775_v11 }
 0x51f   :  { %v4777_v34 = vpop.eup %4776 }
 0x520   :  { %v4779_v18 = vpop.eup %4778  ;;  %v2618_v38 = vmul.f32 %v4777_v34, %v2616_v2  ;;  %4780 = vrcp.f32 %v2655_v15  ;;  %vm2623_vm8 = vweird.f32 %v4777_v34  ;;  %v2667_v57 = vand.u32 2147483648, %v2655_v15 }
 0x521   :  { %v2637_v14 = vmul.f32 %v4779_v18, %v2635_v12  ;;  %4782 = vtanh.f32 %v2611_v44  ;;  %vm2642_vm9 = vweird.f32 %v4779_v18  ;;  %vm2624_vm12 = vmor %vm2622_vm10, %vm2623_vm8  ;;  %vm2661_vm1 = vweird.f32 %v2655_v15 }
 0x522   :  { %v2619_v16 = vsub.f32 1.0, %v2618_v38  ;;  %vm2643_vm13 = vmor %vm2641_vm11, %vm2642_vm9  ;;  %v2665_v20 = vand.u32 2147483647, %v2655_v15  ;;  %v2668_v25 = vor.u32 1.1754944e-38, %v2667_v57  ;;  %v309_v2 = vadd.f32 %v5157_v31, %v5129_v10  ;;  %v5381_v31 = vld [vmem:[%s5429_s5] ss:$0 sm:$0xff] }
 0x523   :  { %v2638_v19 = vsub.f32 1.0, %v2637_v14 }
 0x524   :  { %v2620_v9 = vmul.f32 %v4777_v34, %v2619_v16  ;;  %vm2666_vm3 = vcmp.eq.f32.partialorder %v2665_v20, 8.507059e+37 }
 0x525   :  { %v2639_v39 = vmul.f32 %v4779_v18, %v2638_v19 }
 0x526   :  { %v4781_v42 = vpop.eup %4780  ;;  %v2621_v6 = vadd.f32 %v4777_v34, %v2620_v9 }
 0x527   :  { %v2640_v56 = vadd.f32 %v4779_v18, %v2639_v39  ;;  %v2657_v7 = vmul.f32 %v4781_v42, %v2655_v15  ;;  %v4783_v40 = vpop.eup %4782  ;;  %vm2662_vm0 = vweird.f32 %v4781_v42 }
 0x528   :  { %v2625_v61 = vsel %vm2624_vm12, %v4777_v34, %v2621_v6  ;;  %vm2663_vm2 = vmor %vm2661_vm1, %vm2662_vm0 }
 0x529   :  { %v2630_v36 = vsel %vm2627_vm14, %v2629_v41, %v2625_v61  ;;  %v2644_v30 = vsel %vm2643_vm13, %v4779_v18, %v2640_v56  ;;  %v2658_v45 = vsub.f32 1.0, %v2657_v7 }
 0x52a   :  { %v2649_v33 = vsel %vm2646_vm15, %v2648_v60, %v2644_v30  ;;  %v2672_v21 = vmul.f32 %v4783_v40, %v2630_v36 }
 0x52b   :  { %v2671_v46 = vmul.f32 %v2649_v33, %v5325_v43  ;;  %v2659_v48 = vmul.f32 %v4781_v42, %v2658_v45 }
 0x52d   :  { %v5361_v0 = vadd.f32 %v2672_v21, %v2671_v46  ;;  %v2660_v55 = vadd.f32 %v4781_v42, %v2659_v48 }
 0x52f   :  { %4784 = vtanh.f32 %v5361_v0  ;;  %v2664_v1 = vsel %vm2663_vm2, %v4781_v42, %v2660_v55 }
 0x530   :  { %v2669_v3 = vsel %vm2666_vm3, %v2668_v25, %v2664_v1 }
 0x535   :  { %v4785_v13 = vpop.eup %4784 }
 0x536   :  { %v5364_v4 = vmul.f32 %v4785_v13, %v2669_v3 }
 0x538   :  { %v2685_v43 = vpack.c.bf16 %v5364_v4, %v5364_v4 }
 0x53a   :  { %2886 = vmatmul.bf16.vlgmr.msrb.gmra.mxu0 %v2685_v43  ;;  %2899 = vmatmul.bf16.vlgmr.msrb.gmra.mxu1 %v2685_v43 }
 0x53b   :  { %2912 = vmatmul.bf16.vlgmr.msrb.gmra.mxu2 %v2685_v43  ;;  %2925 = vmatmul.bf16.vlgmr.msra.gmra.mxu3 %v2685_v43 }
 0x54a   :  { %3089 = vmatmul.bf16.vlgmr.msra.gmra.mxu0 %v3009_v51 }
 0x55a   :  { %3094 = vmatmul.bf16.gmra.mxu0 %v3010_v62 }
 0x56a   :  { %3099 = vmatmul.bf16.gmra.mxu0 %v3011_v5 }
 0x5b7   :  { %v2887_v63 = vpop.f32.mrf.mxu0  ;;  %v2900_v49 = vpop.f32.mrf.mxu1 }
 0x5b8   :  { %v2930_v12 = vadd.f32 %v2887_v63, %v309_v2  ;;  %v2931_v54 = vadd.f32 %v2900_v49, %v5226_v53 }
 0x5ba   :  { %v4327_v47 = vmul.f32 -1.442695, %v2930_v12  ;;  %v4328_v8 = vmul.f32 -1.442695, %v2931_v54 }
 0x5bc   :  { %4786 = vpow2.f32 %v4327_v47 }
 0x5bd   :  { %4788 = vpow2.f32 %v4328_v8 }
 0x5be   :  { %v2913_v59 = vpop.f32.mrf.mxu2  ;;  %v2926_v22 = vpop.f32.mrf.mxu3 }
 0x5bf   :  { %v2933_v24 = vadd.f32 %v2926_v22, %v5198_v58  ;;  %v2889_v50 = vpop.f32.mrf.mxu0  ;;  %v2902_v11 = vpop.f32.mrf.mxu1  ;;  %v2932_v16 = vadd.f32 %v2913_v59, %v5233_v52 }
 0x5c1   :  { %v4329_v35 = vmul.f32 -1.442695, %v2933_v24 }
 0x5c2   :  { %v4787_v29 = vpop.eup %4786 }
 0x5c3   :  { %v4789_v15 = vpop.eup %4788  ;;  %v2937_v34 = vadd.f32 1.0, %v4787_v29  ;;  %4790 = vpow2.f32 %v4329_v35 }
 0x5c4   :  { %v2956_v10 = vadd.f32 1.0, %v4789_v15 }
 0x5c5   :  { %4792 = vrcp.f32 %v2937_v34  ;;  %v2947_v32 = vand.u32 2147483647, %v2937_v34  ;;  %v2949_v39 = vand.u32 2147483648, %v2937_v34  ;;  %vm2943_vm6 = vweird.f32 %v2937_v34 }
 0x5c6   :  { %4794 = vrcp.f32 %v2956_v10  ;;  %v2915_v53 = vpop.f32.mrf.mxu2  ;;  %v2928_v44 = vpop.f32.mrf.mxu3  ;;  %v2968_v42 = vand.u32 2147483648, %v2956_v10  ;;  %v2966_v7 = vand.u32 2147483647, %v2956_v10  ;;  %vm2962_vm7 = vweird.f32 %v2956_v10 }
 0x5c7   :  { %v3090_v28 = vpop.f32.mrf.mxu0  ;;  %v2950_v60 = vor.u32 1.1754944e-38, %v2949_v39  ;;  %vm2948_vm10 = vcmp.eq.f32.partialorder %v2947_v32, 8.507059e+37 }
 0x5c8   :  { %v3091_v58 = vadd.f32 %v5381_v31, %v3090_v28  ;;  %v2969_v36 = vor.u32 1.1754944e-38, %v2968_v42  ;;  %vm2967_vm11 = vcmp.eq.f32.partialorder %v2966_v7, 8.507059e+37 }
 0x5c9   :  { %v4791_v18 = vpop.eup %4790 }
 0x5ca   :  { %v2976_v38 = vadd.f32 1.0, %v4791_v18  ;;  %3110 = vst [vmem:[%s5432_s8] sm:$0xff] %v3091_v58 }
 0x5cb   :  { %v4793_v14 = vpop.eup %4792 }
 0x5cc   :  { %v4795_v19 = vpop.eup %4794  ;;  %v2939_v26 = vmul.f32 %v4793_v14, %v2937_v34  ;;  %4796 = vrcp.f32 %v2976_v38  ;;  %vm2944_vm4 = vweird.f32 %v4793_v14  ;;  %v2988_v43 = vand.u32 2147483648, %v2976_v38 }
 0x5cd   :  { %v2958_v37 = vmul.f32 %v4795_v19, %v2956_v10  ;;  %4798 = vtanh.f32 %v2932_v16  ;;  %vm2963_vm5 = vweird.f32 %v4795_v19  ;;  %vm2945_vm8 = vmor %vm2943_vm6, %vm2944_vm4  ;;  %vm2982_vm13 = vweird.f32 %v2976_v38 }
 0x5ce   :  { %v2940_v27 = vsub.f32 1.0, %v2939_v26  ;;  %vm2964_vm9 = vmor %vm2962_vm7, %vm2963_vm5  ;;  %v2986_v51 = vand.u32 2147483647, %v2976_v38  ;;  %v2989_v5 = vor.u32 1.1754944e-38, %v2988_v43 }
 0x5cf   :  { %v2959_v9 = vsub.f32 1.0, %v2958_v37  ;;  %v3092_v23 = vpop.f32.mrf.mxu0 }
 0x5d0   :  { %v2941_v6 = vmul.f32 %v4793_v14, %v2940_v27  ;;  %v3093_v41 = vadd.f32 %v5381_v31, %v3092_v23  ;;  %vm2987_vm15 = vcmp.eq.f32.partialorder %v2986_v51, 8.507059e+37 }
 0x5d1   :  { %v2960_v56 = vmul.f32 %v4795_v19, %v2959_v9 }
 0x5d2   :  { %v4797_v17 = vpop.eup %4796  ;;  %v2942_v52 = vadd.f32 %v4793_v14, %v2941_v6  ;;  %3111 = vst [vmem:[%s5432_s8 + $0x8] sm:$0xff] %v3093_v41 }
 0x5d3   :  { %v2961_v61 = vadd.f32 %v4795_v19, %v2960_v56  ;;  %v2978_v40 = vmul.f32 %v4797_v17, %v2976_v38  ;;  %v4799_v45 = vpop.eup %4798  ;;  %vm2983_vm12 = vweird.f32 %v4797_v17 }
 0x5d4   :  { %v2946_v30 = vsel %vm2945_vm8, %v4793_v14, %v2942_v52  ;;  %vm2984_vm14 = vmor %vm2982_vm13, %vm2983_vm12 }
 0x5d5   :  { %v2951_v33 = vsel %vm2948_vm10, %v2950_v60, %v2946_v30  ;;  %v2965_v21 = vsel %vm2964_vm9, %v4795_v19, %v2961_v61  ;;  %v2979_v46 = vsub.f32 1.0, %v2978_v40 }
 0x5d6   :  { %v2970_v48 = vsel %vm2967_vm11, %v2969_v36, %v2965_v21  ;;  %v2993_v55 = vmul.f32 %v4799_v45, %v2951_v33 }
 0x5d7   :  { %v2992_v57 = vmul.f32 %v2970_v48, %v5361_v0  ;;  %v3095_v20 = vpop.f32.mrf.mxu0  ;;  %v2980_v1 = vmul.f32 %v4797_v17, %v2979_v46 }
 0x5d8   :  { %v3096_v25 = vadd.f32 %v5381_v31, %v3095_v20 }
 0x5d9   :  { %v2994_v13 = vadd.f32 %v2993_v55, %v2992_v57  ;;  %v2981_v3 = vadd.f32 %v4797_v17, %v2980_v1 }
 0x5da   :  { %3112 = vst [vmem:[%s5432_s8 + $0x10] sm:$0xff] %v3096_v25 }
 0x5db   :  { %3000 = vst [vmem:[%s5434_s10] sm:$0xff] %v2994_v13  ;;  %4800 = vtanh.f32 %v2994_v13  ;;  %v2985_v0 = vsel %vm2984_vm14, %v4797_v17, %v2981_v3 }
 0x5dc   :  { %v2990_v49 = vsel %vm2987_vm15, %v2989_v5, %v2985_v0 }
 0x5df   :  { %v3097_v62 = vpop.f32.mrf.mxu0 }
 0x5e0   :  { %v3098_v2 = vadd.f32 %v5381_v31, %v3097_v62 }
 0x5e1   :  { %v4801_v63 = vpop.eup %4800 }
 0x5e2   :  { %3113 = vst [vmem:[%s5432_s8 + $0x18] sm:$0xff] %v3098_v2  ;;  %v2996_v12 = vmul.f32 %v4801_v63, %v2990_v49 }
 0x5e4   :  { %2999 = vst [vmem:[%s5433_s9] sm:$0xff] %v2996_v12  ;;  %v3012_v54 = vpack.c.bf16 %v2996_v12, %v5364_v4 }
 0x5e6   :  { %3104 = vmatmul.bf16.gmra.mxu0 %v3012_v54 }
 0x5e7   :  { %v3100_v47 = vpop.f32.mrf.mxu0 }
 0x5e8   :  { %v3101_v8 = vadd.f32 %v5381_v31, %v3100_v47 }
 0x5ea   :  { %3114 = vst [vmem:[%s5432_s8 + $0x20] sm:$0xff] %v3101_v8 }
 0x5ef   :  { %v3102_v59 = vpop.f32.mrf.mxu0 }
 0x5f0   :  { %v3103_v22 = vadd.f32 %v5381_v31, %v3102_v59 }
 0x5f2   :  { %3115 = vst [vmem:[%s5432_s8 + $0x28] sm:$0xff] %v3103_v22 }
 0x663   :  { %v3105_v24 = vpop.f32.mrf.mxu0 }
 0x664   :  { %v3106_v50 = vadd.f32 %v5381_v31, %v3105_v24 }
 0x666   :  { %3116 = vst [vmem:[%s5432_s8 + $0x30] sm:$0xff] %v3106_v50 }
 0x66b   :  { %v3107_v4 = vpop.f32.mrf.mxu0 }
 0x66c   :  { %v3108_v11 = vadd.f32 %v5381_v31, %v3107_v4 }
 0x66e   :  { %3117 = vst [vmem:[%s5432_s8 + $0x38] sm:$0xff] %v3108_v11 }
 0x66f   :  { %3130 = vsyncpa [#allocation5], 1 }

</bundles_post_ra>
